<compile_context>
chip_gen: v7x
topology: tpu7x:2x2x1
jax: 0.10.0
libtpu: 0.0.40
codegen_flags: <defaults>
</compile_context>

<pallas_src>
import functools
import math

import jax
import jax.numpy as jnp
from jax.experimental import pallas as pl
from jax.experimental.pallas import tpu as pltpu


# --------------------------------------------------------------------------
# In-kernel helpers (traced inside Pallas kernels)
# --------------------------------------------------------------------------

def _mm(a, w_bf16):
    """MXU matmul: activation cast to bf16, weight already bf16, f32 accumulation."""
    return jnp.dot(a.astype(jnp.bfloat16), w_bf16, preferred_element_type=jnp.float32)


def _layernorm(y, g, b, eps):
    """One-pass LN statistics: var = E[y^2] - mu^2 (shorter reduce chain)."""
    mu = jnp.mean(y, axis=-1, keepdims=True)
    ms = jnp.mean(y * y, axis=-1, keepdims=True)
    var = ms - mu * mu
    return (y - mu) * jax.lax.rsqrt(var + eps) * g + b


def _mha(q, k, v, wo_bf16, num_heads, dh, scale):
    """Multi-head attention with a single head-concatenated output projection.

    q: (Lq, H), k/v: (Lk, H), wo: (H, H) bf16.
    Per-head scores/softmax/AV, then ONE (Lq, H) @ (H, H) output projection
    (full 128-deep contraction) instead of num_heads 32-deep matmuls.
    """
    outs = []
    for h in range(num_heads):
        sl = slice(h * dh, (h + 1) * dh)
        qh = q[:, sl].astype(jnp.bfloat16)
        kh = k[:, sl].astype(jnp.bfloat16)
        vh = v[:, sl].astype(jnp.bfloat16)
        s = jax.lax.dot_general(qh, kh, (((1,), (1,)), ((), ())),
                                preferred_element_type=jnp.float32) * scale
        s = s - jnp.max(s, axis=-1, keepdims=True)
        p = jnp.exp(s)
        p = p * pl.reciprocal(jnp.sum(p, axis=-1, keepdims=True), approx=True)
        outs.append(jnp.dot(p.astype(jnp.bfloat16), vh,
                            preferred_element_type=jnp.float32))
    merged = jnp.concatenate(outs, axis=-1)          # (Lq, H), single lane concat
    return _mm(merged, wo_bf16)                      # one 128-deep output projection


# --------------------------------------------------------------------------
# Kernel A: query_pos_head + self-attn + LN + cross-attn + LN  (one batch element)
# --------------------------------------------------------------------------
# attn_vec rows: 0 qph_b1_lo | 1 qph_b1_hi | 2 qph_b2 |
#                3 sa b_q | 4 sa b_k | 5 sa b_v | 6 sa b_o | 7 sa ln_g | 8 sa ln_b |
#                9 ca b_q | 10 ca b_k | 11 ca b_v | 12 ca b_o | 13 ca ln_g | 14 ca ln_b

def _attn_block_kernel(x_ref, ref_ref, mem_ref,
                       qw1_ref, qw2_ref,
                       wqk_ref, wv_ref, wo_s_ref,
                       wq_c_ref, wkv_ref, wo_c_ref,
                       vec_ref, o_ref, *, num_heads, eps):
    x = x_ref[0]                       # (Q, H) f32
    refp = ref_ref[0]                  # (Q, H) f32, cols 0..3 meaningful
    mem = mem_ref[0]                   # (M, H) f32
    hdim = x.shape[-1]
    dh = hdim // num_heads
    scale = 1.0 / math.sqrt(dh)
    vec = vec_ref[...]                 # (15, H) f32

    # --- query_pos_head: MLP(4 -> 2H -> H); w1 zero-padded to (H, 2H) ---
    b1 = jnp.concatenate([vec[0:1], vec[1:2]], axis=-1)            # (1, 2H)
    h = jnp.maximum(_mm(refp, qw1_ref[...]) + b1, 0.0)             # (Q, 2H)
    pos = _mm(h, qw2_ref[...]) + vec[2:3]                          # (Q, H)

    # --- self-attention (q = k = x + pos, v = x) + residual + LN ---
    qk = _mm(x + pos, wqk_ref[...])                                # (Q, 2H) fused proj
    q = qk[:, :hdim] + vec[3:4]
    k = qk[:, hdim:] + vec[4:5]
    v = _mm(x, wv_ref[...]) + vec[5:6]
    attn = _mha(q, k, v, wo_s_ref[...], num_heads, dh, scale)
    x = _layernorm(x + attn + vec[6:7], vec[7:8], vec[8:9], eps)

    # --- cross-attention (q = x + pos, k = v = memory) + residual + LN ---
    qc = _mm(x + pos, wq_c_ref[...]) + vec[9:10]
    kv = _mm(mem, wkv_ref[...])                                    # (M, 2H) fused proj
    kc = kv[:, :hdim] + vec[10:11]
    vc = kv[:, hdim:] + vec[11:12]
    attn = _mha(qc, kc, vc, wo_c_ref[...], num_heads, dh, scale)
    x = _layernorm(x + attn + vec[12:13], vec[13:14], vec[14:15], eps)

    o_ref[0] = x.astype(o_ref.dtype)


# --------------------------------------------------------------------------
# Kernel B: FFN + LN + bbox-head MLP + sigmoid(delta + inverse_sigmoid(ref))
# --------------------------------------------------------------------------
# ffn_vec rows: 0 ffn b2 | 1 ln_g | 2 ln_b | 3 bbox b1 | 4 bbox b2 | 5 bbox b3 (lane-padded)

def _ffn_bbox_kernel(x_ref, ref_ref, w1_ref, b1_ref, w2_ref,
                     bw1_ref, bw2_ref, bw3_ref, vec_ref,
                     y_ref, nref_ref, *, eps, sig_eps):
    x = x_ref[...]                     # (rows, H)
    vec = vec_ref[...]                 # (6, H)

    # FFN + residual + LN
    h = jnp.maximum(_mm(x, w1_ref[...]) + b1_ref[...], 0.0)
    y = _layernorm(x + _mm(h, w2_ref[...]) + vec[0:1], vec[1:2], vec[2:3], eps)
    y_ref[...] = y.astype(y_ref.dtype)

    # bbox head MLP(H -> H -> H -> 4, lane-padded to H) + ref-point update
    b = jnp.maximum(_mm(y, bw1_ref[...]) + vec[3:4], 0.0)
    b = jnp.maximum(_mm(b, bw2_ref[...]) + vec[4:5], 0.0)
    delta = _mm(b, bw3_ref[...]) + vec[5:6]                        # (rows, H), cols 0..3 real
    r = jnp.clip(ref_ref[...], 0.0, 1.0)
    inv = jnp.log(jnp.maximum(r, sig_eps) / jnp.maximum(1.0 - r, sig_eps))
    nref_ref[...] = jax.nn.sigmoid(delta + inv).astype(nref_ref.dtype)


# --------------------------------------------------------------------------
# pallas_call wrappers
# --------------------------------------------------------------------------

_PARALLEL_1D = pltpu.CompilerParams(dimension_semantics=("parallel",))


def _row_tile(n):
    """Row tile (multiple of 8). Prefer >=2 grid steps (feeds both v7x TensorCores)."""
    for t in (256, 128, 64, 32, 16, 8):
        if n % t == 0 and n // t >= 2:
            return t
    for t in (256, 128, 64, 32, 16, 8):
        if n % t == 0:
            return t
    return n


def fused_attn_block(x, refp, memory, p, num_heads, eps=1e-5):
    B, Q, H = x.shape
    M = memory.shape[1]
    kernel = functools.partial(_attn_block_kernel, num_heads=num_heads, eps=eps)
    full2d = lambda b: (0, 0)
    return pl.pallas_call(
        kernel,
        out_shape=jax.ShapeDtypeStruct((B, Q, H), x.dtype),
        grid=(B,),
        in_specs=[
            pl.BlockSpec((1, Q, H), lambda b: (b, 0, 0)),          # x
            pl.BlockSpec((1, Q, H), lambda b: (b, 0, 0)),          # ref slab
            pl.BlockSpec((1, M, H), lambda b: (b, 0, 0)),          # memory
            pl.BlockSpec((H, 2 * H), full2d),                      # qph w1 (row-padded)
            pl.BlockSpec((2 * H, H), full2d),                      # qph w2
            pl.BlockSpec((H, 2 * H), full2d),                      # self w_qk (fused Q|K)
            pl.BlockSpec((H, H), full2d),                          # self w_v
            pl.BlockSpec((H, H), full2d),                          # self w_o
            pl.BlockSpec((H, H), full2d),                          # cross w_q
            pl.BlockSpec((H, 2 * H), full2d),                      # cross w_kv (fused K|V)
            pl.BlockSpec((H, H), full2d),                          # cross w_o
            pl.BlockSpec((15, H), full2d),                         # packed bias/LN vectors
        ],
        out_specs=pl.BlockSpec((1, Q, H), lambda b: (b, 0, 0)),
        compiler_params=_PARALLEL_1D,
    )(x, refp, memory,
      p["qph_w1"], p["qph_w2"],
      p["w_qk"], p["w_v"], p["w_o_self"],
      p["w_q_cross"], p["w_kv"], p["w_o_cross"],
      p["attn_vec"])


def fused_ffn_bbox(x2d, ref2d, p, eps=1e-5, sig_eps=1e-5):
    N, H = x2d.shape
    F = p["ffn_w1"].shape[1]
    rt = _row_tile(N)
    kernel = functools.partial(_ffn_bbox_kernel, eps=eps, sig_eps=sig_eps)
    full2d = lambda i: (0, 0)
    return pl.pallas_call(
        kernel,
        out_shape=(jax.ShapeDtypeStruct((N, H), x2d.dtype),
                   jax.ShapeDtypeStruct((N, H), x2d.dtype)),
        grid=(N // rt,),
        in_specs=[
            pl.BlockSpec((rt, H), lambda i: (i, 0)),               # x rows
            pl.BlockSpec((rt, H), lambda i: (i, 0)),               # ref rows (lane-padded)
            pl.BlockSpec((H, F), full2d),                          # ffn w1
            pl.BlockSpec((1, F), full2d),                          # ffn b1
            pl.BlockSpec((F, H), full2d),                          # ffn w2
            pl.BlockSpec((H, H), full2d),                          # bbox w1
            pl.BlockSpec((H, H), full2d),                          # bbox w2
            pl.BlockSpec((H, H), full2d),                          # bbox w3 (lane-padded)
            pl.BlockSpec((6, H), full2d),                          # packed bias/LN vectors
        ],
        out_specs=(pl.BlockSpec((rt, H), lambda i: (i, 0)),
                   pl.BlockSpec((rt, H), lambda i: (i, 0))),
        compiler_params=_PARALLEL_1D,
    )(x2d, ref2d, p["ffn_w1"], p["ffn_b1"], p["ffn_w2"],
      p["bbox_w1"], p["bbox_w2"], p["bbox_w3"], p["ffn_vec"])


# --------------------------------------------------------------------------
# Forward pass (eval mode)
# --------------------------------------------------------------------------

def transformer_decoder_forward(tgt, ref_points_unact, memory, params, *,
                                num_layers, eval_idx, num_heads):
    """Eval-mode TransformerDecoder.forward. Returns (1, B, Q, 4)."""
    B, Q, H = tgt.shape
    # Carry ref points as a lane-dense (B, Q, H) slab; only columns 0..3 are meaningful.
    ref_pad = jnp.pad(ref_points_unact, ((0, 0), (0, 0), (0, H - 4)))
    ref_points_detach = jax.nn.sigmoid(ref_pad)

    output = tgt
    dec_out = None
    for i in range(num_layers):
        lp = params["layers"][i]
        # ref_points_input = ref_points_detach[:, :, None, :]  (unused by dense layer)
        output = fused_attn_block(output, ref_points_detach, memory, lp, num_heads)
        y2d, nref2d = fused_ffn_bbox(output.reshape(B * Q, H),
                                     ref_points_detach.reshape(B * Q, H), lp)
        output = y2d.reshape(B, Q, H)
        inter_ref = nref2d.reshape(B, Q, H)
        if i == eval_idx:
            dec_out = inter_ref[:, :, :4]
            break
        ref_points_detach = inter_ref
    return jnp.stack([dec_out])


# --------------------------------------------------------------------------
# Deterministic parameter construction (fused, pre-cast bf16, packed-vector layout)
# --------------------------------------------------------------------------

def make_params(key, hidden_dim, num_layers, num_heads, ffn_dim):
    H = hidden_dim
    keys = iter(jax.random.split(key, 1024))
    wdt = jnp.bfloat16

    def w(din, dout, scale=0.02):
        return (scale * jax.random.normal(next(keys), (din, dout), jnp.float32)).astype(wdt)

    def vrow(scale=0.02):
        return scale * jax.random.normal(next(keys), (H,), jnp.float32)

    ones = jnp.ones((H,), jnp.float32)
    zeros = jnp.zeros((H,), jnp.float32)

    # Shared query_pos_head: MLP(4 -> 2H -> H); first-layer weight row-padded to (H, 2H).
    qph_w1 = jnp.zeros((H, 2 * H), jnp.float32).at[:4].set(
        0.02 * jax.random.normal(next(keys), (4, 2 * H), jnp.float32)).astype(wdt)
    qph_w2 = w(2 * H, H)
    qph_b1 = 0.02 * jax.random.normal(next(keys), (2 * H,), jnp.float32)
    qph_b2 = vrow()

    layers = []
    for _ in range(num_layers):
        p = {
            "qph_w1": qph_w1, "qph_w2": qph_w2,                    # shared module (aliased)
            "w_qk": w(H, 2 * H), "w_v": w(H, H), "w_o_self": w(H, H),
            "w_q_cross": w(H, H), "w_kv": w(H, 2 * H), "w_o_cross": w(H, H),
            "ffn_w1": w(H, ffn_dim), "ffn_w2": w(ffn_dim, H),
            "bbox_w1": w(H, H), "bbox_w2": w(H, H),
        }
        p["bbox_w3"] = jnp.zeros((H, H), jnp.float32).at[:, :4].set(
            0.02 * jax.random.normal(next(keys), (H, 4), jnp.float32)).astype(wdt)

        p["attn_vec"] = jnp.stack([
            qph_b1[:H], qph_b1[H:], qph_b2,
            vrow(), vrow(), vrow(), vrow(), ones, zeros,            # self-attn biases + LN
            vrow(), vrow(), vrow(), vrow(), ones, zeros,            # cross-attn biases + LN
        ])
        p["ffn_b1"] = (0.02 * jax.random.normal(next(keys), (1, ffn_dim), jnp.float32))
        bbox_b3 = jnp.zeros((H,), jnp.float32).at[:4].set(
            0.02 * jax.random.normal(next(keys), (4,), jnp.float32))
        p["ffn_vec"] = jnp.stack([vrow(), ones, zeros, vrow(), vrow(), bbox_b3])
        layers.append(p)

    return {"layers": layers}


# --------------------------------------------------------------------------
# Main
# --------------------------------------------------------------------------

if __name__ == "__main__":
    # Small but lane-dense config: H = 128 keeps every kernel's minor dim a full
    # 128-lane vreg row (unmasked stores); B/Q/M stay tiny.
    B, Q, M = 2, 8, 16               # batch, num queries, memory length
    H = 128                          # hidden_dim (lane-dense)
    NUM_LAYERS, NUM_HEADS, FFN = 2, 4, 256
    EVAL_IDX = NUM_LAYERS - 1        # eval_idx=-1 -> num_layers - 1

    key = jax.random.PRNGKey(0)
    k_tgt, k_ref, k_mem, k_par = jax.random.split(key, 4)

    tgt = jax.random.normal(k_tgt, (B, Q, H), jnp.float32)
    ref_points_unact = jax.random.normal(k_ref, (B, Q, 4), jnp.float32)
    memory = jax.random.normal(k_mem, (B, M, H), jnp.float32)

    params = make_params(k_par, H, NUM_LAYERS, NUM_HEADS, FFN)

    fwd = jax.jit(functools.partial(transformer_decoder_forward,
                                    num_layers=NUM_LAYERS, eval_idx=EVAL_IDX,
                                    num_heads=NUM_HEADS))
    out = fwd(tgt, ref_points_unact, memory, params)
    out = jax.block_until_ready(out)
    assert out.shape == (1, B, Q, 4), out.shape
    assert bool(jnp.all(jnp.isfinite(out)))
    assert bool(jnp.all((out >= 0.0) & (out <= 1.0)))   # sigmoid-bounded boxes
    print("KERNEL_OK")
</pallas_src>

<mosaic_0001>
module attributes {stable_mosaic.version = 11 : i64} {
  func.func @_ffn_bbox_kernel(%arg0: i32, %arg1: memref<8x128xf32, #tpu.memory_space<vmem>>, %arg2: memref<8x128xf32, #tpu.memory_space<vmem>>, %arg3: memref<128x256xbf16, #tpu.memory_space<vmem>>, %arg4: memref<1x256xf32, #tpu.memory_space<vmem>>, %arg5: memref<256x128xbf16, #tpu.memory_space<vmem>>, %arg6: memref<128x128xbf16, #tpu.memory_space<vmem>>, %arg7: memref<128x128xbf16, #tpu.memory_space<vmem>>, %arg8: memref<128x128xbf16, #tpu.memory_space<vmem>>, %arg9: memref<6x128xf32, #tpu.memory_space<vmem>>, %arg10: memref<8x128xf32, #tpu.memory_space<vmem>>, %arg11: memref<8x128xf32, #tpu.memory_space<vmem>>) attributes {dimension_semantics = [#tpu.dimension_semantics<parallel>], iteration_bounds = array<i64: 2>, scalar_prefetch = 0 : i64, scratch_operands = 0 : i64, tpu.core_type = #tpu.core_type<tc>, window_params = [{transform_indices = @transform_0, window_bounds = array<i64: 8, 128>}, {transform_indices = @transform_1, window_bounds = array<i64: 8, 128>}, {pipeline_mode = #tpu.pipeline_mode<synchronous>, transform_indices = @transform_2, window_bounds = array<i64: 128, 256>}, {pipeline_mode = #tpu.pipeline_mode<synchronous>, transform_indices = @transform_3, window_bounds = array<i64: 1, 256>}, {pipeline_mode = #tpu.pipeline_mode<synchronous>, transform_indices = @transform_4, window_bounds = array<i64: 256, 128>}, {pipeline_mode = #tpu.pipeline_mode<synchronous>, transform_indices = @transform_5, window_bounds = array<i64: 128, 128>}, {pipeline_mode = #tpu.pipeline_mode<synchronous>, transform_indices = @transform_6, window_bounds = array<i64: 128, 128>}, {pipeline_mode = #tpu.pipeline_mode<synchronous>, transform_indices = @transform_7, window_bounds = array<i64: 128, 128>}, {pipeline_mode = #tpu.pipeline_mode<synchronous>, transform_indices = @transform_8, window_bounds = array<i64: 6, 128>}, {transform_indices = @transform_9, window_bounds = array<i64: 8, 128>}, {transform_indices = @transform_10, window_bounds = array<i64: 8, 128>}]} {
    %c0 = arith.constant 0 : index
    %c0_0 = arith.constant 0 : index
    %0 = vector.load %arg1[%c0, %c0_0] : memref<8x128xf32, #tpu.memory_space<vmem>>, vector<8x128xf32>
    %c0_1 = arith.constant 0 : index
    %c0_2 = arith.constant 0 : index
    %1 = vector.load %arg9[%c0_1, %c0_2] : memref<6x128xf32, #tpu.memory_space<vmem>>, vector<6x128xf32>
    %c0_3 = arith.constant 0 : index
    %c0_4 = arith.constant 0 : index
    %2 = vector.load %arg3[%c0_3, %c0_4] : memref<128x256xbf16, #tpu.memory_space<vmem>>, vector<128x256xbf16>
    %3 = arith.truncf %0 : vector<8x128xf32> to vector<8x128xbf16>
    %cst = arith.constant dense<0.000000e+00> : vector<8x256xf32>
    %4 = tpu.matmul %3, %2, %cst {dimension_numbers = #tpu.dot_dimension_numbers<[1], [0], [0], [1], [0, 0, 1, 1], [], []>} : vector<8x128xbf16>, vector<128x256xbf16>, vector<8x256xf32> -> vector<8x256xf32>
    %c0_5 = arith.constant 0 : index
    %c0_6 = arith.constant 0 : index
    %5 = vector.load %arg4[%c0_5, %c0_6] : memref<1x256xf32, #tpu.memory_space<vmem>>, vector<1x256xf32>
    %6 = vector.broadcast %5 : vector<1x256xf32> to vector<8x256xf32>
    %7 = arith.addf %4, %6 : vector<8x256xf32>
    %cst_7 = arith.constant 0.000000e+00 : f32
    %8 = vector.broadcast %cst_7 : f32 to vector<8x256xf32>
    %9 = arith.maximumf %7, %8 : vector<8x256xf32>
    %c0_8 = arith.constant 0 : index
    %c0_9 = arith.constant 0 : index
    %10 = vector.load %arg5[%c0_8, %c0_9] : memref<256x128xbf16, #tpu.memory_space<vmem>>, vector<256x128xbf16>
    %11 = arith.truncf %9 : vector<8x256xf32> to vector<8x256xbf16>
    %cst_10 = arith.constant dense<0.000000e+00> : vector<8x128xf32>
    %12 = tpu.matmul %11, %10, %cst_10 {dimension_numbers = #tpu.dot_dimension_numbers<[1], [0], [0], [1], [0, 0, 1, 1], [], []>} : vector<8x256xbf16>, vector<256x128xbf16>, vector<8x128xf32> -> vector<8x128xf32>
    %13 = arith.addf %0, %12 : vector<8x128xf32>
    %14 = vector.extract_strided_slice %1 {offsets = [0, 0], sizes = [1, 128], strides = [1, 1]} : vector<6x128xf32> to vector<1x128xf32>
    %15 = vector.broadcast %14 : vector<1x128xf32> to vector<8x128xf32>
    %16 = arith.addf %13, %15 : vector<8x128xf32>
    %17 = vector.extract_strided_slice %1 {offsets = [1, 0], sizes = [1, 128], strides = [1, 1]} : vector<6x128xf32> to vector<1x128xf32>
    %18 = vector.extract_strided_slice %1 {offsets = [2, 0], sizes = [1, 128], strides = [1, 1]} : vector<6x128xf32> to vector<1x128xf32>
    %cst_11 = arith.constant dense<0.000000e+00> : vector<8xf32>
    %19 = vector.multi_reduction <add>, %16, %cst_11 [1] : vector<8x128xf32> to vector<8xf32>
    %20 = vector.shape_cast %19 : vector<8xf32> to vector<8x1xf32>
    %cst_12 = arith.constant 1.280000e+02 : f32
    %21 = vector.broadcast %cst_12 : f32 to vector<8x1xf32>
    %22 = arith.divf %20, %21 : vector<8x1xf32>
    %23 = arith.mulf %16, %16 : vector<8x128xf32>
    %cst_13 = arith.constant dense<0.000000e+00> : vector<8xf32>
    %24 = vector.multi_reduction <add>, %23, %cst_13 [1] : vector<8x128xf32> to vector<8xf32>
    %25 = vector.shape_cast %24 : vector<8xf32> to vector<8x1xf32>
    %cst_14 = arith.constant 1.280000e+02 : f32
    %26 = vector.broadcast %cst_14 : f32 to vector<8x1xf32>
    %27 = arith.divf %25, %26 : vector<8x1xf32>
    %28 = arith.mulf %22, %22 : vector<8x1xf32>
    %29 = arith.subf %27, %28 : vector<8x1xf32>
    %30 = vector.broadcast %22 : vector<8x1xf32> to vector<8x128xf32>
    %31 = arith.subf %16, %30 : vector<8x128xf32>
    %cst_15 = arith.constant 9.99999974E-6 : f32
    %32 = vector.broadcast %cst_15 : f32 to vector<8x1xf32>
    %33 = arith.addf %29, %32 : vector<8x1xf32>
    %34 = math.rsqrt %33 : vector<8x1xf32>
    %35 = vector.broadcast %34 : vector<8x1xf32> to vector<8x128xf32>
    %36 = arith.mulf %31, %35 : vector<8x128xf32>
    %37 = vector.broadcast %17 : vector<1x128xf32> to vector<8x128xf32>
    %38 = arith.mulf %36, %37 : vector<8x128xf32>
    %39 = vector.broadcast %18 : vector<1x128xf32> to vector<8x128xf32>
    %40 = arith.addf %38, %39 : vector<8x128xf32>
    %c0_16 = arith.constant 0 : index
    %c0_17 = arith.constant 0 : index
    %41 = vector.load %arg10[%c0_16, %c0_17] : memref<8x128xf32, #tpu.memory_space<vmem>>, vector<8x128xf32>
    tpu.vector_store %arg10[%c0_16, %c0_17], %40 {strides = array<i32>} : memref<8x128xf32, #tpu.memory_space<vmem>>, vector<8x128xf32>,
    %c0_18 = arith.constant 0 : index
    %c0_19 = arith.constant 0 : index
    %42 = vector.load %arg6[%c0_18, %c0_19] : memref<128x128xbf16, #tpu.memory_space<vmem>>, vector<128x128xbf16>
    %43 = arith.truncf %40 : vector<8x128xf32> to vector<8x128xbf16>
    %cst_20 = arith.constant dense<0.000000e+00> : vector<8x128xf32>
    %44 = tpu.matmul %43, %42, %cst_20 {dimension_numbers = #tpu.dot_dimension_numbers<[1], [0], [0], [1], [0, 0, 1, 1], [], []>} : vector<8x128xbf16>, vector<128x128xbf16>, vector<8x128xf32> -> vector<8x128xf32>
    %45 = vector.extract_strided_slice %1 {offsets = [3, 0], sizes = [1, 128], strides = [1, 1]} : vector<6x128xf32> to vector<1x128xf32>
    %46 = vector.broadcast %45 : vector<1x128xf32> to vector<8x128xf32>
    %47 = arith.addf %44, %46 : vector<8x128xf32>
    %cst_21 = arith.constant 0.000000e+00 : f32
    %48 = vector.broadcast %cst_21 : f32 to vector<8x128xf32>
    %49 = arith.maximumf %47, %48 : vector<8x128xf32>
    %c0_22 = arith.constant 0 : index
    %c0_23 = arith.constant 0 : index
    %50 = vector.load %arg7[%c0_22, %c0_23] : memref<128x128xbf16, #tpu.memory_space<vmem>>, vector<128x128xbf16>
    %51 = arith.truncf %49 : vector<8x128xf32> to vector<8x128xbf16>
    %cst_24 = arith.constant dense<0.000000e+00> : vector<8x128xf32>
    %52 = tpu.matmul %51, %50, %cst_24 {dimension_numbers = #tpu.dot_dimension_numbers<[1], [0], [0], [1], [0, 0, 1, 1], [], []>} : vector<8x128xbf16>, vector<128x128xbf16>, vector<8x128xf32> -> vector<8x128xf32>
    %53 = vector.extract_strided_slice %1 {offsets = [4, 0], sizes = [1, 128], strides = [1, 1]} : vector<6x128xf32> to vector<1x128xf32>
    %54 = vector.broadcast %53 : vector<1x128xf32> to vector<8x128xf32>
    %55 = arith.addf %52, %54 : vector<8x128xf32>
    %cst_25 = arith.constant 0.000000e+00 : f32
    %56 = vector.broadcast %cst_25 : f32 to vector<8x128xf32>
    %57 = arith.maximumf %55, %56 : vector<8x128xf32>
    %c0_26 = arith.constant 0 : index
    %c0_27 = arith.constant 0 : index
    %58 = vector.load %arg8[%c0_26, %c0_27] : memref<128x128xbf16, #tpu.memory_space<vmem>>, vector<128x128xbf16>
    %59 = arith.truncf %57 : vector<8x128xf32> to vector<8x128xbf16>
    %cst_28 = arith.constant dense<0.000000e+00> : vector<8x128xf32>
    %60 = tpu.matmul %59, %58, %cst_28 {dimension_numbers = #tpu.dot_dimension_numbers<[1], [0], [0], [1], [0, 0, 1, 1], [], []>} : vector<8x128xbf16>, vector<128x128xbf16>, vector<8x128xf32> -> vector<8x128xf32>
    %61 = vector.extract_strided_slice %1 {offsets = [5, 0], sizes = [1, 128], strides = [1, 1]} : vector<6x128xf32> to vector<1x128xf32>
    %62 = vector.broadcast %61 : vector<1x128xf32> to vector<8x128xf32>
    %63 = arith.addf %60, %62 : vector<8x128xf32>
    %c0_29 = arith.constant 0 : index
    %c0_30 = arith.constant 0 : index
    %64 = vector.load %arg2[%c0_29, %c0_30] : memref<8x128xf32, #tpu.memory_space<vmem>>, vector<8x128xf32>
    %cst_31 = arith.constant 0.000000e+00 : f32
    %cst_32 = arith.constant 1.000000e+00 : f32
    %65 = vector.broadcast %cst_31 : f32 to vector<8x128xf32>
    %66 = arith.maximumf %65, %64 : vector<8x128xf32>
    %67 = vector.broadcast %cst_32 : f32 to vector<8x128xf32>
    %68 = arith.minimumf %67, %66 : vector<8x128xf32>
    %cst_33 = arith.constant 9.99999974E-6 : f32
    %69 = vector.broadcast %cst_33 : f32 to vector<8x128xf32>
    %70 = arith.maximumf %68, %69 : vector<8x128xf32>
    %cst_34 = arith.constant 1.000000e+00 : f32
    %71 = vector.broadcast %cst_34 : f32 to vector<8x128xf32>
    %72 = arith.subf %71, %68 : vector<8x128xf32>
    %cst_35 = arith.constant 9.99999974E-6 : f32
    %73 = vector.broadcast %cst_35 : f32 to vector<8x128xf32>
    %74 = arith.maximumf %72, %73 : vector<8x128xf32>
    %75 = arith.divf %70, %74 : vector<8x128xf32>
    %76 = math.log %75 : vector<8x128xf32>
    %77 = arith.addf %63, %76 : vector<8x128xf32>
    %78 = arith.negf %77 : vector<8x128xf32>
    %79 = math.exp %78 : vector<8x128xf32>
    %cst_36 = arith.constant 1.000000e+00 : f32
    %80 = vector.broadcast %cst_36 : f32 to vector<8x128xf32>
    %81 = arith.addf %80, %79 : vector<8x128xf32>
    %82 = arith.divf %80, %81 : vector<8x128xf32>
    %c0_37 = arith.constant 0 : index
    %c0_38 = arith.constant 0 : index
    %83 = vector.load %arg11[%c0_37, %c0_38] : memref<8x128xf32, #tpu.memory_space<vmem>>, vector<8x128xf32>
    tpu.vector_store %arg11[%c0_37, %c0_38], %82 {strides = array<i32>} : memref<8x128xf32, #tpu.memory_space<vmem>>, vector<8x128xf32>,
    return
  }
  func.func @transform_0(%arg0: i32) -> (i32, i32) {
    %c0_i32 = arith.constant 0 : i32
    %c0_i32_0 = arith.constant 0 : i32
    return %arg0, %c0_i32 : i32, i32
  }
  func.func @transform_1(%arg0: i32) -> (i32, i32) {
    %c0_i32 = arith.constant 0 : i32
    %c0_i32_0 = arith.constant 0 : i32
    return %arg0, %c0_i32 : i32, i32
  }
  func.func @transform_2(%arg0: i32) -> (i32, i32) {
    %c0_i32 = arith.constant 0 : i32
    %c0_i32_0 = arith.constant 0 : i32
    %c0_i32_1 = arith.constant 0 : i32
    return %c0_i32, %c0_i32_0 : i32, i32
  }
  func.func @transform_3(%arg0: i32) -> (i32, i32) {
    %c0_i32 = arith.constant 0 : i32
    %c0_i32_0 = arith.constant 0 : i32
    %c0_i32_1 = arith.constant 0 : i32
    return %c0_i32, %c0_i32_0 : i32, i32
  }
  func.func @transform_4(%arg0: i32) -> (i32, i32) {
    %c0_i32 = arith.constant 0 : i32
    %c0_i32_0 = arith.constant 0 : i32
    %c0_i32_1 = arith.constant 0 : i32
    return %c0_i32, %c0_i32_0 : i32, i32
  }
  func.func @transform_5(%arg0: i32) -> (i32, i32) {
    %c0_i32 = arith.constant 0 : i32
    %c0_i32_0 = arith.constant 0 : i32
    %c0_i32_1 = arith.constant 0 : i32
    return %c0_i32, %c0_i32_0 : i32, i32
  }
  func.func @transform_6(%arg0: i32) -> (i32, i32) {
    %c0_i32 = arith.constant 0 : i32
    %c0_i32_0 = arith.constant 0 : i32
    %c0_i32_1 = arith.constant 0 : i32
    return %c0_i32, %c0_i32_0 : i32, i32
  }
  func.func @transform_7(%arg0: i32) -> (i32, i32) {
    %c0_i32 = arith.constant 0 : i32
    %c0_i32_0 = arith.constant 0 : i32
    %c0_i32_1 = arith.constant 0 : i32
    return %c0_i32, %c0_i32_0 : i32, i32
  }
  func.func @transform_8(%arg0: i32) -> (i32, i32) {
    %c0_i32 = arith.constant 0 : i32
    %c0_i32_0 = arith.constant 0 : i32
    %c0_i32_1 = arith.constant 0 : i32
    return %c0_i32, %c0_i32_0 : i32, i32
  }
  func.func @transform_9(%arg0: i32) -> (i32, i32) {
    %c0_i32 = arith.constant 0 : i32
    %c0_i32_0 = arith.constant 0 : i32
    return %arg0, %c0_i32 : i32, i32
  }
  func.func @transform_10(%arg0: i32) -> (i32, i32) {
    %c0_i32 = arith.constant 0 : i32
    %c0_i32_0 = arith.constant 0 : i32
    return %arg0, %c0_i32 : i32, i32
  }
}

module attributes {stable_mosaic.version = 11 : i64} {
  func.func @_ffn_bbox_kernel(%arg0: i32, %arg1: memref<8x128xf32, #tpu.memory_space<vmem>>, %arg2: memref<8x128xf32, #tpu.memory_space<vmem>>, %arg3: memref<128x256xbf16, #tpu.memory_space<vmem>>, %arg4: memref<1x256xf32, #tpu.memory_space<vmem>>, %arg5: memref<256x128xbf16, #tpu.memory_space<vmem>>, %arg6: memref<128x128xbf16, #tpu.memory_space<vmem>>, %arg7: memref<128x128xbf16, #tpu.memory_space<vmem>>, %arg8: memref<128x128xbf16, #tpu.memory_space<vmem>>, %arg9: memref<6x128xf32, #tpu.memory_space<vmem>>, %arg10: memref<8x128xf32, #tpu.memory_space<vmem>>, %arg11: memref<8x128xf32, #tpu.memory_space<vmem>>) attributes {dimension_semantics = [#tpu.dimension_semantics<parallel>], iteration_bounds = array<i64: 2>, scalar_prefetch = 0 : i64, scratch_operands = 0 : i64, tpu.core_type = #tpu.core_type<tc>, window_params = [{transform_indices = @transform_0, window_bounds = array<i64: 8, 128>}, {transform_indices = @transform_1, window_bounds = array<i64: 8, 128>}, {pipeline_mode = #tpu.pipeline_mode<synchronous>, transform_indices = @transform_2, window_bounds = array<i64: 128, 256>}, {pipeline_mode = #tpu.pipeline_mode<synchronous>, transform_indices = @transform_3, window_bounds = array<i64: 1, 256>}, {pipeline_mode = #tpu.pipeline_mode<synchronous>, transform_indices = @transform_4, window_bounds = array<i64: 256, 128>}, {pipeline_mode = #tpu.pipeline_mode<synchronous>, transform_indices = @transform_5, window_bounds = array<i64: 128, 128>}, {pipeline_mode = #tpu.pipeline_mode<synchronous>, transform_indices = @transform_6, window_bounds = array<i64: 128, 128>}, {pipeline_mode = #tpu.pipeline_mode<synchronous>, transform_indices = @transform_7, window_bounds = array<i64: 128, 128>}, {pipeline_mode = #tpu.pipeline_mode<synchronous>, transform_indices = @transform_8, window_bounds = array<i64: 6, 128>}, {transform_indices = @transform_9, window_bounds = array<i64: 8, 128>}, {transform_indices = @transform_10, window_bounds = array<i64: 8, 128>}]} {
    %c0 = arith.constant 0 : index
    %c0_0 = arith.constant 0 : index
    %0 = vector.load %arg1[%c0, %c0_0] : memref<8x128xf32, #tpu.memory_space<vmem>>, vector<8x128xf32>
    %c0_1 = arith.constant 0 : index
    %c0_2 = arith.constant 0 : index
    %1 = vector.load %arg9[%c0_1, %c0_2] : memref<6x128xf32, #tpu.memory_space<vmem>>, vector<6x128xf32>
    %c0_3 = arith.constant 0 : index
    %c0_4 = arith.constant 0 : index
    %2 = vector.load %arg3[%c0_3, %c0_4] : memref<128x256xbf16, #tpu.memory_space<vmem>>, vector<128x256xbf16>
    %3 = arith.truncf %0 : vector<8x128xf32> to vector<8x128xbf16>
    %cst = arith.constant dense<0.000000e+00> : vector<8x256xf32>
    %4 = tpu.matmul %3, %2, %cst {dimension_numbers = #tpu.dot_dimension_numbers<[1], [0], [0], [1], [0, 0, 1, 1], [], []>} : vector<8x128xbf16>, vector<128x256xbf16>, vector<8x256xf32> -> vector<8x256xf32>
    %c0_5 = arith.constant 0 : index
    %c0_6 = arith.constant 0 : index
    %5 = vector.load %arg4[%c0_5, %c0_6] : memref<1x256xf32, #tpu.memory_space<vmem>>, vector<1x256xf32>
    %6 = vector.broadcast %5 : vector<1x256xf32> to vector<8x256xf32>
    %7 = arith.addf %4, %6 : vector<8x256xf32>
    %cst_7 = arith.constant 0.000000e+00 : f32
    %8 = vector.broadcast %cst_7 : f32 to vector<8x256xf32>
    %9 = arith.maximumf %7, %8 : vector<8x256xf32>
    %c0_8 = arith.constant 0 : index
    %c0_9 = arith.constant 0 : index
    %10 = vector.load %arg5[%c0_8, %c0_9] : memref<256x128xbf16, #tpu.memory_space<vmem>>, vector<256x128xbf16>
    %11 = arith.truncf %9 : vector<8x256xf32> to vector<8x256xbf16>
    %cst_10 = arith.constant dense<0.000000e+00> : vector<8x128xf32>
    %12 = tpu.matmul %11, %10, %cst_10 {dimension_numbers = #tpu.dot_dimension_numbers<[1], [0], [0], [1], [0, 0, 1, 1], [], []>} : vector<8x256xbf16>, vector<256x128xbf16>, vector<8x128xf32> -> vector<8x128xf32>
    %13 = arith.addf %0, %12 : vector<8x128xf32>
    %14 = vector.extract_strided_slice %1 {offsets = [0, 0], sizes = [1, 128], strides = [1, 1]} : vector<6x128xf32> to vector<1x128xf32>
    %15 = vector.broadcast %14 : vector<1x128xf32> to vector<8x128xf32>
    %16 = arith.addf %13, %15 : vector<8x128xf32>
    %17 = vector.extract_strided_slice %1 {offsets = [1, 0], sizes = [1, 128], strides = [1, 1]} : vector<6x128xf32> to vector<1x128xf32>
    %18 = vector.extract_strided_slice %1 {offsets = [2, 0], sizes = [1, 128], strides = [1, 1]} : vector<6x128xf32> to vector<1x128xf32>
    %cst_11 = arith.constant dense<0.000000e+00> : vector<8xf32>
    %19 = vector.multi_reduction <add>, %16, %cst_11 [1] : vector<8x128xf32> to vector<8xf32>
    %20 = vector.shape_cast %19 : vector<8xf32> to vector<8x1xf32>
    %cst_12 = arith.constant 1.280000e+02 : f32
    %21 = vector.broadcast %cst_12 : f32 to vector<8x1xf32>
    %22 = arith.divf %20, %21 : vector<8x1xf32>
    %23 = arith.mulf %16, %16 : vector<8x128xf32>
    %cst_13 = arith.constant dense<0.000000e+00> : vector<8xf32>
    %24 = vector.multi_reduction <add>, %23, %cst_13 [1] : vector<8x128xf32> to vector<8xf32>
    %25 = vector.shape_cast %24 : vector<8xf32> to vector<8x1xf32>
    %cst_14 = arith.constant 1.280000e+02 : f32
    %26 = vector.broadcast %cst_14 : f32 to vector<8x1xf32>
    %27 = arith.divf %25, %26 : vector<8x1xf32>
    %28 = arith.mulf %22, %22 : vector<8x1xf32>
    %29 = arith.subf %27, %28 : vector<8x1xf32>
    %30 = vector.broadcast %22 : vector<8x1xf32> to vector<8x128xf32>
    %31 = arith.subf %16, %30 : vector<8x128xf32>
    %cst_15 = arith.constant 9.99999974E-6 : f32
    %32 = vector.broadcast %cst_15 : f32 to vector<8x1xf32>
    %33 = arith.addf %29, %32 : vector<8x1xf32>
    %34 = math.rsqrt %33 : vector<8x1xf32>
    %35 = vector.broadcast %34 : vector<8x1xf32> to vector<8x128xf32>
    %36 = arith.mulf %31, %35 : vector<8x128xf32>
    %37 = vector.broadcast %17 : vector<1x128xf32> to vector<8x128xf32>
    %38 = arith.mulf %36, %37 : vector<8x128xf32>
    %39 = vector.broadcast %18 : vector<1x128xf32> to vector<8x128xf32>
    %40 = arith.addf %38, %39 : vector<8x128xf32>
    %c0_16 = arith.constant 0 : index
    %c0_17 = arith.constant 0 : index
    %41 = vector.load %arg10[%c0_16, %c0_17] : memref<8x128xf32, #tpu.memory_space<vmem>>, vector<8x128xf32>
    tpu.vector_store %arg10[%c0_16, %c0_17], %40 {strides = array<i32>} : memref<8x128xf32, #tpu.memory_space<vmem>>, vector<8x128xf32>,
    %c0_18 = arith.constant 0 : index
    %c0_19 = arith.constant 0 : index
    %42 = vector.load %arg6[%c0_18, %c0_19] : memref<128x128xbf16, #tpu.memory_space<vmem>>, vector<128x128xbf16>
    %43 = arith.truncf %40 : vector<8x128xf32> to vector<8x128xbf16>
    %cst_20 = arith.constant dense<0.000000e+00> : vector<8x128xf32>
    %44 = tpu.matmul %43, %42, %cst_20 {dimension_numbers = #tpu.dot_dimension_numbers<[1], [0], [0], [1], [0, 0, 1, 1], [], []>} : vector<8x128xbf16>, vector<128x128xbf16>, vector<8x128xf32> -> vector<8x128xf32>
    %45 = vector.extract_strided_slice %1 {offsets = [3, 0], sizes = [1, 128], strides = [1, 1]} : vector<6x128xf32> to vector<1x128xf32>
    %46 = vector.broadcast %45 : vector<1x128xf32> to vector<8x128xf32>
    %47 = arith.addf %44, %46 : vector<8x128xf32>
    %cst_21 = arith.constant 0.000000e+00 : f32
    %48 = vector.broadcast %cst_21 : f32 to vector<8x128xf32>
    %49 = arith.maximumf %47, %48 : vector<8x128xf32>
    %c0_22 = arith.constant 0 : index
    %c0_23 = arith.constant 0 : index
    %50 = vector.load %arg7[%c0_22, %c0_23] : memref<128x128xbf16, #tpu.memory_space<vmem>>, vector<128x128xbf16>
    %51 = arith.truncf %49 : vector<8x128xf32> to vector<8x128xbf16>
    %cst_24 = arith.constant dense<0.000000e+00> : vector<8x128xf32>
    %52 = tpu.matmul %51, %50, %cst_24 {dimension_numbers = #tpu.dot_dimension_numbers<[1], [0], [0], [1], [0, 0, 1, 1], [], []>} : vector<8x128xbf16>, vector<128x128xbf16>, vector<8x128xf32> -> vector<8x128xf32>
    %53 = vector.extract_strided_slice %1 {offsets = [4, 0], sizes = [1, 128], strides = [1, 1]} : vector<6x128xf32> to vector<1x128xf32>
    %54 = vector.broadcast %53 : vector<1x128xf32> to vector<8x128xf32>
    %55 = arith.addf %52, %54 : vector<8x128xf32>
    %cst_25 = arith.constant 0.000000e+00 : f32
    %56 = vector.broadcast %cst_25 : f32 to vector<8x128xf32>
    %57 = arith.maximumf %55, %56 : vector<8x128xf32>
    %c0_26 = arith.constant 0 : index
    %c0_27 = arith.constant 0 : index
    %58 = vector.load %arg8[%c0_26, %c0_27] : memref<128x128xbf16, #tpu.memory_space<vmem>>, vector<128x128xbf16>
    %59 = arith.truncf %57 : vector<8x128xf32> to vector<8x128xbf16>
    %cst_28 = arith.constant dense<0.000000e+00> : vector<8x128xf32>
    %60 = tpu.matmul %59, %58, %cst_28 {dimension_numbers = #tpu.dot_dimension_numbers<[1], [0], [0], [1], [0, 0, 1, 1], [], []>} : vector<8x128xbf16>, vector<128x128xbf16>, vector<8x128xf32> -> vector<8x128xf32>
    %61 = vector.extract_strided_slice %1 {offsets = [5, 0], sizes = [1, 128], strides = [1, 1]} : vector<6x128xf32> to vector<1x128xf32>
    %62 = vector.broadcast %61 : vector<1x128xf32> to vector<8x128xf32>
    %63 = arith.addf %60, %62 : vector<8x128xf32>
    %c0_29 = arith.constant 0 : index
    %c0_30 = arith.constant 0 : index
    %64 = vector.load %arg2[%c0_29, %c0_30] : memref<8x128xf32, #tpu.memory_space<vmem>>, vector<8x128xf32>
    %cst_31 = arith.constant 0.000000e+00 : f32
    %cst_32 = arith.constant 1.000000e+00 : f32
    %65 = vector.broadcast %cst_31 : f32 to vector<8x128xf32>
    %66 = arith.maximumf %65, %64 : vector<8x128xf32>
    %67 = vector.broadcast %cst_32 : f32 to vector<8x128xf32>
    %68 = arith.minimumf %67, %66 : vector<8x128xf32>
    %cst_33 = arith.constant 9.99999974E-6 : f32
    %69 = vector.broadcast %cst_33 : f32 to vector<8x128xf32>
    %70 = arith.maximumf %68, %69 : vector<8x128xf32>
    %cst_34 = arith.constant 1.000000e+00 : f32
    %71 = vector.broadcast %cst_34 : f32 to vector<8x128xf32>
    %72 = arith.subf %71, %68 : vector<8x128xf32>
    %cst_35 = arith.constant 9.99999974E-6 : f32
    %73 = vector.broadcast %cst_35 : f32 to vector<8x128xf32>
    %74 = arith.maximumf %72, %73 : vector<8x128xf32>
    %75 = arith.divf %70, %74 : vector<8x128xf32>
    %76 = math.log %75 : vector<8x128xf32>
    %77 = arith.addf %63, %76 : vector<8x128xf32>
    %78 = arith.negf %77 : vector<8x128xf32>
    %79 = math.exp %78 : vector<8x128xf32>
    %cst_36 = arith.constant 1.000000e+00 : f32
    %80 = vector.broadcast %cst_36 : f32 to vector<8x128xf32>
    %81 = arith.addf %80, %79 : vector<8x128xf32>
    %82 = arith.divf %80, %81 : vector<8x128xf32>
    %c0_37 = arith.constant 0 : index
    %c0_38 = arith.constant 0 : index
    %83 = vector.load %arg11[%c0_37, %c0_38] : memref<8x128xf32, #tpu.memory_space<vmem>>, vector<8x128xf32>
    tpu.vector_store %arg11[%c0_37, %c0_38], %82 {strides = array<i32>} : memref<8x128xf32, #tpu.memory_space<vmem>>, vector<8x128xf32>,
    return
  }
  func.func @transform_0(%arg0: i32) -> (i32, i32) {
    %c0_i32 = arith.constant 0 : i32
    %c0_i32_0 = arith.constant 0 : i32
    return %arg0, %c0_i32 : i32, i32
  }
  func.func @transform_1(%arg0: i32) -> (i32, i32) {
    %c0_i32 = arith.constant 0 : i32
    %c0_i32_0 = arith.constant 0 : i32
    return %arg0, %c0_i32 : i32, i32
  }
  func.func @transform_2(%arg0: i32) -> (i32, i32) {
    %c0_i32 = arith.constant 0 : i32
    %c0_i32_0 = arith.constant 0 : i32
    %c0_i32_1 = arith.constant 0 : i32
    return %c0_i32, %c0_i32_0 : i32, i32
  }
  func.func @transform_3(%arg0: i32) -> (i32, i32) {
    %c0_i32 = arith.constant 0 : i32
    %c0_i32_0 = arith.constant 0 : i32
    %c0_i32_1 = arith.constant 0 : i32
    return %c0_i32, %c0_i32_0 : i32, i32
  }
  func.func @transform_4(%arg0: i32) -> (i32, i32) {
    %c0_i32 = arith.constant 0 : i32
    %c0_i32_0 = arith.constant 0 : i32
    %c0_i32_1 = arith.constant 0 : i32
    return %c0_i32, %c0_i32_0 : i32, i32
  }
  func.func @transform_5(%arg0: i32) -> (i32, i32) {
    %c0_i32 = arith.constant 0 : i32
    %c0_i32_0 = arith.constant 0 : i32
    %c0_i32_1 = arith.constant 0 : i32
    return %c0_i32, %c0_i32_0 : i32, i32
  }
  func.func @transform_6(%arg0: i32) -> (i32, i32) {
    %c0_i32 = arith.constant 0 : i32
    %c0_i32_0 = arith.constant 0 : i32
    %c0_i32_1 = arith.constant 0 : i32
    return %c0_i32, %c0_i32_0 : i32, i32
  }
  func.func @transform_7(%arg0: i32) -> (i32, i32) {
    %c0_i32 = arith.constant 0 : i32
    %c0_i32_0 = arith.constant 0 : i32
    %c0_i32_1 = arith.constant 0 : i32
    return %c0_i32, %c0_i32_0 : i32, i32
  }
  func.func @transform_8(%arg0: i32) -> (i32, i32) {
    %c0_i32 = arith.constant 0 : i32
    %c0_i32_0 = arith.constant 0 : i32
    %c0_i32_1 = arith.constant 0 : i32
    return %c0_i32, %c0_i32_0 : i32, i32
  }
  func.func @transform_9(%arg0: i32) -> (i32, i32) {
    %c0_i32 = arith.constant 0 : i32
    %c0_i32_0 = arith.constant 0 : i32
    return %arg0, %c0_i32 : i32, i32
  }
  func.func @transform_10(%arg0: i32) -> (i32, i32) {
    %c0_i32 = arith.constant 0 : i32
    %c0_i32_0 = arith.constant 0 : i32
    return %arg0, %c0_i32 : i32, i32
  }
}

module attributes {stable_mosaic.version = 11 : i64} {
  func.func @_attn_block_kernel(%arg0: i32, %arg1: memref<1x8x128xf32, #tpu.memory_space<vmem>>, %arg2: memref<1x8x128xf32, #tpu.memory_space<vmem>>, %arg3: memref<1x16x128xf32, #tpu.memory_space<vmem>>, %arg4: memref<128x256xbf16, #tpu.memory_space<vmem>>, %arg5: memref<256x128xbf16, #tpu.memory_space<vmem>>, %arg6: memref<128x256xbf16, #tpu.memory_space<vmem>>, %arg7: memref<128x128xbf16, #tpu.memory_space<vmem>>, %arg8: memref<128x128xbf16, #tpu.memory_space<vmem>>, %arg9: memref<128x128xbf16, #tpu.memory_space<vmem>>, %arg10: memref<128x256xbf16, #tpu.memory_space<vmem>>, %arg11: memref<128x128xbf16, #tpu.memory_space<vmem>>, %arg12: memref<15x128xf32, #tpu.memory_space<vmem>>, %arg13: memref<1x8x128xf32, #tpu.memory_space<vmem>>) attributes {dimension_semantics = [#tpu.dimension_semantics<parallel>], iteration_bounds = array<i64: 2>, scalar_prefetch = 0 : i64, scratch_operands = 0 : i64, tpu.core_type = #tpu.core_type<tc>, window_params = [{transform_indices = @transform_0, window_bounds = array<i64: 1, 8, 128>}, {transform_indices = @transform_1, window_bounds = array<i64: 1, 8, 128>}, {transform_indices = @transform_2, window_bounds = array<i64: 1, 16, 128>}, {pipeline_mode = #tpu.pipeline_mode<synchronous>, transform_indices = @transform_3, window_bounds = array<i64: 128, 256>}, {pipeline_mode = #tpu.pipeline_mode<synchronous>, transform_indices = @transform_4, window_bounds = array<i64: 256, 128>}, {pipeline_mode = #tpu.pipeline_mode<synchronous>, transform_indices = @transform_5, window_bounds = array<i64: 128, 256>}, {pipeline_mode = #tpu.pipeline_mode<synchronous>, transform_indices = @transform_6, window_bounds = array<i64: 128, 128>}, {pipeline_mode = #tpu.pipeline_mode<synchronous>, transform_indices = @transform_7, window_bounds = array<i64: 128, 128>}, {pipeline_mode = #tpu.pipeline_mode<synchronous>, transform_indices = @transform_8, window_bounds = array<i64: 128, 128>}, {pipeline_mode = #tpu.pipeline_mode<synchronous>, transform_indices = @transform_9, window_bounds = array<i64: 128, 256>}, {pipeline_mode = #tpu.pipeline_mode<synchronous>, transform_indices = @transform_10, window_bounds = array<i64: 128, 128>}, {pipeline_mode = #tpu.pipeline_mode<synchronous>, transform_indices = @transform_11, window_bounds = array<i64: 15, 128>}, {transform_indices = @transform_12, window_bounds = array<i64: 1, 8, 128>}]} {
    %c0 = arith.constant 0 : index
    %c0_0 = arith.constant 0 : index
    %c0_1 = arith.constant 0 : index
    %0 = vector.load %arg1[%c0, %c0_0, %c0_1] : memref<1x8x128xf32, #tpu.memory_space<vmem>>, vector<1x8x128xf32>
    %1 = vector.shape_cast %0 : vector<1x8x128xf32> to vector<8x128xf32>
    %c0_2 = arith.constant 0 : index
    %c0_3 = arith.constant 0 : index
    %c0_4 = arith.constant 0 : index
    %2 = vector.load %arg2[%c0_2, %c0_3, %c0_4] : memref<1x8x128xf32, #tpu.memory_space<vmem>>, vector<1x8x128xf32>
    %3 = vector.shape_cast %2 : vector<1x8x128xf32> to vector<8x128xf32>
    %c0_5 = arith.constant 0 : index
    %c0_6 = arith.constant 0 : index
    %c0_7 = arith.constant 0 : index
    %4 = vector.load %arg3[%c0_5, %c0_6, %c0_7] : memref<1x16x128xf32, #tpu.memory_space<vmem>>, vector<1x16x128xf32>
    %5 = vector.shape_cast %4 : vector<1x16x128xf32> to vector<16x128xf32>
    %c0_8 = arith.constant 0 : index
    %c0_9 = arith.constant 0 : index
    %6 = vector.load %arg12[%c0_8, %c0_9] : memref<15x128xf32, #tpu.memory_space<vmem>>, vector<15x128xf32>
    %7 = vector.extract_strided_slice %6 {offsets = [0, 0], sizes = [1, 128], strides = [1, 1]} : vector<15x128xf32> to vector<1x128xf32>
    %8 = vector.extract_strided_slice %6 {offsets = [1, 0], sizes = [1, 128], strides = [1, 1]} : vector<15x128xf32> to vector<1x128xf32>
    %9 = tpu.concatenate %7, %8 in 1 : vector<1x128xf32>, vector<1x128xf32> -> vector<1x256xf32>
    %c0_10 = arith.constant 0 : index
    %c0_11 = arith.constant 0 : index
    %10 = vector.load %arg4[%c0_10, %c0_11] : memref<128x256xbf16, #tpu.memory_space<vmem>>, vector<128x256xbf16>
    %11 = arith.truncf %3 : vector<8x128xf32> to vector<8x128xbf16>
    %cst = arith.constant dense<0.000000e+00> : vector<8x256xf32>
    %12 = tpu.matmul %11, %10, %cst {dimension_numbers = #tpu.dot_dimension_numbers<[1], [0], [0], [1], [0, 0, 1, 1], [], []>} : vector<8x128xbf16>, vector<128x256xbf16>, vector<8x256xf32> -> vector<8x256xf32>
    %13 = vector.broadcast %9 : vector<1x256xf32> to vector<8x256xf32>
    %14 = arith.addf %12, %13 : vector<8x256xf32>
    %cst_12 = arith.constant 0.000000e+00 : f32
    %15 = vector.broadcast %cst_12 : f32 to vector<8x256xf32>
    %16 = arith.maximumf %14, %15 : vector<8x256xf32>
    %c0_13 = arith.constant 0 : index
    %c0_14 = arith.constant 0 : index
    %17 = vector.load %arg5[%c0_13, %c0_14] : memref<256x128xbf16, #tpu.memory_space<vmem>>, vector<256x128xbf16>
    %18 = arith.truncf %16 : vector<8x256xf32> to vector<8x256xbf16>
    %cst_15 = arith.constant dense<0.000000e+00> : vector<8x128xf32>
    %19 = tpu.matmul %18, %17, %cst_15 {dimension_numbers = #tpu.dot_dimension_numbers<[1], [0], [0], [1], [0, 0, 1, 1], [], []>} : vector<8x256xbf16>, vector<256x128xbf16>, vector<8x128xf32> -> vector<8x128xf32>
    %20 = vector.extract_strided_slice %6 {offsets = [2, 0], sizes = [1, 128], strides = [1, 1]} : vector<15x128xf32> to vector<1x128xf32>
    %21 = vector.broadcast %20 : vector<1x128xf32> to vector<8x128xf32>
    %22 = arith.addf %19, %21 : vector<8x128xf32>
    %23 = arith.addf %1, %22 : vector<8x128xf32>
    %c0_16 = arith.constant 0 : index
    %c0_17 = arith.constant 0 : index
    %24 = vector.load %arg6[%c0_16, %c0_17] : memref<128x256xbf16, #tpu.memory_space<vmem>>, vector<128x256xbf16>
    %25 = arith.truncf %23 : vector<8x128xf32> to vector<8x128xbf16>
    %cst_18 = arith.constant dense<0.000000e+00> : vector<8x256xf32>
    %26 = tpu.matmul %25, %24, %cst_18 {dimension_numbers = #tpu.dot_dimension_numbers<[1], [0], [0], [1], [0, 0, 1, 1], [], []>} : vector<8x128xbf16>, vector<128x256xbf16>, vector<8x256xf32> -> vector<8x256xf32>
    %27 = vector.extract_strided_slice %26 {offsets = [0, 0], sizes = [8, 128], strides = [1, 1]} : vector<8x256xf32> to vector<8x128xf32>
    %28 = vector.extract_strided_slice %6 {offsets = [3, 0], sizes = [1, 128], strides = [1, 1]} : vector<15x128xf32> to vector<1x128xf32>
    %29 = vector.broadcast %28 : vector<1x128xf32> to vector<8x128xf32>
    %30 = arith.addf %27, %29 : vector<8x128xf32>
    %31 = vector.extract_strided_slice %26 {offsets = [0, 128], sizes = [8, 128], strides = [1, 1]} : vector<8x256xf32> to vector<8x128xf32>
    %32 = vector.extract_strided_slice %6 {offsets = [4, 0], sizes = [1, 128], strides = [1, 1]} : vector<15x128xf32> to vector<1x128xf32>
    %33 = vector.broadcast %32 : vector<1x128xf32> to vector<8x128xf32>
    %34 = arith.addf %31, %33 : vector<8x128xf32>
    %c0_19 = arith.constant 0 : index
    %c0_20 = arith.constant 0 : index
    %35 = vector.load %arg7[%c0_19, %c0_20] : memref<128x128xbf16, #tpu.memory_space<vmem>>, vector<128x128xbf16>
    %36 = arith.truncf %1 : vector<8x128xf32> to vector<8x128xbf16>
    %cst_21 = arith.constant dense<0.000000e+00> : vector<8x128xf32>
    %37 = tpu.matmul %36, %35, %cst_21 {dimension_numbers = #tpu.dot_dimension_numbers<[1], [0], [0], [1], [0, 0, 1, 1], [], []>} : vector<8x128xbf16>, vector<128x128xbf16>, vector<8x128xf32> -> vector<8x128xf32>
    %38 = vector.extract_strided_slice %6 {offsets = [5, 0], sizes = [1, 128], strides = [1, 1]} : vector<15x128xf32> to vector<1x128xf32>
    %39 = vector.broadcast %38 : vector<1x128xf32> to vector<8x128xf32>
    %40 = arith.addf %37, %39 : vector<8x128xf32>
    %c0_22 = arith.constant 0 : index
    %c0_23 = arith.constant 0 : index
    %41 = vector.load %arg8[%c0_22, %c0_23] : memref<128x128xbf16, #tpu.memory_space<vmem>>, vector<128x128xbf16>
    %42 = vector.extract_strided_slice %30 {offsets = [0, 0], sizes = [8, 32], strides = [1, 1]} : vector<8x128xf32> to vector<8x32xf32>
    %43 = arith.truncf %42 : vector<8x32xf32> to vector<8x32xbf16>
    %44 = vector.extract_strided_slice %34 {offsets = [0, 0], sizes = [8, 32], strides = [1, 1]} : vector<8x128xf32> to vector<8x32xf32>
    %45 = arith.truncf %44 : vector<8x32xf32> to vector<8x32xbf16>
    %46 = vector.extract_strided_slice %40 {offsets = [0, 0], sizes = [8, 32], strides = [1, 1]} : vector<8x128xf32> to vector<8x32xf32>
    %47 = arith.truncf %46 : vector<8x32xf32> to vector<8x32xbf16>
    %cst_24 = arith.constant dense<0.000000e+00> : vector<8x8xf32>
    %48 = tpu.matmul %43, %45, %cst_24 {dimension_numbers = #tpu.dot_dimension_numbers<[1], [1], [0], [0], [0, 0, 1, 0], [], []>} : vector<8x32xbf16>, vector<8x32xbf16>, vector<8x8xf32> -> vector<8x8xf32>
    %cst_25 = arith.constant 0.176776692 : f32
    %49 = vector.broadcast %cst_25 : f32 to vector<8x8xf32>
    %50 = arith.mulf %48, %49 : vector<8x8xf32>
    %cst_26 = arith.constant dense<0xFF800000> : vector<8xf32>
    %51 = vector.multi_reduction <maximumf>, %50, %cst_26 [1] : vector<8x8xf32> to vector<8xf32>
    %52 = vector.shape_cast %51 : vector<8xf32> to vector<8x1xf32>
    %53 = vector.broadcast %52 : vector<8x1xf32> to vector<8x8xf32>
    %54 = arith.subf %50, %53 : vector<8x8xf32>
    %55 = math.exp %54 : vector<8x8xf32>
    %cst_27 = arith.constant dense<0.000000e+00> : vector<8xf32>
    %56 = vector.multi_reduction <add>, %55, %cst_27 [1] : vector<8x8xf32> to vector<8xf32>
    %57 = vector.shape_cast %56 : vector<8xf32> to vector<8x1xf32>
    %58 = tpu.reciprocal %57 {approx = true} : vector<8x1xf32> -> vector<8x1xf32>
    %59 = vector.broadcast %58 : vector<8x1xf32> to vector<8x8xf32>
    %60 = arith.mulf %55, %59 : vector<8x8xf32>
    %61 = arith.truncf %60 : vector<8x8xf32> to vector<8x8xbf16>
    %cst_28 = arith.constant dense<0.000000e+00> : vector<8x32xf32>
    %62 = tpu.matmul %61, %47, %cst_28 {dimension_numbers = #tpu.dot_dimension_numbers<[1], [0], [0], [1], [0, 0, 1, 1], [], []>} : vector<8x8xbf16>, vector<8x32xbf16>, vector<8x32xf32> -> vector<8x32xf32>
    %63 = vector.extract_strided_slice %30 {offsets = [0, 32], sizes = [8, 32], strides = [1, 1]} : vector<8x128xf32> to vector<8x32xf32>
    %64 = arith.truncf %63 : vector<8x32xf32> to vector<8x32xbf16>
    %65 = vector.extract_strided_slice %34 {offsets = [0, 32], sizes = [8, 32], strides = [1, 1]} : vector<8x128xf32> to vector<8x32xf32>
    %66 = arith.truncf %65 : vector<8x32xf32> to vector<8x32xbf16>
    %67 = vector.extract_strided_slice %40 {offsets = [0, 32], sizes = [8, 32], strides = [1, 1]} : vector<8x128xf32> to vector<8x32xf32>
    %68 = arith.truncf %67 : vector<8x32xf32> to vector<8x32xbf16>
    %cst_29 = arith.constant dense<0.000000e+00> : vector<8x8xf32>
    %69 = tpu.matmul %64, %66, %cst_29 {dimension_numbers = #tpu.dot_dimension_numbers<[1], [1], [0], [0], [0, 0, 1, 0], [], []>} : vector<8x32xbf16>, vector<8x32xbf16>, vector<8x8xf32> -> vector<8x8xf32>
    %cst_30 = arith.constant 0.176776692 : f32
    %70 = vector.broadcast %cst_30 : f32 to vector<8x8xf32>
    %71 = arith.mulf %69, %70 : vector<8x8xf32>
    %cst_31 = arith.constant dense<0xFF800000> : vector<8xf32>
    %72 = vector.multi_reduction <maximumf>, %71, %cst_31 [1] : vector<8x8xf32> to vector<8xf32>
    %73 = vector.shape_cast %72 : vector<8xf32> to vector<8x1xf32>
    %74 = vector.broadcast %73 : vector<8x1xf32> to vector<8x8xf32>
    %75 = arith.subf %71, %74 : vector<8x8xf32>
    %76 = math.exp %75 : vector<8x8xf32>
    %cst_32 = arith.constant dense<0.000000e+00> : vector<8xf32>
    %77 = vector.multi_reduction <add>, %76, %cst_32 [1] : vector<8x8xf32> to vector<8xf32>
    %78 = vector.shape_cast %77 : vector<8xf32> to vector<8x1xf32>
    %79 = tpu.reciprocal %78 {approx = true} : vector<8x1xf32> -> vector<8x1xf32>
    %80 = vector.broadcast %79 : vector<8x1xf32> to vector<8x8xf32>
    %81 = arith.mulf %76, %80 : vector<8x8xf32>
    %82 = arith.truncf %81 : vector<8x8xf32> to vector<8x8xbf16>
    %cst_33 = arith.constant dense<0.000000e+00> : vector<8x32xf32>
    %83 = tpu.matmul %82, %68, %cst_33 {dimension_numbers = #tpu.dot_dimension_numbers<[1], [0], [0], [1], [0, 0, 1, 1], [], []>} : vector<8x8xbf16>, vector<8x32xbf16>, vector<8x32xf32> -> vector<8x32xf32>
    %84 = vector.extract_strided_slice %30 {offsets = [0, 64], sizes = [8, 32], strides = [1, 1]} : vector<8x128xf32> to vector<8x32xf32>
    %85 = arith.truncf %84 : vector<8x32xf32> to vector<8x32xbf16>
    %86 = vector.extract_strided_slice %34 {offsets = [0, 64], sizes = [8, 32], strides = [1, 1]} : vector<8x128xf32> to vector<8x32xf32>
    %87 = arith.truncf %86 : vector<8x32xf32> to vector<8x32xbf16>
    %88 = vector.extract_strided_slice %40 {offsets = [0, 64], sizes = [8, 32], strides = [1, 1]} : vector<8x128xf32> to vector<8x32xf32>
    %89 = arith.truncf %88 : vector<8x32xf32> to vector<8x32xbf16>
    %cst_34 = arith.constant dense<0.000000e+00> : vector<8x8xf32>
    %90 = tpu.matmul %85, %87, %cst_34 {dimension_numbers = #tpu.dot_dimension_numbers<[1], [1], [0], [0], [0, 0, 1, 0], [], []>} : vector<8x32xbf16>, vector<8x32xbf16>, vector<8x8xf32> -> vector<8x8xf32>
    %cst_35 = arith.constant 0.176776692 : f32
    %91 = vector.broadcast %cst_35 : f32 to vector<8x8xf32>
    %92 = arith.mulf %90, %91 : vector<8x8xf32>
    %cst_36 = arith.constant dense<0xFF800000> : vector<8xf32>
    %93 = vector.multi_reduction <maximumf>, %92, %cst_36 [1] : vector<8x8xf32> to vector<8xf32>
    %94 = vector.shape_cast %93 : vector<8xf32> to vector<8x1xf32>
    %95 = vector.broadcast %94 : vector<8x1xf32> to vector<8x8xf32>
    %96 = arith.subf %92, %95 : vector<8x8xf32>
    %97 = math.exp %96 : vector<8x8xf32>
    %cst_37 = arith.constant dense<0.000000e+00> : vector<8xf32>
    %98 = vector.multi_reduction <add>, %97, %cst_37 [1] : vector<8x8xf32> to vector<8xf32>
    %99 = vector.shape_cast %98 : vector<8xf32> to vector<8x1xf32>
    %100 = tpu.reciprocal %99 {approx = true} : vector<8x1xf32> -> vector<8x1xf32>
    %101 = vector.broadcast %100 : vector<8x1xf32> to vector<8x8xf32>
    %102 = arith.mulf %97, %101 : vector<8x8xf32>
    %103 = arith.truncf %102 : vector<8x8xf32> to vector<8x8xbf16>
    %cst_38 = arith.constant dense<0.000000e+00> : vector<8x32xf32>
    %104 = tpu.matmul %103, %89, %cst_38 {dimension_numbers = #tpu.dot_dimension_numbers<[1], [0], [0], [1], [0, 0, 1, 1], [], []>} : vector<8x8xbf16>, vector<8x32xbf16>, vector<8x32xf32> -> vector<8x32xf32>
    %105 = vector.extract_strided_slice %30 {offsets = [0, 96], sizes = [8, 32], strides = [1, 1]} : vector<8x128xf32> to vector<8x32xf32>
    %106 = arith.truncf %105 : vector<8x32xf32> to vector<8x32xbf16>
    %107 = vector.extract_strided_slice %34 {offsets = [0, 96], sizes = [8, 32], strides = [1, 1]} : vector<8x128xf32> to vector<8x32xf32>
    %108 = arith.truncf %107 : vector<8x32xf32> to vector<8x32xbf16>
    %109 = vector.extract_strided_slice %40 {offsets = [0, 96], sizes = [8, 32], strides = [1, 1]} : vector<8x128xf32> to vector<8x32xf32>
    %110 = arith.truncf %109 : vector<8x32xf32> to vector<8x32xbf16>
    %cst_39 = arith.constant dense<0.000000e+00> : vector<8x8xf32>
    %111 = tpu.matmul %106, %108, %cst_39 {dimension_numbers = #tpu.dot_dimension_numbers<[1], [1], [0], [0], [0, 0, 1, 0], [], []>} : vector<8x32xbf16>, vector<8x32xbf16>, vector<8x8xf32> -> vector<8x8xf32>
    %cst_40 = arith.constant 0.176776692 : f32
    %112 = vector.broadcast %cst_40 : f32 to vector<8x8xf32>
    %113 = arith.mulf %111, %112 : vector<8x8xf32>
    %cst_41 = arith.constant dense<0xFF800000> : vector<8xf32>
    %114 = vector.multi_reduction <maximumf>, %113, %cst_41 [1] : vector<8x8xf32> to vector<8xf32>
    %115 = vector.shape_cast %114 : vector<8xf32> to vector<8x1xf32>
    %116 = vector.broadcast %115 : vector<8x1xf32> to vector<8x8xf32>
    %117 = arith.subf %113, %116 : vector<8x8xf32>
    %118 = math.exp %117 : vector<8x8xf32>
    %cst_42 = arith.constant dense<0.000000e+00> : vector<8xf32>
    %119 = vector.multi_reduction <add>, %118, %cst_42 [1] : vector<8x8xf32> to vector<8xf32>
    %120 = vector.shape_cast %119 : vector<8xf32> to vector<8x1xf32>
    %121 = tpu.reciprocal %120 {approx = true} : vector<8x1xf32> -> vector<8x1xf32>
    %122 = vector.broadcast %121 : vector<8x1xf32> to vector<8x8xf32>
    %123 = arith.mulf %118, %122 : vector<8x8xf32>
    %124 = arith.truncf %123 : vector<8x8xf32> to vector<8x8xbf16>
    %cst_43 = arith.constant dense<0.000000e+00> : vector<8x32xf32>
    %125 = tpu.matmul %124, %110, %cst_43 {dimension_numbers = #tpu.dot_dimension_numbers<[1], [0], [0], [1], [0, 0, 1, 1], [], []>} : vector<8x8xbf16>, vector<8x32xbf16>, vector<8x32xf32> -> vector<8x32xf32>
    %126 = tpu.concatenate %62, %83, %104, %125 in 1 : vector<8x32xf32>, vector<8x32xf32>, vector<8x32xf32>, vector<8x32xf32> -> vector<8x128xf32>
    %127 = arith.truncf %126 : vector<8x128xf32> to vector<8x128xbf16>
    %cst_44 = arith.constant dense<0.000000e+00> : vector<8x128xf32>
    %128 = tpu.matmul %127, %41, %cst_44 {dimension_numbers = #tpu.dot_dimension_numbers<[1], [0], [0], [1], [0, 0, 1, 1], [], []>} : vector<8x128xbf16>, vector<128x128xbf16>, vector<8x128xf32> -> vector<8x128xf32>
    %129 = arith.addf %1, %128 : vector<8x128xf32>
    %130 = vector.extract_strided_slice %6 {offsets = [6, 0], sizes = [1, 128], strides = [1, 1]} : vector<15x128xf32> to vector<1x128xf32>
    %131 = vector.broadcast %130 : vector<1x128xf32> to vector<8x128xf32>
    %132 = arith.addf %129, %131 : vector<8x128xf32>
    %133 = vector.extract_strided_slice %6 {offsets = [7, 0], sizes = [1, 128], strides = [1, 1]} : vector<15x128xf32> to vector<1x128xf32>
    %134 = vector.extract_strided_slice %6 {offsets = [8, 0], sizes = [1, 128], strides = [1, 1]} : vector<15x128xf32> to vector<1x128xf32>
    %cst_45 = arith.constant dense<0.000000e+00> : vector<8xf32>
    %135 = vector.multi_reduction <add>, %132, %cst_45 [1] : vector<8x128xf32> to vector<8xf32>
    %136 = vector.shape_cast %135 : vector<8xf32> to vector<8x1xf32>
    %cst_46 = arith.constant 1.280000e+02 : f32
    %137 = vector.broadcast %cst_46 : f32 to vector<8x1xf32>
    %138 = arith.divf %136, %137 : vector<8x1xf32>
    %139 = arith.mulf %132, %132 : vector<8x128xf32>
    %cst_47 = arith.constant dense<0.000000e+00> : vector<8xf32>
    %140 = vector.multi_reduction <add>, %139, %cst_47 [1] : vector<8x128xf32> to vector<8xf32>
    %141 = vector.shape_cast %140 : vector<8xf32> to vector<8x1xf32>
    %cst_48 = arith.constant 1.280000e+02 : f32
    %142 = vector.broadcast %cst_48 : f32 to vector<8x1xf32>
    %143 = arith.divf %141, %142 : vector<8x1xf32>
    %144 = arith.mulf %138, %138 : vector<8x1xf32>
    %145 = arith.subf %143, %144 : vector<8x1xf32>
    %146 = vector.broadcast %138 : vector<8x1xf32> to vector<8x128xf32>
    %147 = arith.subf %132, %146 : vector<8x128xf32>
    %cst_49 = arith.constant 9.99999974E-6 : f32
    %148 = vector.broadcast %cst_49 : f32 to vector<8x1xf32>
    %149 = arith.addf %145, %148 : vector<8x1xf32>
    %150 = math.rsqrt %149 : vector<8x1xf32>
    %151 = vector.broadcast %150 : vector<8x1xf32> to vector<8x128xf32>
    %152 = arith.mulf %147, %151 : vector<8x128xf32>
    %153 = vector.broadcast %133 : vector<1x128xf32> to vector<8x128xf32>
    %154 = arith.mulf %152, %153 : vector<8x128xf32>
    %155 = vector.broadcast %134 : vector<1x128xf32> to vector<8x128xf32>
    %156 = arith.addf %154, %155 : vector<8x128xf32>
    %157 = arith.addf %156, %22 : vector<8x128xf32>
    %c0_50 = arith.constant 0 : index
    %c0_51 = arith.constant 0 : index
    %158 = vector.load %arg9[%c0_50, %c0_51] : memref<128x128xbf16, #tpu.memory_space<vmem>>, vector<128x128xbf16>
    %159 = arith.truncf %157 : vector<8x128xf32> to vector<8x128xbf16>
    %cst_52 = arith.constant dense<0.000000e+00> : vector<8x128xf32>
    %160 = tpu.matmul %159, %158, %cst_52 {dimension_numbers = #tpu.dot_dimension_numbers<[1], [0], [0], [1], [0, 0, 1, 1], [], []>} : vector<8x128xbf16>, vector<128x128xbf16>, vector<8x128xf32> -> vector<8x128xf32>
    %161 = vector.extract_strided_slice %6 {offsets = [9, 0], sizes = [1, 128], strides = [1, 1]} : vector<15x128xf32> to vector<1x128xf32>
    %162 = vector.broadcast %161 : vector<1x128xf32> to vector<8x128xf32>
    %163 = arith.addf %160, %162 : vector<8x128xf32>
    %c0_53 = arith.constant 0 : index
    %c0_54 = arith.constant 0 : index
    %164 = vector.load %arg10[%c0_53, %c0_54] : memref<128x256xbf16, #tpu.memory_space<vmem>>, vector<128x256xbf16>
    %165 = arith.truncf %5 : vector<16x128xf32> to vector<16x128xbf16>
    %cst_55 = arith.constant dense<0.000000e+00> : vector<16x256xf32>
    %166 = tpu.matmul %165, %164, %cst_55 {dimension_numbers = #tpu.dot_dimension_numbers<[1], [0], [0], [1], [0, 0, 1, 1], [], []>} : vector<16x128xbf16>, vector<128x256xbf16>, vector<16x256xf32> -> vector<16x256xf32>
    %167 = vector.extract_strided_slice %166 {offsets = [0, 0], sizes = [16, 128], strides = [1, 1]} : vector<16x256xf32> to vector<16x128xf32>
    %168 = vector.extract_strided_slice %6 {offsets = [10, 0], sizes = [1, 128], strides = [1, 1]} : vector<15x128xf32> to vector<1x128xf32>
    %169 = vector.broadcast %168 : vector<1x128xf32> to vector<16x128xf32>
    %170 = arith.addf %167, %169 : vector<16x128xf32>
    %171 = vector.extract_strided_slice %166 {offsets = [0, 128], sizes = [16, 128], strides = [1, 1]} : vector<16x256xf32> to vector<16x128xf32>
    %172 = vector.extract_strided_slice %6 {offsets = [11, 0], sizes = [1, 128], strides = [1, 1]} : vector<15x128xf32> to vector<1x128xf32>
    %173 = vector.broadcast %172 : vector<1x128xf32> to vector<16x128xf32>
    %174 = arith.addf %171, %173 : vector<16x128xf32>
    %c0_56 = arith.constant 0 : index
    %c0_57 = arith.constant 0 : index
    %175 = vector.load %arg11[%c0_56, %c0_57] : memref<128x128xbf16, #tpu.memory_space<vmem>>, vector<128x128xbf16>
    %176 = vector.extract_strided_slice %163 {offsets = [0, 0], sizes = [8, 32], strides = [1, 1]} : vector<8x128xf32> to vector<8x32xf32>
    %177 = arith.truncf %176 : vector<8x32xf32> to vector<8x32xbf16>
    %178 = vector.extract_strided_slice %170 {offsets = [0, 0], sizes = [16, 32], strides = [1, 1]} : vector<16x128xf32> to vector<16x32xf32>
    %179 = arith.truncf %178 : vector<16x32xf32> to vector<16x32xbf16>
    %180 = vector.extract_strided_slice %174 {offsets = [0, 0], sizes = [16, 32], strides = [1, 1]} : vector<16x128xf32> to vector<16x32xf32>
    %181 = arith.truncf %180 : vector<16x32xf32> to vector<16x32xbf16>
    %cst_58 = arith.constant dense<0.000000e+00> : vector<8x16xf32>
    %182 = tpu.matmul %177, %179, %cst_58 {dimension_numbers = #tpu.dot_dimension_numbers<[1], [1], [0], [0], [0, 0, 1, 0], [], []>} : vector<8x32xbf16>, vector<16x32xbf16>, vector<8x16xf32> -> vector<8x16xf32>
    %cst_59 = arith.constant 0.176776692 : f32
    %183 = vector.broadcast %cst_59 : f32 to vector<8x16xf32>
    %184 = arith.mulf %182, %183 : vector<8x16xf32>
    %cst_60 = arith.constant dense<0xFF800000> : vector<8xf32>
    %185 = vector.multi_reduction <maximumf>, %184, %cst_60 [1] : vector<8x16xf32> to vector<8xf32>
    %186 = vector.shape_cast %185 : vector<8xf32> to vector<8x1xf32>
    %187 = vector.broadcast %186 : vector<8x1xf32> to vector<8x16xf32>
    %188 = arith.subf %184, %187 : vector<8x16xf32>
    %189 = math.exp %188 : vector<8x16xf32>
    %cst_61 = arith.constant dense<0.000000e+00> : vector<8xf32>
    %190 = vector.multi_reduction <add>, %189, %cst_61 [1] : vector<8x16xf32> to vector<8xf32>
    %191 = vector.shape_cast %190 : vector<8xf32> to vector<8x1xf32>
    %192 = tpu.reciprocal %191 {approx = true} : vector<8x1xf32> -> vector<8x1xf32>
    %193 = vector.broadcast %192 : vector<8x1xf32> to vector<8x16xf32>
    %194 = arith.mulf %189, %193 : vector<8x16xf32>
    %195 = arith.truncf %194 : vector<8x16xf32> to vector<8x16xbf16>
    %cst_62 = arith.constant dense<0.000000e+00> : vector<8x32xf32>
    %196 = tpu.matmul %195, %181, %cst_62 {dimension_numbers = #tpu.dot_dimension_numbers<[1], [0], [0], [1], [0, 0, 1, 1], [], []>} : vector<8x16xbf16>, vector<16x32xbf16>, vector<8x32xf32> -> vector<8x32xf32>
    %197 = vector.extract_strided_slice %163 {offsets = [0, 32], sizes = [8, 32], strides = [1, 1]} : vector<8x128xf32> to vector<8x32xf32>
    %198 = arith.truncf %197 : vector<8x32xf32> to vector<8x32xbf16>
    %199 = vector.extract_strided_slice %170 {offsets = [0, 32], sizes = [16, 32], strides = [1, 1]} : vector<16x128xf32> to vector<16x32xf32>
    %200 = arith.truncf %199 : vector<16x32xf32> to vector<16x32xbf16>
    %201 = vector.extract_strided_slice %174 {offsets = [0, 32], sizes = [16, 32], strides = [1, 1]} : vector<16x128xf32> to vector<16x32xf32>
    %202 = arith.truncf %201 : vector<16x32xf32> to vector<16x32xbf16>
    %cst_63 = arith.constant dense<0.000000e+00> : vector<8x16xf32>
    %203 = tpu.matmul %198, %200, %cst_63 {dimension_numbers = #tpu.dot_dimension_numbers<[1], [1], [0], [0], [0, 0, 1, 0], [], []>} : vector<8x32xbf16>, vector<16x32xbf16>, vector<8x16xf32> -> vector<8x16xf32>
    %cst_64 = arith.constant 0.176776692 : f32
    %204 = vector.broadcast %cst_64 : f32 to vector<8x16xf32>
    %205 = arith.mulf %203, %204 : vector<8x16xf32>
    %cst_65 = arith.constant dense<0xFF800000> : vector<8xf32>
    %206 = vector.multi_reduction <maximumf>, %205, %cst_65 [1] : vector<8x16xf32> to vector<8xf32>
    %207 = vector.shape_cast %206 : vector<8xf32> to vector<8x1xf32>
    %208 = vector.broadcast %207 : vector<8x1xf32> to vector<8x16xf32>
    %209 = arith.subf %205, %208 : vector<8x16xf32>
    %210 = math.exp %209 : vector<8x16xf32>
    %cst_66 = arith.constant dense<0.000000e+00> : vector<8xf32>
    %211 = vector.multi_reduction <add>, %210, %cst_66 [1] : vector<8x16xf32> to vector<8xf32>
    %212 = vector.shape_cast %211 : vector<8xf32> to vector<8x1xf32>
    %213 = tpu.reciprocal %212 {approx = true} : vector<8x1xf32> -> vector<8x1xf32>
    %214 = vector.broadcast %213 : vector<8x1xf32> to vector<8x16xf32>
    %215 = arith.mulf %210, %214 : vector<8x16xf32>
    %216 = arith.truncf %215 : vector<8x16xf32> to vector<8x16xbf16>
    %cst_67 = arith.constant dense<0.000000e+00> : vector<8x32xf32>
    %217 = tpu.matmul %216, %202, %cst_67 {dimension_numbers = #tpu.dot_dimension_numbers<[1], [0], [0], [1], [0, 0, 1, 1], [], []>} : vector<8x16xbf16>, vector<16x32xbf16>, vector<8x32xf32> -> vector<8x32xf32>
    %218 = vector.extract_strided_slice %163 {offsets = [0, 64], sizes = [8, 32], strides = [1, 1]} : vector<8x128xf32> to vector<8x32xf32>
    %219 = arith.truncf %218 : vector<8x32xf32> to vector<8x32xbf16>
    %220 = vector.extract_strided_slice %170 {offsets = [0, 64], sizes = [16, 32], strides = [1, 1]} : vector<16x128xf32> to vector<16x32xf32>
    %221 = arith.truncf %220 : vector<16x32xf32> to vector<16x32xbf16>
    %222 = vector.extract_strided_slice %174 {offsets = [0, 64], sizes = [16, 32], strides = [1, 1]} : vector<16x128xf32> to vector<16x32xf32>
    %223 = arith.truncf %222 : vector<16x32xf32> to vector<16x32xbf16>
    %cst_68 = arith.constant dense<0.000000e+00> : vector<8x16xf32>
    %224 = tpu.matmul %219, %221, %cst_68 {dimension_numbers = #tpu.dot_dimension_numbers<[1], [1], [0], [0], [0, 0, 1, 0], [], []>} : vector<8x32xbf16>, vector<16x32xbf16>, vector<8x16xf32> -> vector<8x16xf32>
    %cst_69 = arith.constant 0.176776692 : f32
    %225 = vector.broadcast %cst_69 : f32 to vector<8x16xf32>
    %226 = arith.mulf %224, %225 : vector<8x16xf32>
    %cst_70 = arith.constant dense<0xFF800000> : vector<8xf32>
    %227 = vector.multi_reduction <maximumf>, %226, %cst_70 [1] : vector<8x16xf32> to vector<8xf32>
    %228 = vector.shape_cast %227 : vector<8xf32> to vector<8x1xf32>
    %229 = vector.broadcast %228 : vector<8x1xf32> to vector<8x16xf32>
    %230 = arith.subf %226, %229 : vector<8x16xf32>
    %231 = math.exp %230 : vector<8x16xf32>
    %cst_71 = arith.constant dense<0.000000e+00> : vector<8xf32>
    %232 = vector.multi_reduction <add>, %231, %cst_71 [1] : vector<8x16xf32> to vector<8xf32>
    %233 = vector.shape_cast %232 : vector<8xf32> to vector<8x1xf32>
    %234 = tpu.reciprocal %233 {approx = true} : vector<8x1xf32> -> vector<8x1xf32>
    %235 = vector.broadcast %234 : vector<8x1xf32> to vector<8x16xf32>
    %236 = arith.mulf %231, %235 : vector<8x16xf32>
    %237 = arith.truncf %236 : vector<8x16xf32> to vector<8x16xbf16>
    %cst_72 = arith.constant dense<0.000000e+00> : vector<8x32xf32>
    %238 = tpu.matmul %237, %223, %cst_72 {dimension_numbers = #tpu.dot_dimension_numbers<[1], [0], [0], [1], [0, 0, 1, 1], [], []>} : vector<8x16xbf16>, vector<16x32xbf16>, vector<8x32xf32> -> vector<8x32xf32>
    %239 = vector.extract_strided_slice %163 {offsets = [0, 96], sizes = [8, 32], strides = [1, 1]} : vector<8x128xf32> to vector<8x32xf32>
    %240 = arith.truncf %239 : vector<8x32xf32> to vector<8x32xbf16>
    %241 = vector.extract_strided_slice %170 {offsets = [0, 96], sizes = [16, 32], strides = [1, 1]} : vector<16x128xf32> to vector<16x32xf32>
    %242 = arith.truncf %241 : vector<16x32xf32> to vector<16x32xbf16>
    %243 = vector.extract_strided_slice %174 {offsets = [0, 96], sizes = [16, 32], strides = [1, 1]} : vector<16x128xf32> to vector<16x32xf32>
    %244 = arith.truncf %243 : vector<16x32xf32> to vector<16x32xbf16>
    %cst_73 = arith.constant dense<0.000000e+00> : vector<8x16xf32>
    %245 = tpu.matmul %240, %242, %cst_73 {dimension_numbers = #tpu.dot_dimension_numbers<[1], [1], [0], [0], [0, 0, 1, 0], [], []>} : vector<8x32xbf16>, vector<16x32xbf16>, vector<8x16xf32> -> vector<8x16xf32>
    %cst_74 = arith.constant 0.176776692 : f32
    %246 = vector.broadcast %cst_74 : f32 to vector<8x16xf32>
    %247 = arith.mulf %245, %246 : vector<8x16xf32>
    %cst_75 = arith.constant dense<0xFF800000> : vector<8xf32>
    %248 = vector.multi_reduction <maximumf>, %247, %cst_75 [1] : vector<8x16xf32> to vector<8xf32>
    %249 = vector.shape_cast %248 : vector<8xf32> to vector<8x1xf32>
    %250 = vector.broadcast %249 : vector<8x1xf32> to vector<8x16xf32>
    %251 = arith.subf %247, %250 : vector<8x16xf32>
    %252 = math.exp %251 : vector<8x16xf32>
    %cst_76 = arith.constant dense<0.000000e+00> : vector<8xf32>
    %253 = vector.multi_reduction <add>, %252, %cst_76 [1] : vector<8x16xf32> to vector<8xf32>
    %254 = vector.shape_cast %253 : vector<8xf32> to vector<8x1xf32>
    %255 = tpu.reciprocal %254 {approx = true} : vector<8x1xf32> -> vector<8x1xf32>
    %256 = vector.broadcast %255 : vector<8x1xf32> to vector<8x16xf32>
    %257 = arith.mulf %252, %256 : vector<8x16xf32>
    %258 = arith.truncf %257 : vector<8x16xf32> to vector<8x16xbf16>
    %cst_77 = arith.constant dense<0.000000e+00> : vector<8x32xf32>
    %259 = tpu.matmul %258, %244, %cst_77 {dimension_numbers = #tpu.dot_dimension_numbers<[1], [0], [0], [1], [0, 0, 1, 1], [], []>} : vector<8x16xbf16>, vector<16x32xbf16>, vector<8x32xf32> -> vector<8x32xf32>
    %260 = tpu.concatenate %196, %217, %238, %259 in 1 : vector<8x32xf32>, vector<8x32xf32>, vector<8x32xf32>, vector<8x32xf32> -> vector<8x128xf32>
    %261 = arith.truncf %260 : vector<8x128xf32> to vector<8x128xbf16>
    %cst_78 = arith.constant dense<0.000000e+00> : vector<8x128xf32>
    %262 = tpu.matmul %261, %175, %cst_78 {dimension_numbers = #tpu.dot_dimension_numbers<[1], [0], [0], [1], [0, 0, 1, 1], [], []>} : vector<8x128xbf16>, vector<128x128xbf16>, vector<8x128xf32> -> vector<8x128xf32>
    %263 = arith.addf %156, %262 : vector<8x128xf32>
    %264 = vector.extract_strided_slice %6 {offsets = [12, 0], sizes = [1, 128], strides = [1, 1]} : vector<15x128xf32> to vector<1x128xf32>
    %265 = vector.broadcast %264 : vector<1x128xf32> to vector<8x128xf32>
    %266 = arith.addf %263, %265 : vector<8x128xf32>
    %267 = vector.extract_strided_slice %6 {offsets = [13, 0], sizes = [1, 128], strides = [1, 1]} : vector<15x128xf32> to vector<1x128xf32>
    %268 = vector.extract_strided_slice %6 {offsets = [14, 0], sizes = [1, 128], strides = [1, 1]} : vector<15x128xf32> to vector<1x128xf32>
    %cst_79 = arith.constant dense<0.000000e+00> : vector<8xf32>
    %269 = vector.multi_reduction <add>, %266, %cst_79 [1] : vector<8x128xf32> to vector<8xf32>
    %270 = vector.shape_cast %269 : vector<8xf32> to vector<8x1xf32>
    %cst_80 = arith.constant 1.280000e+02 : f32
    %271 = vector.broadcast %cst_80 : f32 to vector<8x1xf32>
    %272 = arith.divf %270, %271 : vector<8x1xf32>
    %273 = arith.mulf %266, %266 : vector<8x128xf32>
    %cst_81 = arith.constant dense<0.000000e+00> : vector<8xf32>
    %274 = vector.multi_reduction <add>, %273, %cst_81 [1] : vector<8x128xf32> to vector<8xf32>
    %275 = vector.shape_cast %274 : vector<8xf32> to vector<8x1xf32>
    %cst_82 = arith.constant 1.280000e+02 : f32
    %276 = vector.broadcast %cst_82 : f32 to vector<8x1xf32>
    %277 = arith.divf %275, %276 : vector<8x1xf32>
    %278 = arith.mulf %272, %272 : vector<8x1xf32>
    %279 = arith.subf %277, %278 : vector<8x1xf32>
    %280 = vector.broadcast %272 : vector<8x1xf32> to vector<8x128xf32>
    %281 = arith.subf %266, %280 : vector<8x128xf32>
    %cst_83 = arith.constant 9.99999974E-6 : f32
    %282 = vector.broadcast %cst_83 : f32 to vector<8x1xf32>
    %283 = arith.addf %279, %282 : vector<8x1xf32>
    %284 = math.rsqrt %283 : vector<8x1xf32>
    %285 = vector.broadcast %284 : vector<8x1xf32> to vector<8x128xf32>
    %286 = arith.mulf %281, %285 : vector<8x128xf32>
    %287 = vector.broadcast %267 : vector<1x128xf32> to vector<8x128xf32>
    %288 = arith.mulf %286, %287 : vector<8x128xf32>
    %289 = vector.broadcast %268 : vector<1x128xf32> to vector<8x128xf32>
    %290 = arith.addf %288, %289 : vector<8x128xf32>
    %c0_84 = arith.constant 0 : index
    %c0_85 = arith.constant 0 : index
    %c0_86 = arith.constant 0 : index
    %291 = vector.load %arg13[%c0_84, %c0_85, %c0_86] : memref<1x8x128xf32, #tpu.memory_space<vmem>>, vector<1x8x128xf32>
    %292 = vector.shape_cast %291 : vector<1x8x128xf32> to vector<8x128xf32>
    %293 = vector.shape_cast %290 : vector<8x128xf32> to vector<1x8x128xf32>
    tpu.vector_store %arg13[%c0_84, %c0_85, %c0_86], %293 {strides = array<i32>} : memref<1x8x128xf32, #tpu.memory_space<vmem>>, vector<1x8x128xf32>,
    return
  }
  func.func @transform_0(%arg0: i32) -> (i32, i32, i32) {
    %c0_i32 = arith.constant 0 : i32
    %c0_i32_0 = arith.constant 0 : i32
    %c0_i32_1 = arith.constant 0 : i32
    return %arg0, %c0_i32, %c0_i32_0 : i32, i32, i32
  }
  func.func @transform_1(%arg0: i32) -> (i32, i32, i32) {
    %c0_i32 = arith.constant 0 : i32
    %c0_i32_0 = arith.constant 0 : i32
    %c0_i32_1 = arith.constant 0 : i32
    return %arg0, %c0_i32, %c0_i32_0 : i32, i32, i32
  }
  func.func @transform_2(%arg0: i32) -> (i32, i32, i32) {
    %c0_i32 = arith.constant 0 : i32
    %c0_i32_0 = arith.constant 0 : i32
    %c0_i32_1 = arith.constant 0 : i32
    return %arg0, %c0_i32, %c0_i32_0 : i32, i32, i32
  }
  func.func @transform_3(%arg0: i32) -> (i32, i32) {
    %c0_i32 = arith.constant 0 : i32
    %c0_i32_0 = arith.constant 0 : i32
    %c0_i32_1 = arith.constant 0 : i32
    return %c0_i32, %c0_i32_0 : i32, i32
  }
  func.func @transform_4(%arg0: i32) -> (i32, i32) {
    %c0_i32 = arith.constant 0 : i32
    %c0_i32_0 = arith.constant 0 : i32
    %c0_i32_1 = arith.constant 0 : i32
    return %c0_i32, %c0_i32_0 : i32, i32
  }
  func.func @transform_5(%arg0: i32) -> (i32, i32) {
    %c0_i32 = arith.constant 0 : i32
    %c0_i32_0 = arith.constant 0 : i32
    %c0_i32_1 = arith.constant 0 : i32
    return %c0_i32, %c0_i32_0 : i32, i32
  }
  func.func @transform_6(%arg0: i32) -> (i32, i32) {
    %c0_i32 = arith.constant 0 : i32
    %c0_i32_0 = arith.constant 0 : i32
    %c0_i32_1 = arith.constant 0 : i32
    return %c0_i32, %c0_i32_0 : i32, i32
  }
  func.func @transform_7(%arg0: i32) -> (i32, i32) {
    %c0_i32 = arith.constant 0 : i32
    %c0_i32_0 = arith.constant 0 : i32
    %c0_i32_1 = arith.constant 0 : i32
    return %c0_i32, %c0_i32_0 : i32, i32
  }
  func.func @transform_8(%arg0: i32) -> (i32, i32) {
    %c0_i32 = arith.constant 0 : i32
    %c0_i32_0 = arith.constant 0 : i32
    %c0_i32_1 = arith.constant 0 : i32
    return %c0_i32, %c0_i32_0 : i32, i32
  }
  func.func @transform_9(%arg0: i32) -> (i32, i32) {
    %c0_i32 = arith.constant 0 : i32
    %c0_i32_0 = arith.constant 0 : i32
    %c0_i32_1 = arith.constant 0 : i32
    return %c0_i32, %c0_i32_0 : i32, i32
  }
  func.func @transform_10(%arg0: i32) -> (i32, i32) {
    %c0_i32 = arith.constant 0 : i32
    %c0_i32_0 = arith.constant 0 : i32
    %c0_i32_1 = arith.constant 0 : i32
    return %c0_i32, %c0_i32_0 : i32, i32
  }
  func.func @transform_11(%arg0: i32) -> (i32, i32) {
    %c0_i32 = arith.constant 0 : i32
    %c0_i32_0 = arith.constant 0 : i32
    %c0_i32_1 = arith.constant 0 : i32
    return %c0_i32, %c0_i32_0 : i32, i32
  }
  func.func @transform_12(%arg0: i32) -> (i32, i32, i32) {
    %c0_i32 = arith.constant 0 : i32
    %c0_i32_0 = arith.constant 0 : i32
    %c0_i32_1 = arith.constant 0 : i32
    return %arg0, %c0_i32, %c0_i32_0 : i32, i32, i32
  }
}

module attributes {stable_mosaic.version = 11 : i64} {
  func.func @_attn_block_kernel(%arg0: i32, %arg1: memref<1x8x128xf32, #tpu.memory_space<vmem>>, %arg2: memref<1x8x128xf32, #tpu.memory_space<vmem>>, %arg3: memref<1x16x128xf32, #tpu.memory_space<vmem>>, %arg4: memref<128x256xbf16, #tpu.memory_space<vmem>>, %arg5: memref<256x128xbf16, #tpu.memory_space<vmem>>, %arg6: memref<128x256xbf16, #tpu.memory_space<vmem>>, %arg7: memref<128x128xbf16, #tpu.memory_space<vmem>>, %arg8: memref<128x128xbf16, #tpu.memory_space<vmem>>, %arg9: memref<128x128xbf16, #tpu.memory_space<vmem>>, %arg10: memref<128x256xbf16, #tpu.memory_space<vmem>>, %arg11: memref<128x128xbf16, #tpu.memory_space<vmem>>, %arg12: memref<15x128xf32, #tpu.memory_space<vmem>>, %arg13: memref<1x8x128xf32, #tpu.memory_space<vmem>>) attributes {dimension_semantics = [#tpu.dimension_semantics<parallel>], iteration_bounds = array<i64: 2>, scalar_prefetch = 0 : i64, scratch_operands = 0 : i64, tpu.core_type = #tpu.core_type<tc>, window_params = [{transform_indices = @transform_0, window_bounds = array<i64: 1, 8, 128>}, {transform_indices = @transform_1, window_bounds = array<i64: 1, 8, 128>}, {transform_indices = @transform_2, window_bounds = array<i64: 1, 16, 128>}, {pipeline_mode = #tpu.pipeline_mode<synchronous>, transform_indices = @transform_3, window_bounds = array<i64: 128, 256>}, {pipeline_mode = #tpu.pipeline_mode<synchronous>, transform_indices = @transform_4, window_bounds = array<i64: 256, 128>}, {pipeline_mode = #tpu.pipeline_mode<synchronous>, transform_indices = @transform_5, window_bounds = array<i64: 128, 256>}, {pipeline_mode = #tpu.pipeline_mode<synchronous>, transform_indices = @transform_6, window_bounds = array<i64: 128, 128>}, {pipeline_mode = #tpu.pipeline_mode<synchronous>, transform_indices = @transform_7, window_bounds = array<i64: 128, 128>}, {pipeline_mode = #tpu.pipeline_mode<synchronous>, transform_indices = @transform_8, window_bounds = array<i64: 128, 128>}, {pipeline_mode = #tpu.pipeline_mode<synchronous>, transform_indices = @transform_9, window_bounds = array<i64: 128, 256>}, {pipeline_mode = #tpu.pipeline_mode<synchronous>, transform_indices = @transform_10, window_bounds = array<i64: 128, 128>}, {pipeline_mode = #tpu.pipeline_mode<synchronous>, transform_indices = @transform_11, window_bounds = array<i64: 15, 128>}, {transform_indices = @transform_12, window_bounds = array<i64: 1, 8, 128>}]} {
    %c0 = arith.constant 0 : index
    %c0_0 = arith.constant 0 : index
    %c0_1 = arith.constant 0 : index
    %0 = vector.load %arg1[%c0, %c0_0, %c0_1] : memref<1x8x128xf32, #tpu.memory_space<vmem>>, vector<1x8x128xf32>
    %1 = vector.shape_cast %0 : vector<1x8x128xf32> to vector<8x128xf32>
    %c0_2 = arith.constant 0 : index
    %c0_3 = arith.constant 0 : index
    %c0_4 = arith.constant 0 : index
    %2 = vector.load %arg2[%c0_2, %c0_3, %c0_4] : memref<1x8x128xf32, #tpu.memory_space<vmem>>, vector<1x8x128xf32>
    %3 = vector.shape_cast %2 : vector<1x8x128xf32> to vector<8x128xf32>
    %c0_5 = arith.constant 0 : index
    %c0_6 = arith.constant 0 : index
    %c0_7 = arith.constant 0 : index
    %4 = vector.load %arg3[%c0_5, %c0_6, %c0_7] : memref<1x16x128xf32, #tpu.memory_space<vmem>>, vector<1x16x128xf32>
    %5 = vector.shape_cast %4 : vector<1x16x128xf32> to vector<16x128xf32>
    %c0_8 = arith.constant 0 : index
    %c0_9 = arith.constant 0 : index
    %6 = vector.load %arg12[%c0_8, %c0_9] : memref<15x128xf32, #tpu.memory_space<vmem>>, vector<15x128xf32>
    %7 = vector.extract_strided_slice %6 {offsets = [0, 0], sizes = [1, 128], strides = [1, 1]} : vector<15x128xf32> to vector<1x128xf32>
    %8 = vector.extract_strided_slice %6 {offsets = [1, 0], sizes = [1, 128], strides = [1, 1]} : vector<15x128xf32> to vector<1x128xf32>
    %9 = tpu.concatenate %7, %8 in 1 : vector<1x128xf32>, vector<1x128xf32> -> vector<1x256xf32>
    %c0_10 = arith.constant 0 : index
    %c0_11 = arith.constant 0 : index
    %10 = vector.load %arg4[%c0_10, %c0_11] : memref<128x256xbf16, #tpu.memory_space<vmem>>, vector<128x256xbf16>
    %11 = arith.truncf %3 : vector<8x128xf32> to vector<8x128xbf16>
    %cst = arith.constant dense<0.000000e+00> : vector<8x256xf32>
    %12 = tpu.matmul %11, %10, %cst {dimension_numbers = #tpu.dot_dimension_numbers<[1], [0], [0], [1], [0, 0, 1, 1], [], []>} : vector<8x128xbf16>, vector<128x256xbf16>, vector<8x256xf32> -> vector<8x256xf32>
    %13 = vector.broadcast %9 : vector<1x256xf32> to vector<8x256xf32>
    %14 = arith.addf %12, %13 : vector<8x256xf32>
    %cst_12 = arith.constant 0.000000e+00 : f32
    %15 = vector.broadcast %cst_12 : f32 to vector<8x256xf32>
    %16 = arith.maximumf %14, %15 : vector<8x256xf32>
    %c0_13 = arith.constant 0 : index
    %c0_14 = arith.constant 0 : index
    %17 = vector.load %arg5[%c0_13, %c0_14] : memref<256x128xbf16, #tpu.memory_space<vmem>>, vector<256x128xbf16>
    %18 = arith.truncf %16 : vector<8x256xf32> to vector<8x256xbf16>
    %cst_15 = arith.constant dense<0.000000e+00> : vector<8x128xf32>
    %19 = tpu.matmul %18, %17, %cst_15 {dimension_numbers = #tpu.dot_dimension_numbers<[1], [0], [0], [1], [0, 0, 1, 1], [], []>} : vector<8x256xbf16>, vector<256x128xbf16>, vector<8x128xf32> -> vector<8x128xf32>
    %20 = vector.extract_strided_slice %6 {offsets = [2, 0], sizes = [1, 128], strides = [1, 1]} : vector<15x128xf32> to vector<1x128xf32>
    %21 = vector.broadcast %20 : vector<1x128xf32> to vector<8x128xf32>
    %22 = arith.addf %19, %21 : vector<8x128xf32>
    %23 = arith.addf %1, %22 : vector<8x128xf32>
    %c0_16 = arith.constant 0 : index
    %c0_17 = arith.constant 0 : index
    %24 = vector.load %arg6[%c0_16, %c0_17] : memref<128x256xbf16, #tpu.memory_space<vmem>>, vector<128x256xbf16>
    %25 = arith.truncf %23 : vector<8x128xf32> to vector<8x128xbf16>
    %cst_18 = arith.constant dense<0.000000e+00> : vector<8x256xf32>
    %26 = tpu.matmul %25, %24, %cst_18 {dimension_numbers = #tpu.dot_dimension_numbers<[1], [0], [0], [1], [0, 0, 1, 1], [], []>} : vector<8x128xbf16>, vector<128x256xbf16>, vector<8x256xf32> -> vector<8x256xf32>
    %27 = vector.extract_strided_slice %26 {offsets = [0, 0], sizes = [8, 128], strides = [1, 1]} : vector<8x256xf32> to vector<8x128xf32>
    %28 = vector.extract_strided_slice %6 {offsets = [3, 0], sizes = [1, 128], strides = [1, 1]} : vector<15x128xf32> to vector<1x128xf32>
    %29 = vector.broadcast %28 : vector<1x128xf32> to vector<8x128xf32>
    %30 = arith.addf %27, %29 : vector<8x128xf32>
    %31 = vector.extract_strided_slice %26 {offsets = [0, 128], sizes = [8, 128], strides = [1, 1]} : vector<8x256xf32> to vector<8x128xf32>
    %32 = vector.extract_strided_slice %6 {offsets = [4, 0], sizes = [1, 128], strides = [1, 1]} : vector<15x128xf32> to vector<1x128xf32>
    %33 = vector.broadcast %32 : vector<1x128xf32> to vector<8x128xf32>
    %34 = arith.addf %31, %33 : vector<8x128xf32>
    %c0_19 = arith.constant 0 : index
    %c0_20 = arith.constant 0 : index
    %35 = vector.load %arg7[%c0_19, %c0_20] : memref<128x128xbf16, #tpu.memory_space<vmem>>, vector<128x128xbf16>
    %36 = arith.truncf %1 : vector<8x128xf32> to vector<8x128xbf16>
    %cst_21 = arith.constant dense<0.000000e+00> : vector<8x128xf32>
    %37 = tpu.matmul %36, %35, %cst_21 {dimension_numbers = #tpu.dot_dimension_numbers<[1], [0], [0], [1], [0, 0, 1, 1], [], []>} : vector<8x128xbf16>, vector<128x128xbf16>, vector<8x128xf32> -> vector<8x128xf32>
    %38 = vector.extract_strided_slice %6 {offsets = [5, 0], sizes = [1, 128], strides = [1, 1]} : vector<15x128xf32> to vector<1x128xf32>
    %39 = vector.broadcast %38 : vector<1x128xf32> to vector<8x128xf32>
    %40 = arith.addf %37, %39 : vector<8x128xf32>
    %c0_22 = arith.constant 0 : index
    %c0_23 = arith.constant 0 : index
    %41 = vector.load %arg8[%c0_22, %c0_23] : memref<128x128xbf16, #tpu.memory_space<vmem>>, vector<128x128xbf16>
    %42 = vector.extract_strided_slice %30 {offsets = [0, 0], sizes = [8, 32], strides = [1, 1]} : vector<8x128xf32> to vector<8x32xf32>
    %43 = arith.truncf %42 : vector<8x32xf32> to vector<8x32xbf16>
    %44 = vector.extract_strided_slice %34 {offsets = [0, 0], sizes = [8, 32], strides = [1, 1]} : vector<8x128xf32> to vector<8x32xf32>
    %45 = arith.truncf %44 : vector<8x32xf32> to vector<8x32xbf16>
    %46 = vector.extract_strided_slice %40 {offsets = [0, 0], sizes = [8, 32], strides = [1, 1]} : vector<8x128xf32> to vector<8x32xf32>
    %47 = arith.truncf %46 : vector<8x32xf32> to vector<8x32xbf16>
    %cst_24 = arith.constant dense<0.000000e+00> : vector<8x8xf32>
    %48 = tpu.matmul %43, %45, %cst_24 {dimension_numbers = #tpu.dot_dimension_numbers<[1], [1], [0], [0], [0, 0, 1, 0], [], []>} : vector<8x32xbf16>, vector<8x32xbf16>, vector<8x8xf32> -> vector<8x8xf32>
    %cst_25 = arith.constant 0.176776692 : f32
    %49 = vector.broadcast %cst_25 : f32 to vector<8x8xf32>
    %50 = arith.mulf %48, %49 : vector<8x8xf32>
    %cst_26 = arith.constant dense<0xFF800000> : vector<8xf32>
    %51 = vector.multi_reduction <maximumf>, %50, %cst_26 [1] : vector<8x8xf32> to vector<8xf32>
    %52 = vector.shape_cast %51 : vector<8xf32> to vector<8x1xf32>
    %53 = vector.broadcast %52 : vector<8x1xf32> to vector<8x8xf32>
    %54 = arith.subf %50, %53 : vector<8x8xf32>
    %55 = math.exp %54 : vector<8x8xf32>
    %cst_27 = arith.constant dense<0.000000e+00> : vector<8xf32>
    %56 = vector.multi_reduction <add>, %55, %cst_27 [1] : vector<8x8xf32> to vector<8xf32>
    %57 = vector.shape_cast %56 : vector<8xf32> to vector<8x1xf32>
    %58 = tpu.reciprocal %57 {approx = true} : vector<8x1xf32> -> vector<8x1xf32>
    %59 = vector.broadcast %58 : vector<8x1xf32> to vector<8x8xf32>
    %60 = arith.mulf %55, %59 : vector<8x8xf32>
    %61 = arith.truncf %60 : vector<8x8xf32> to vector<8x8xbf16>
    %cst_28 = arith.constant dense<0.000000e+00> : vector<8x32xf32>
    %62 = tpu.matmul %61, %47, %cst_28 {dimension_numbers = #tpu.dot_dimension_numbers<[1], [0], [0], [1], [0, 0, 1, 1], [], []>} : vector<8x8xbf16>, vector<8x32xbf16>, vector<8x32xf32> -> vector<8x32xf32>
    %63 = vector.extract_strided_slice %30 {offsets = [0, 32], sizes = [8, 32], strides = [1, 1]} : vector<8x128xf32> to vector<8x32xf32>
    %64 = arith.truncf %63 : vector<8x32xf32> to vector<8x32xbf16>
    %65 = vector.extract_strided_slice %34 {offsets = [0, 32], sizes = [8, 32], strides = [1, 1]} : vector<8x128xf32> to vector<8x32xf32>
    %66 = arith.truncf %65 : vector<8x32xf32> to vector<8x32xbf16>
    %67 = vector.extract_strided_slice %40 {offsets = [0, 32], sizes = [8, 32], strides = [1, 1]} : vector<8x128xf32> to vector<8x32xf32>
    %68 = arith.truncf %67 : vector<8x32xf32> to vector<8x32xbf16>
    %cst_29 = arith.constant dense<0.000000e+00> : vector<8x8xf32>
    %69 = tpu.matmul %64, %66, %cst_29 {dimension_numbers = #tpu.dot_dimension_numbers<[1], [1], [0], [0], [0, 0, 1, 0], [], []>} : vector<8x32xbf16>, vector<8x32xbf16>, vector<8x8xf32> -> vector<8x8xf32>
    %cst_30 = arith.constant 0.176776692 : f32
    %70 = vector.broadcast %cst_30 : f32 to vector<8x8xf32>
    %71 = arith.mulf %69, %70 : vector<8x8xf32>
    %cst_31 = arith.constant dense<0xFF800000> : vector<8xf32>
    %72 = vector.multi_reduction <maximumf>, %71, %cst_31 [1] : vector<8x8xf32> to vector<8xf32>
    %73 = vector.shape_cast %72 : vector<8xf32> to vector<8x1xf32>
    %74 = vector.broadcast %73 : vector<8x1xf32> to vector<8x8xf32>
    %75 = arith.subf %71, %74 : vector<8x8xf32>
    %76 = math.exp %75 : vector<8x8xf32>
    %cst_32 = arith.constant dense<0.000000e+00> : vector<8xf32>
    %77 = vector.multi_reduction <add>, %76, %cst_32 [1] : vector<8x8xf32> to vector<8xf32>
    %78 = vector.shape_cast %77 : vector<8xf32> to vector<8x1xf32>
    %79 = tpu.reciprocal %78 {approx = true} : vector<8x1xf32> -> vector<8x1xf32>
    %80 = vector.broadcast %79 : vector<8x1xf32> to vector<8x8xf32>
    %81 = arith.mulf %76, %80 : vector<8x8xf32>
    %82 = arith.truncf %81 : vector<8x8xf32> to vector<8x8xbf16>
    %cst_33 = arith.constant dense<0.000000e+00> : vector<8x32xf32>
    %83 = tpu.matmul %82, %68, %cst_33 {dimension_numbers = #tpu.dot_dimension_numbers<[1], [0], [0], [1], [0, 0, 1, 1], [], []>} : vector<8x8xbf16>, vector<8x32xbf16>, vector<8x32xf32> -> vector<8x32xf32>
    %84 = vector.extract_strided_slice %30 {offsets = [0, 64], sizes = [8, 32], strides = [1, 1]} : vector<8x128xf32> to vector<8x32xf32>
    %85 = arith.truncf %84 : vector<8x32xf32> to vector<8x32xbf16>
    %86 = vector.extract_strided_slice %34 {offsets = [0, 64], sizes = [8, 32], strides = [1, 1]} : vector<8x128xf32> to vector<8x32xf32>
    %87 = arith.truncf %86 : vector<8x32xf32> to vector<8x32xbf16>
    %88 = vector.extract_strided_slice %40 {offsets = [0, 64], sizes = [8, 32], strides = [1, 1]} : vector<8x128xf32> to vector<8x32xf32>
    %89 = arith.truncf %88 : vector<8x32xf32> to vector<8x32xbf16>
    %cst_34 = arith.constant dense<0.000000e+00> : vector<8x8xf32>
    %90 = tpu.matmul %85, %87, %cst_34 {dimension_numbers = #tpu.dot_dimension_numbers<[1], [1], [0], [0], [0, 0, 1, 0], [], []>} : vector<8x32xbf16>, vector<8x32xbf16>, vector<8x8xf32> -> vector<8x8xf32>
    %cst_35 = arith.constant 0.176776692 : f32
    %91 = vector.broadcast %cst_35 : f32 to vector<8x8xf32>
    %92 = arith.mulf %90, %91 : vector<8x8xf32>
    %cst_36 = arith.constant dense<0xFF800000> : vector<8xf32>
    %93 = vector.multi_reduction <maximumf>, %92, %cst_36 [1] : vector<8x8xf32> to vector<8xf32>
    %94 = vector.shape_cast %93 : vector<8xf32> to vector<8x1xf32>
    %95 = vector.broadcast %94 : vector<8x1xf32> to vector<8x8xf32>
    %96 = arith.subf %92, %95 : vector<8x8xf32>
    %97 = math.exp %96 : vector<8x8xf32>
    %cst_37 = arith.constant dense<0.000000e+00> : vector<8xf32>
    %98 = vector.multi_reduction <add>, %97, %cst_37 [1] : vector<8x8xf32> to vector<8xf32>
    %99 = vector.shape_cast %98 : vector<8xf32> to vector<8x1xf32>
    %100 = tpu.reciprocal %99 {approx = true} : vector<8x1xf32> -> vector<8x1xf32>
    %101 = vector.broadcast %100 : vector<8x1xf32> to vector<8x8xf32>
    %102 = arith.mulf %97, %101 : vector<8x8xf32>
    %103 = arith.truncf %102 : vector<8x8xf32> to vector<8x8xbf16>
    %cst_38 = arith.constant dense<0.000000e+00> : vector<8x32xf32>
    %104 = tpu.matmul %103, %89, %cst_38 {dimension_numbers = #tpu.dot_dimension_numbers<[1], [0], [0], [1], [0, 0, 1, 1], [], []>} : vector<8x8xbf16>, vector<8x32xbf16>, vector<8x32xf32> -> vector<8x32xf32>
    %105 = vector.extract_strided_slice %30 {offsets = [0, 96], sizes = [8, 32], strides = [1, 1]} : vector<8x128xf32> to vector<8x32xf32>
    %106 = arith.truncf %105 : vector<8x32xf32> to vector<8x32xbf16>
    %107 = vector.extract_strided_slice %34 {offsets = [0, 96], sizes = [8, 32], strides = [1, 1]} : vector<8x128xf32> to vector<8x32xf32>
    %108 = arith.truncf %107 : vector<8x32xf32> to vector<8x32xbf16>
    %109 = vector.extract_strided_slice %40 {offsets = [0, 96], sizes = [8, 32], strides = [1, 1]} : vector<8x128xf32> to vector<8x32xf32>
    %110 = arith.truncf %109 : vector<8x32xf32> to vector<8x32xbf16>
    %cst_39 = arith.constant dense<0.000000e+00> : vector<8x8xf32>
    %111 = tpu.matmul %106, %108, %cst_39 {dimension_numbers = #tpu.dot_dimension_numbers<[1], [1], [0], [0], [0, 0, 1, 0], [], []>} : vector<8x32xbf16>, vector<8x32xbf16>, vector<8x8xf32> -> vector<8x8xf32>
    %cst_40 = arith.constant 0.176776692 : f32
    %112 = vector.broadcast %cst_40 : f32 to vector<8x8xf32>
    %113 = arith.mulf %111, %112 : vector<8x8xf32>
    %cst_41 = arith.constant dense<0xFF800000> : vector<8xf32>
    %114 = vector.multi_reduction <maximumf>, %113, %cst_41 [1] : vector<8x8xf32> to vector<8xf32>
    %115 = vector.shape_cast %114 : vector<8xf32> to vector<8x1xf32>
    %116 = vector.broadcast %115 : vector<8x1xf32> to vector<8x8xf32>
    %117 = arith.subf %113, %116 : vector<8x8xf32>
    %118 = math.exp %117 : vector<8x8xf32>
    %cst_42 = arith.constant dense<0.000000e+00> : vector<8xf32>
    %119 = vector.multi_reduction <add>, %118, %cst_42 [1] : vector<8x8xf32> to vector<8xf32>
    %120 = vector.shape_cast %119 : vector<8xf32> to vector<8x1xf32>
    %121 = tpu.reciprocal %120 {approx = true} : vector<8x1xf32> -> vector<8x1xf32>
    %122 = vector.broadcast %121 : vector<8x1xf32> to vector<8x8xf32>
    %123 = arith.mulf %118, %122 : vector<8x8xf32>
    %124 = arith.truncf %123 : vector<8x8xf32> to vector<8x8xbf16>
    %cst_43 = arith.constant dense<0.000000e+00> : vector<8x32xf32>
    %125 = tpu.matmul %124, %110, %cst_43 {dimension_numbers = #tpu.dot_dimension_numbers<[1], [0], [0], [1], [0, 0, 1, 1], [], []>} : vector<8x8xbf16>, vector<8x32xbf16>, vector<8x32xf32> -> vector<8x32xf32>
    %126 = tpu.concatenate %62, %83, %104, %125 in 1 : vector<8x32xf32>, vector<8x32xf32>, vector<8x32xf32>, vector<8x32xf32> -> vector<8x128xf32>
    %127 = arith.truncf %126 : vector<8x128xf32> to vector<8x128xbf16>
    %cst_44 = arith.constant dense<0.000000e+00> : vector<8x128xf32>
    %128 = tpu.matmul %127, %41, %cst_44 {dimension_numbers = #tpu.dot_dimension_numbers<[1], [0], [0], [1], [0, 0, 1, 1], [], []>} : vector<8x128xbf16>, vector<128x128xbf16>, vector<8x128xf32> -> vector<8x128xf32>
    %129 = arith.addf %1, %128 : vector<8x128xf32>
    %130 = vector.extract_strided_slice %6 {offsets = [6, 0], sizes = [1, 128], strides = [1, 1]} : vector<15x128xf32> to vector<1x128xf32>
    %131 = vector.broadcast %130 : vector<1x128xf32> to vector<8x128xf32>
    %132 = arith.addf %129, %131 : vector<8x128xf32>
    %133 = vector.extract_strided_slice %6 {offsets = [7, 0], sizes = [1, 128], strides = [1, 1]} : vector<15x128xf32> to vector<1x128xf32>
    %134 = vector.extract_strided_slice %6 {offsets = [8, 0], sizes = [1, 128], strides = [1, 1]} : vector<15x128xf32> to vector<1x128xf32>
    %cst_45 = arith.constant dense<0.000000e+00> : vector<8xf32>
    %135 = vector.multi_reduction <add>, %132, %cst_45 [1] : vector<8x128xf32> to vector<8xf32>
    %136 = vector.shape_cast %135 : vector<8xf32> to vector<8x1xf32>
    %cst_46 = arith.constant 1.280000e+02 : f32
    %137 = vector.broadcast %cst_46 : f32 to vector<8x1xf32>
    %138 = arith.divf %136, %137 : vector<8x1xf32>
    %139 = arith.mulf %132, %132 : vector<8x128xf32>
    %cst_47 = arith.constant dense<0.000000e+00> : vector<8xf32>
    %140 = vector.multi_reduction <add>, %139, %cst_47 [1] : vector<8x128xf32> to vector<8xf32>
    %141 = vector.shape_cast %140 : vector<8xf32> to vector<8x1xf32>
    %cst_48 = arith.constant 1.280000e+02 : f32
    %142 = vector.broadcast %cst_48 : f32 to vector<8x1xf32>
    %143 = arith.divf %141, %142 : vector<8x1xf32>
    %144 = arith.mulf %138, %138 : vector<8x1xf32>
    %145 = arith.subf %143, %144 : vector<8x1xf32>
    %146 = vector.broadcast %138 : vector<8x1xf32> to vector<8x128xf32>
    %147 = arith.subf %132, %146 : vector<8x128xf32>
    %cst_49 = arith.constant 9.99999974E-6 : f32
    %148 = vector.broadcast %cst_49 : f32 to vector<8x1xf32>
    %149 = arith.addf %145, %148 : vector<8x1xf32>
    %150 = math.rsqrt %149 : vector<8x1xf32>
    %151 = vector.broadcast %150 : vector<8x1xf32> to vector<8x128xf32>
    %152 = arith.mulf %147, %151 : vector<8x128xf32>
    %153 = vector.broadcast %133 : vector<1x128xf32> to vector<8x128xf32>
    %154 = arith.mulf %152, %153 : vector<8x128xf32>
    %155 = vector.broadcast %134 : vector<1x128xf32> to vector<8x128xf32>
    %156 = arith.addf %154, %155 : vector<8x128xf32>
    %157 = arith.addf %156, %22 : vector<8x128xf32>
    %c0_50 = arith.constant 0 : index
    %c0_51 = arith.constant 0 : index
    %158 = vector.load %arg9[%c0_50, %c0_51] : memref<128x128xbf16, #tpu.memory_space<vmem>>, vector<128x128xbf16>
    %159 = arith.truncf %157 : vector<8x128xf32> to vector<8x128xbf16>
    %cst_52 = arith.constant dense<0.000000e+00> : vector<8x128xf32>
    %160 = tpu.matmul %159, %158, %cst_52 {dimension_numbers = #tpu.dot_dimension_numbers<[1], [0], [0], [1], [0, 0, 1, 1], [], []>} : vector<8x128xbf16>, vector<128x128xbf16>, vector<8x128xf32> -> vector<8x128xf32>
    %161 = vector.extract_strided_slice %6 {offsets = [9, 0], sizes = [1, 128], strides = [1, 1]} : vector<15x128xf32> to vector<1x128xf32>
    %162 = vector.broadcast %161 : vector<1x128xf32> to vector<8x128xf32>
    %163 = arith.addf %160, %162 : vector<8x128xf32>
    %c0_53 = arith.constant 0 : index
    %c0_54 = arith.constant 0 : index
    %164 = vector.load %arg10[%c0_53, %c0_54] : memref<128x256xbf16, #tpu.memory_space<vmem>>, vector<128x256xbf16>
    %165 = arith.truncf %5 : vector<16x128xf32> to vector<16x128xbf16>
    %cst_55 = arith.constant dense<0.000000e+00> : vector<16x256xf32>
    %166 = tpu.matmul %165, %164, %cst_55 {dimension_numbers = #tpu.dot_dimension_numbers<[1], [0], [0], [1], [0, 0, 1, 1], [], []>} : vector<16x128xbf16>, vector<128x256xbf16>, vector<16x256xf32> -> vector<16x256xf32>
    %167 = vector.extract_strided_slice %166 {offsets = [0, 0], sizes = [16, 128], strides = [1, 1]} : vector<16x256xf32> to vector<16x128xf32>
    %168 = vector.extract_strided_slice %6 {offsets = [10, 0], sizes = [1, 128], strides = [1, 1]} : vector<15x128xf32> to vector<1x128xf32>
    %169 = vector.broadcast %168 : vector<1x128xf32> to vector<16x128xf32>
    %170 = arith.addf %167, %169 : vector<16x128xf32>
    %171 = vector.extract_strided_slice %166 {offsets = [0, 128], sizes = [16, 128], strides = [1, 1]} : vector<16x256xf32> to vector<16x128xf32>
    %172 = vector.extract_strided_slice %6 {offsets = [11, 0], sizes = [1, 128], strides = [1, 1]} : vector<15x128xf32> to vector<1x128xf32>
    %173 = vector.broadcast %172 : vector<1x128xf32> to vector<16x128xf32>
    %174 = arith.addf %171, %173 : vector<16x128xf32>
    %c0_56 = arith.constant 0 : index
    %c0_57 = arith.constant 0 : index
    %175 = vector.load %arg11[%c0_56, %c0_57] : memref<128x128xbf16, #tpu.memory_space<vmem>>, vector<128x128xbf16>
    %176 = vector.extract_strided_slice %163 {offsets = [0, 0], sizes = [8, 32], strides = [1, 1]} : vector<8x128xf32> to vector<8x32xf32>
    %177 = arith.truncf %176 : vector<8x32xf32> to vector<8x32xbf16>
    %178 = vector.extract_strided_slice %170 {offsets = [0, 0], sizes = [16, 32], strides = [1, 1]} : vector<16x128xf32> to vector<16x32xf32>
    %179 = arith.truncf %178 : vector<16x32xf32> to vector<16x32xbf16>
    %180 = vector.extract_strided_slice %174 {offsets = [0, 0], sizes = [16, 32], strides = [1, 1]} : vector<16x128xf32> to vector<16x32xf32>
    %181 = arith.truncf %180 : vector<16x32xf32> to vector<16x32xbf16>
    %cst_58 = arith.constant dense<0.000000e+00> : vector<8x16xf32>
    %182 = tpu.matmul %177, %179, %cst_58 {dimension_numbers = #tpu.dot_dimension_numbers<[1], [1], [0], [0], [0, 0, 1, 0], [], []>} : vector<8x32xbf16>, vector<16x32xbf16>, vector<8x16xf32> -> vector<8x16xf32>
    %cst_59 = arith.constant 0.176776692 : f32
    %183 = vector.broadcast %cst_59 : f32 to vector<8x16xf32>
    %184 = arith.mulf %182, %183 : vector<8x16xf32>
    %cst_60 = arith.constant dense<0xFF800000> : vector<8xf32>
    %185 = vector.multi_reduction <maximumf>, %184, %cst_60 [1] : vector<8x16xf32> to vector<8xf32>
    %186 = vector.shape_cast %185 : vector<8xf32> to vector<8x1xf32>
    %187 = vector.broadcast %186 : vector<8x1xf32> to vector<8x16xf32>
    %188 = arith.subf %184, %187 : vector<8x16xf32>
    %189 = math.exp %188 : vector<8x16xf32>
    %cst_61 = arith.constant dense<0.000000e+00> : vector<8xf32>
    %190 = vector.multi_reduction <add>, %189, %cst_61 [1] : vector<8x16xf32> to vector<8xf32>
    %191 = vector.shape_cast %190 : vector<8xf32> to vector<8x1xf32>
    %192 = tpu.reciprocal %191 {approx = true} : vector<8x1xf32> -> vector<8x1xf32>
    %193 = vector.broadcast %192 : vector<8x1xf32> to vector<8x16xf32>
    %194 = arith.mulf %189, %193 : vector<8x16xf32>
    %195 = arith.truncf %194 : vector<8x16xf32> to vector<8x16xbf16>
    %cst_62 = arith.constant dense<0.000000e+00> : vector<8x32xf32>
    %196 = tpu.matmul %195, %181, %cst_62 {dimension_numbers = #tpu.dot_dimension_numbers<[1], [0], [0], [1], [0, 0, 1, 1], [], []>} : vector<8x16xbf16>, vector<16x32xbf16>, vector<8x32xf32> -> vector<8x32xf32>
    %197 = vector.extract_strided_slice %163 {offsets = [0, 32], sizes = [8, 32], strides = [1, 1]} : vector<8x128xf32> to vector<8x32xf32>
    %198 = arith.truncf %197 : vector<8x32xf32> to vector<8x32xbf16>
    %199 = vector.extract_strided_slice %170 {offsets = [0, 32], sizes = [16, 32], strides = [1, 1]} : vector<16x128xf32> to vector<16x32xf32>
    %200 = arith.truncf %199 : vector<16x32xf32> to vector<16x32xbf16>
    %201 = vector.extract_strided_slice %174 {offsets = [0, 32], sizes = [16, 32], strides = [1, 1]} : vector<16x128xf32> to vector<16x32xf32>
    %202 = arith.truncf %201 : vector<16x32xf32> to vector<16x32xbf16>
    %cst_63 = arith.constant dense<0.000000e+00> : vector<8x16xf32>
    %203 = tpu.matmul %198, %200, %cst_63 {dimension_numbers = #tpu.dot_dimension_numbers<[1], [1], [0], [0], [0, 0, 1, 0], [], []>} : vector<8x32xbf16>, vector<16x32xbf16>, vector<8x16xf32> -> vector<8x16xf32>
    %cst_64 = arith.constant 0.176776692 : f32
    %204 = vector.broadcast %cst_64 : f32 to vector<8x16xf32>
    %205 = arith.mulf %203, %204 : vector<8x16xf32>
    %cst_65 = arith.constant dense<0xFF800000> : vector<8xf32>
    %206 = vector.multi_reduction <maximumf>, %205, %cst_65 [1] : vector<8x16xf32> to vector<8xf32>
    %207 = vector.shape_cast %206 : vector<8xf32> to vector<8x1xf32>
    %208 = vector.broadcast %207 : vector<8x1xf32> to vector<8x16xf32>
    %209 = arith.subf %205, %208 : vector<8x16xf32>
    %210 = math.exp %209 : vector<8x16xf32>
    %cst_66 = arith.constant dense<0.000000e+00> : vector<8xf32>
    %211 = vector.multi_reduction <add>, %210, %cst_66 [1] : vector<8x16xf32> to vector<8xf32>
    %212 = vector.shape_cast %211 : vector<8xf32> to vector<8x1xf32>
    %213 = tpu.reciprocal %212 {approx = true} : vector<8x1xf32> -> vector<8x1xf32>
    %214 = vector.broadcast %213 : vector<8x1xf32> to vector<8x16xf32>
    %215 = arith.mulf %210, %214 : vector<8x16xf32>
    %216 = arith.truncf %215 : vector<8x16xf32> to vector<8x16xbf16>
    %cst_67 = arith.constant dense<0.000000e+00> : vector<8x32xf32>
    %217 = tpu.matmul %216, %202, %cst_67 {dimension_numbers = #tpu.dot_dimension_numbers<[1], [0], [0], [1], [0, 0, 1, 1], [], []>} : vector<8x16xbf16>, vector<16x32xbf16>, vector<8x32xf32> -> vector<8x32xf32>
    %218 = vector.extract_strided_slice %163 {offsets = [0, 64], sizes = [8, 32], strides = [1, 1]} : vector<8x128xf32> to vector<8x32xf32>
    %219 = arith.truncf %218 : vector<8x32xf32> to vector<8x32xbf16>
    %220 = vector.extract_strided_slice %170 {offsets = [0, 64], sizes = [16, 32], strides = [1, 1]} : vector<16x128xf32> to vector<16x32xf32>
    %221 = arith.truncf %220 : vector<16x32xf32> to vector<16x32xbf16>
    %222 = vector.extract_strided_slice %174 {offsets = [0, 64], sizes = [16, 32], strides = [1, 1]} : vector<16x128xf32> to vector<16x32xf32>
    %223 = arith.truncf %222 : vector<16x32xf32> to vector<16x32xbf16>
    %cst_68 = arith.constant dense<0.000000e+00> : vector<8x16xf32>
    %224 = tpu.matmul %219, %221, %cst_68 {dimension_numbers = #tpu.dot_dimension_numbers<[1], [1], [0], [0], [0, 0, 1, 0], [], []>} : vector<8x32xbf16>, vector<16x32xbf16>, vector<8x16xf32> -> vector<8x16xf32>
    %cst_69 = arith.constant 0.176776692 : f32
    %225 = vector.broadcast %cst_69 : f32 to vector<8x16xf32>
    %226 = arith.mulf %224, %225 : vector<8x16xf32>
    %cst_70 = arith.constant dense<0xFF800000> : vector<8xf32>
    %227 = vector.multi_reduction <maximumf>, %226, %cst_70 [1] : vector<8x16xf32> to vector<8xf32>
    %228 = vector.shape_cast %227 : vector<8xf32> to vector<8x1xf32>
    %229 = vector.broadcast %228 : vector<8x1xf32> to vector<8x16xf32>
    %230 = arith.subf %226, %229 : vector<8x16xf32>
    %231 = math.exp %230 : vector<8x16xf32>
    %cst_71 = arith.constant dense<0.000000e+00> : vector<8xf32>
    %232 = vector.multi_reduction <add>, %231, %cst_71 [1] : vector<8x16xf32> to vector<8xf32>
    %233 = vector.shape_cast %232 : vector<8xf32> to vector<8x1xf32>
    %234 = tpu.reciprocal %233 {approx = true} : vector<8x1xf32> -> vector<8x1xf32>
    %235 = vector.broadcast %234 : vector<8x1xf32> to vector<8x16xf32>
    %236 = arith.mulf %231, %235 : vector<8x16xf32>
    %237 = arith.truncf %236 : vector<8x16xf32> to vector<8x16xbf16>
    %cst_72 = arith.constant dense<0.000000e+00> : vector<8x32xf32>
    %238 = tpu.matmul %237, %223, %cst_72 {dimension_numbers = #tpu.dot_dimension_numbers<[1], [0], [0], [1], [0, 0, 1, 1], [], []>} : vector<8x16xbf16>, vector<16x32xbf16>, vector<8x32xf32> -> vector<8x32xf32>
    %239 = vector.extract_strided_slice %163 {offsets = [0, 96], sizes = [8, 32], strides = [1, 1]} : vector<8x128xf32> to vector<8x32xf32>
    %240 = arith.truncf %239 : vector<8x32xf32> to vector<8x32xbf16>
    %241 = vector.extract_strided_slice %170 {offsets = [0, 96], sizes = [16, 32], strides = [1, 1]} : vector<16x128xf32> to vector<16x32xf32>
    %242 = arith.truncf %241 : vector<16x32xf32> to vector<16x32xbf16>
    %243 = vector.extract_strided_slice %174 {offsets = [0, 96], sizes = [16, 32], strides = [1, 1]} : vector<16x128xf32> to vector<16x32xf32>
    %244 = arith.truncf %243 : vector<16x32xf32> to vector<16x32xbf16>
    %cst_73 = arith.constant dense<0.000000e+00> : vector<8x16xf32>
    %245 = tpu.matmul %240, %242, %cst_73 {dimension_numbers = #tpu.dot_dimension_numbers<[1], [1], [0], [0], [0, 0, 1, 0], [], []>} : vector<8x32xbf16>, vector<16x32xbf16>, vector<8x16xf32> -> vector<8x16xf32>
    %cst_74 = arith.constant 0.176776692 : f32
    %246 = vector.broadcast %cst_74 : f32 to vector<8x16xf32>
    %247 = arith.mulf %245, %246 : vector<8x16xf32>
    %cst_75 = arith.constant dense<0xFF800000> : vector<8xf32>
    %248 = vector.multi_reduction <maximumf>, %247, %cst_75 [1] : vector<8x16xf32> to vector<8xf32>
    %249 = vector.shape_cast %248 : vector<8xf32> to vector<8x1xf32>
    %250 = vector.broadcast %249 : vector<8x1xf32> to vector<8x16xf32>
    %251 = arith.subf %247, %250 : vector<8x16xf32>
    %252 = math.exp %251 : vector<8x16xf32>
    %cst_76 = arith.constant dense<0.000000e+00> : vector<8xf32>
    %253 = vector.multi_reduction <add>, %252, %cst_76 [1] : vector<8x16xf32> to vector<8xf32>
    %254 = vector.shape_cast %253 : vector<8xf32> to vector<8x1xf32>
    %255 = tpu.reciprocal %254 {approx = true} : vector<8x1xf32> -> vector<8x1xf32>
    %256 = vector.broadcast %255 : vector<8x1xf32> to vector<8x16xf32>
    %257 = arith.mulf %252, %256 : vector<8x16xf32>
    %258 = arith.truncf %257 : vector<8x16xf32> to vector<8x16xbf16>
    %cst_77 = arith.constant dense<0.000000e+00> : vector<8x32xf32>
    %259 = tpu.matmul %258, %244, %cst_77 {dimension_numbers = #tpu.dot_dimension_numbers<[1], [0], [0], [1], [0, 0, 1, 1], [], []>} : vector<8x16xbf16>, vector<16x32xbf16>, vector<8x32xf32> -> vector<8x32xf32>
    %260 = tpu.concatenate %196, %217, %238, %259 in 1 : vector<8x32xf32>, vector<8x32xf32>, vector<8x32xf32>, vector<8x32xf32> -> vector<8x128xf32>
    %261 = arith.truncf %260 : vector<8x128xf32> to vector<8x128xbf16>
    %cst_78 = arith.constant dense<0.000000e+00> : vector<8x128xf32>
    %262 = tpu.matmul %261, %175, %cst_78 {dimension_numbers = #tpu.dot_dimension_numbers<[1], [0], [0], [1], [0, 0, 1, 1], [], []>} : vector<8x128xbf16>, vector<128x128xbf16>, vector<8x128xf32> -> vector<8x128xf32>
    %263 = arith.addf %156, %262 : vector<8x128xf32>
    %264 = vector.extract_strided_slice %6 {offsets = [12, 0], sizes = [1, 128], strides = [1, 1]} : vector<15x128xf32> to vector<1x128xf32>
    %265 = vector.broadcast %264 : vector<1x128xf32> to vector<8x128xf32>
    %266 = arith.addf %263, %265 : vector<8x128xf32>
    %267 = vector.extract_strided_slice %6 {offsets = [13, 0], sizes = [1, 128], strides = [1, 1]} : vector<15x128xf32> to vector<1x128xf32>
    %268 = vector.extract_strided_slice %6 {offsets = [14, 0], sizes = [1, 128], strides = [1, 1]} : vector<15x128xf32> to vector<1x128xf32>
    %cst_79 = arith.constant dense<0.000000e+00> : vector<8xf32>
    %269 = vector.multi_reduction <add>, %266, %cst_79 [1] : vector<8x128xf32> to vector<8xf32>
    %270 = vector.shape_cast %269 : vector<8xf32> to vector<8x1xf32>
    %cst_80 = arith.constant 1.280000e+02 : f32
    %271 = vector.broadcast %cst_80 : f32 to vector<8x1xf32>
    %272 = arith.divf %270, %271 : vector<8x1xf32>
    %273 = arith.mulf %266, %266 : vector<8x128xf32>
    %cst_81 = arith.constant dense<0.000000e+00> : vector<8xf32>
    %274 = vector.multi_reduction <add>, %273, %cst_81 [1] : vector<8x128xf32> to vector<8xf32>
    %275 = vector.shape_cast %274 : vector<8xf32> to vector<8x1xf32>
    %cst_82 = arith.constant 1.280000e+02 : f32
    %276 = vector.broadcast %cst_82 : f32 to vector<8x1xf32>
    %277 = arith.divf %275, %276 : vector<8x1xf32>
    %278 = arith.mulf %272, %272 : vector<8x1xf32>
    %279 = arith.subf %277, %278 : vector<8x1xf32>
    %280 = vector.broadcast %272 : vector<8x1xf32> to vector<8x128xf32>
    %281 = arith.subf %266, %280 : vector<8x128xf32>
    %cst_83 = arith.constant 9.99999974E-6 : f32
    %282 = vector.broadcast %cst_83 : f32 to vector<8x1xf32>
    %283 = arith.addf %279, %282 : vector<8x1xf32>
    %284 = math.rsqrt %283 : vector<8x1xf32>
    %285 = vector.broadcast %284 : vector<8x1xf32> to vector<8x128xf32>
    %286 = arith.mulf %281, %285 : vector<8x128xf32>
    %287 = vector.broadcast %267 : vector<1x128xf32> to vector<8x128xf32>
    %288 = arith.mulf %286, %287 : vector<8x128xf32>
    %289 = vector.broadcast %268 : vector<1x128xf32> to vector<8x128xf32>
    %290 = arith.addf %288, %289 : vector<8x128xf32>
    %c0_84 = arith.constant 0 : index
    %c0_85 = arith.constant 0 : index
    %c0_86 = arith.constant 0 : index
    %291 = vector.load %arg13[%c0_84, %c0_85, %c0_86] : memref<1x8x128xf32, #tpu.memory_space<vmem>>, vector<1x8x128xf32>
    %292 = vector.shape_cast %291 : vector<1x8x128xf32> to vector<8x128xf32>
    %293 = vector.shape_cast %290 : vector<8x128xf32> to vector<1x8x128xf32>
    tpu.vector_store %arg13[%c0_84, %c0_85, %c0_86], %293 {strides = array<i32>} : memref<1x8x128xf32, #tpu.memory_space<vmem>>, vector<1x8x128xf32>,
    return
  }
  func.func @transform_0(%arg0: i32) -> (i32, i32, i32) {
    %c0_i32 = arith.constant 0 : i32
    %c0_i32_0 = arith.constant 0 : i32
    %c0_i32_1 = arith.constant 0 : i32
    return %arg0, %c0_i32, %c0_i32_0 : i32, i32, i32
  }
  func.func @transform_1(%arg0: i32) -> (i32, i32, i32) {
    %c0_i32 = arith.constant 0 : i32
    %c0_i32_0 = arith.constant 0 : i32
    %c0_i32_1 = arith.constant 0 : i32
    return %arg0, %c0_i32, %c0_i32_0 : i32, i32, i32
  }
  func.func @transform_2(%arg0: i32) -> (i32, i32, i32) {
    %c0_i32 = arith.constant 0 : i32
    %c0_i32_0 = arith.constant 0 : i32
    %c0_i32_1 = arith.constant 0 : i32
    return %arg0, %c0_i32, %c0_i32_0 : i32, i32, i32
  }
  func.func @transform_3(%arg0: i32) -> (i32, i32) {
    %c0_i32 = arith.constant 0 : i32
    %c0_i32_0 = arith.constant 0 : i32
    %c0_i32_1 = arith.constant 0 : i32
    return %c0_i32, %c0_i32_0 : i32, i32
  }
  func.func @transform_4(%arg0: i32) -> (i32, i32) {
    %c0_i32 = arith.constant 0 : i32
    %c0_i32_0 = arith.constant 0 : i32
    %c0_i32_1 = arith.constant 0 : i32
    return %c0_i32, %c0_i32_0 : i32, i32
  }
  func.func @transform_5(%arg0: i32) -> (i32, i32) {
    %c0_i32 = arith.constant 0 : i32
    %c0_i32_0 = arith.constant 0 : i32
    %c0_i32_1 = arith.constant 0 : i32
    return %c0_i32, %c0_i32_0 : i32, i32
  }
  func.func @transform_6(%arg0: i32) -> (i32, i32) {
    %c0_i32 = arith.constant 0 : i32
    %c0_i32_0 = arith.constant 0 : i32
    %c0_i32_1 = arith.constant 0 : i32
    return %c0_i32, %c0_i32_0 : i32, i32
  }
  func.func @transform_7(%arg0: i32) -> (i32, i32) {
    %c0_i32 = arith.constant 0 : i32
    %c0_i32_0 = arith.constant 0 : i32
    %c0_i32_1 = arith.constant 0 : i32
    return %c0_i32, %c0_i32_0 : i32, i32
  }
  func.func @transform_8(%arg0: i32) -> (i32, i32) {
    %c0_i32 = arith.constant 0 : i32
    %c0_i32_0 = arith.constant 0 : i32
    %c0_i32_1 = arith.constant 0 : i32
    return %c0_i32, %c0_i32_0 : i32, i32
  }
  func.func @transform_9(%arg0: i32) -> (i32, i32) {
    %c0_i32 = arith.constant 0 : i32
    %c0_i32_0 = arith.constant 0 : i32
    %c0_i32_1 = arith.constant 0 : i32
    return %c0_i32, %c0_i32_0 : i32, i32
  }
  func.func @transform_10(%arg0: i32) -> (i32, i32) {
    %c0_i32 = arith.constant 0 : i32
    %c0_i32_0 = arith.constant 0 : i32
    %c0_i32_1 = arith.constant 0 : i32
    return %c0_i32, %c0_i32_0 : i32, i32
  }
  func.func @transform_11(%arg0: i32) -> (i32, i32) {
    %c0_i32 = arith.constant 0 : i32
    %c0_i32_0 = arith.constant 0 : i32
    %c0_i32_1 = arith.constant 0 : i32
    return %c0_i32, %c0_i32_0 : i32, i32
  }
  func.func @transform_12(%arg0: i32) -> (i32, i32, i32) {
    %c0_i32 = arith.constant 0 : i32
    %c0_i32_0 = arith.constant 0 : i32
    %c0_i32_1 = arith.constant 0 : i32
    return %arg0, %c0_i32, %c0_i32_0 : i32, i32, i32
  }
}

</mosaic_0001>

<bundles_post_ra>
// kernel: transformer_decoder_forward.5
= control target key start
LH: loop header
LB: loop body
LE: loop exit
PB: predicated region body
PF: predicated region fallthrough
CT: control target
= control target key end

     0   :  { %s1510_s13 = smov 0   ;;  %s1767_s0 = inlined_call_operand.vmem [shape: f32[16,128], index: 0, kind: input, shape index: {}]   ;;  %s1768_s1 = inlined_call_operand.vmem [shape: f32[16,128], index: 1, kind: input, shape index: {}]   ;;  %s1769_s2 = inlined_call_operand.vmem [shape: bf16[128,256], index: 2, kind: input, shape index: {}]   ;;  %s1770_s3 = inlined_call_operand.vmem [shape: f32[1,256], index: 3, kind: input, shape index: {}]   ;;  %s1771_s4 = inlined_call_operand.vmem [shape: bf16[256,128], index: 4, kind: input, shape index: {}]   ;;  %s1772_s5 = inlined_call_operand.vmem [shape: bf16[128,128], index: 5, kind: input, shape index: {}]   ;;  %s1773_s6 = inlined_call_operand.vmem [shape: bf16[128,128], index: 6, kind: input, shape index: {}]   ;;  %s1774_s7 = inlined_call_operand.vmem [shape: bf16[128,128], index: 7, kind: input, shape index: {}]   ;;  %s1775_s8 = inlined_call_operand.vmem [shape: f32[6,128], index: 8, kind: input, shape index: {}]   ;;  %s1776_s9 = inlined_call_operand.vmem [shape: f32[16,128], index: 9, kind: output, shape index: {0}]   ;;  %s1777_s10 = inlined_call_operand.vmem [shape: f32[16,128], index: 10, kind: output, shape index: {1}]  }
   0x1 LB: > { %s1182_s14 = sadd.s32 4294967295, %s1450_s13   ;;  %p1186_p0 = scmp.ge.s32.totalorder %s1450_s13, 1  ;;  %s1450_s13 = sphi %s1510_s13, %s21_s13  }
   0x2   : > { %p323_p1 = scmp.lt.s32.totalorder %s1450_s13, 3 }
   0x4   : > { %p324_p2 = pnand %p1186_p0, %p323_p1 }
   0x5   : > { %v1370_v0 = vld [vmem:[%s1769_s2 + $0x4] ss:$8 sps:$4 sm:$0xff] (!%p324_p2)   ;;  %v1372_v1 = vld [vmem:[%s1769_s2] ss:$8 sps:$4 sm:$0xff] (!%p324_p2)   ;;  %v1452_v2 = vmov (!%p324_p2), 0   ;;  %p367_p3 = scmp.lt.s32.totalorder (!%p324_p2), %s1182_s14, 1  ;;  %v405_v35 = vlaneseq (!%p324_p2) }
   0x6   : > { %327 = sbr.rel (%p324_p2) target bundleno = 1327 (0x52f), region = 56  ;;  %527 = vmatprep.mubr.bf16.mxu0 (!%p324_p2), %v1452_v2  ;;  %495 = vmatprep.subr.bf16.mxu0 (!%p324_p2), %v1370_v0  ;;  %v1373_v3 = vld [vmem:[%s1769_s2 + $0x14] ss:$8 sps:$4 sm:$0xff] (!%p324_p2)   ;;  %v1375_v4 = vld [vmem:[%s1769_s2 + $0x10] ss:$8 sps:$4 sm:$0xff] (!%p324_p2)   ;;  %v1394_v10 = vld [vmem:[%s1771_s4 + $0x40] sm:$0xff] (!%p324_p2)  }
   0x7   : > { %496 = vmatpush1.bf16.msra.mxu0 (!%p324_p2), %v1372_v1  ;;  %v1376_v5 = vld [vmem:[%s1769_s2 + $0x24] ss:$8 sps:$4 sm:$0xff] (!%p324_p2)   ;;  %v1378_v6 = vld [vmem:[%s1769_s2 + $0x20] ss:$8 sps:$4 sm:$0xff] (!%p324_p2)   ;;  %v1379_v7 = vld [vmem:[%s1769_s2 + $0x34] ss:$8 sps:$4 sm:$0xff] (!%p324_p2)   ;;  %1250 = vmatprep.subr.bf16.mxu1 (!%p324_p2), %v1394_v10 }
   0x8   : > { %497 = vmatprep.subr.bf16.mxu0 (!%p324_p2), %v1373_v3  ;;  %v1381_v8 = vld [vmem:[%s1769_s2 + $0x30] ss:$8 sps:$4 sm:$0xff] (!%p324_p2)   ;;  %v1382_v9 = vld [vmem:[%s1769_s2 + $0x44] ss:$8 sps:$4 sm:$0xff] (!%p324_p2)   ;;  %v1384_v12 = vld [vmem:[%s1769_s2 + $0x40] ss:$8 sps:$4 sm:$0xff] (!%p324_p2)  }
   0x9   : > { %v1395_v11 = vld [vmem:[%s1771_s4] sm:$0xff] (!%p324_p2)   ;;  %v1396_v13 = vld [vmem:[%s1771_s4 + $0x48] sm:$0xff] (!%p324_p2)   ;;  %v1398_v15 = vld [vmem:[%s1771_s4 + $0x50] sm:$0xff] (!%p324_p2)   ;;  %v1624_v36 = vshrl.u32 (!%p324_p2), %v405_v35, 7  ;;  %v1453_v53 = vmov (!%p324_p2), 0.0   ;;  %vm1454_vm0 = vmmov (!%p324_p2), 0  }
   0xa   : > { %1251 = vmatpush3.bf16.msra.mxu1 (!%p324_p2), %v1395_v11  ;;  %v1397_v14 = vld [vmem:[%s1771_s4 + $0x8] sm:$0xff] (!%p324_p2)   ;;  %v1385_v16 = vld [vmem:[%s1769_s2 + $0x54] ss:$8 sps:$4 sm:$0xff] (!%p324_p2)   ;;  %v1387_v17 = vld [vmem:[%s1769_s2 + $0x50] ss:$8 sps:$4 sm:$0xff] (!%p324_p2)  }
   0xb   : > { %498 = vmatpush1.bf16.msra.mxu0 (!%p324_p2), %v1375_v4  ;;  %1252 = vmatprep.subr.bf16.mxu1 (!%p324_p2), %v1396_v13  ;;  %v1399_v18 = vld [vmem:[%s1771_s4 + $0x10] sm:$0xff] (!%p324_p2)   ;;  %v1400_v19 = vld [vmem:[%s1771_s4 + $0x58] sm:$0xff] (!%p324_p2)   ;;  %v1388_v20 = vld [vmem:[%s1769_s2 + $0x64] ss:$8 sps:$4 sm:$0xff] (!%p324_p2)   ;;  %v407_v37 = vsub.s32 (!%p324_p2), 0, %v1624_v36  ;;  %v411_v39 = vsub.s32 (!%p324_p2), 1, %v1624_v36 }
   0xc   : > { %499 = vmatprep.subr.bf16.mxu0 (!%p324_p2), %v1376_v5  ;;  %v1390_v21 = vld [vmem:[%s1769_s2 + $0x60] ss:$8 sps:$4 sm:$0xff] (!%p324_p2)   ;;  %v1391_v22 = vld [vmem:[%s1769_s2 + $0x74] ss:$8 sps:$4 sm:$0xff] (!%p324_p2)   ;;  %v1393_v26 = vld [vmem:[%s1769_s2 + $0x70] ss:$8 sps:$4 sm:$0xff] (!%p324_p2)  }
   0xd   : > { %s1779_s14 = smov (!%p367_p3, %s1182_s14), 1  ;;  %v1401_v23 = vld [vmem:[%s1771_s4 + $0x18] sm:$0xff]   ;;  %v1402_v24 = vld [vmem:[%s1771_s4 + $0x60] sm:$0xff]   ;;  %v1404_v28 = vld [vmem:[%s1771_s4 + $0x68] sm:$0xff]  }
   0xe   : > { %1253 = vmatpush3.bf16.msra.mxu1 %v1397_v14  ;;  %s1576_s15 = sshll.u32 %s1779_s14, 3  ;;  %v1403_v25 = vld [vmem:[%s1771_s4 + $0x20] sm:$0xff]   ;;  %v1405_v29 = vld [vmem:[%s1771_s4 + $0x28] sm:$0xff]   ;;  %v1406_v31 = vld [vmem:[%s1771_s4 + $0x70] sm:$0xff]  }
   0xf   : > { %500 = vmatpush1.bf16.msra.mxu0 %v1378_v6  ;;  %1254 = vmatprep.subr.bf16.mxu1 %v1398_v15  ;;  %s370_s25 = scalar_lea.vmem %s1767_s0, %s1576_s15  ;;  %v1407_v32 = vld [vmem:[%s1771_s4 + $0x30] sm:$0xff]   ;;  %v1408_v33 = vld [vmem:[%s1771_s4 + $0x78] sm:$0xff]   ;;  %v403_v38 = vld [vmem:[%s1770_s3] sm:$0x3]  ;;  %s378_s26 = scalar_lea.vmem %s1776_s9, %s1576_s15 }
  0x10   : > { %501 = vmatprep.subr.bf16.mxu0 %v1379_v7  ;;  %v384_v27 = vld [vmem:[%s370_s25] sm:$0xff]  ;;  %v1409_v34 = vld [vmem:[%s1771_s4 + $0x38] sm:$0xff]   ;;  %v408_v40 = vrot.slane %v403_v38, %v407_v37  ;;  %v412_v41 = vrot.slane %v403_v38, %v411_v39  ;;  %v1411_v0 = vld [vmem:[%s1772_s5 + $0x8] sm:$0xff]   ;;  %v758_v38 = vsub.s32 3, %v1624_v36  ;;  %s374_s11 = scalar_lea.vmem %s1768_s1, %s1576_s15  ;;  %s382_s17 = scalar_lea.vmem %s1777_s10, %s1576_s15 }
  0x11   : > { %v402_v30 = vpack.c.bf16 %v384_v27, %v384_v27  ;;  %v1410_v52 = vld [vmem:[%s1772_s5] sm:$0xff]   ;;  %v1412_v1 = vld [vmem:[%s1772_s5 + $0x10] sm:$0xff]   ;;  %v1413_v2 = vld [vmem:[%s1772_s5 + $0x18] sm:$0xff]  }
  0x12   : > { %1255 = vmatpush3.bf16.msra.mxu1 %v1399_v18  ;;  %v1642_v54 = vld [vmem:[%s1775_s8] sm:$0x3f]  ;;  %v1415_v4 = vld [vmem:[%s1772_s5 + $0x28] sm:$0xff]   ;;  %v1416_v5 = vld [vmem:[%s1772_s5 + $0x30] sm:$0xff]  }
  0x13   : > { %502 = vmatpush1.bf16.msra.mxu0 %v1381_v8  ;;  %1256 = vmatprep.subr.bf16.mxu1 %v1400_v19  ;;  %v712_v59 = vrot.slane %v1642_v54, %v407_v37  ;;  %v1414_v3 = vld [vmem:[%s1772_s5 + $0x20] sm:$0xff]   ;;  %v1417_v6 = vld [vmem:[%s1772_s5 + $0x38] sm:$0xff]   ;;  %v1419_v8 = vld [vmem:[%s1773_s6 + $0x8] sm:$0xff]  }
  0x14   : > { %503 = vmatprep.subr.bf16.mxu0 %v1382_v9  ;;  %v1418_v7 = vld [vmem:[%s1773_s6] sm:$0xff]   ;;  %v1420_v9 = vld [vmem:[%s1773_s6 + $0x10] sm:$0xff]   ;;  %v1421_v10 = vld [vmem:[%s1773_s6 + $0x18] sm:$0xff]  }
  0x15   : > { %v1422_v11 = vld [vmem:[%s1773_s6 + $0x20] sm:$0xff]   ;;  %v1431_v37 = vld [vmem:[%s1774_s7 + $0x28] sm:$0xff]  }
  0x16   : > { %1257 = vmatpush3.bf16.msra.mxu1 %v1401_v23  ;;  %v1430_v35 = vld [vmem:[%s1774_s7 + $0x20] sm:$0xff]  }
  0x17   : > { %504 = vmatpush1.bf16.msra.mxu0 %v1384_v12  ;;  %1258 = vmatprep.subr.bf16.mxu1 %v1402_v24  ;;  %v1423_v12 = vld [vmem:[%s1773_s6 + $0x28] sm:$0xff]  }
  0x18   : > { %505 = vmatprep.subr.bf16.mxu0 %v1385_v16 }
  0x1a   : > { %1259 = vmatpush3.bf16.msra.mxu1 %v1403_v25 }
  0x1b   : > { %506 = vmatpush1.bf16.msra.mxu0 %v1387_v17  ;;  %1260 = vmatprep.subr.bf16.mxu1 %v1404_v28 }
  0x1c   : > { %507 = vmatprep.subr.bf16.mxu0 %v1388_v20  ;;  %v735_v20 = vsub.s32 2, %v1624_v36 }
  0x1e   : > { %1261 = vmatpush3.bf16.msra.mxu1 %v1405_v29  ;;  %v736_v25 = vrot.slane %v1642_v54, %v735_v20  ;;  %v1424_v29 = vld [vmem:[%s1773_s6 + $0x30] sm:$0xff]  }
  0x1f   : > { %508 = vmatpush1.bf16.msra.mxu0 %v1390_v21  ;;  %1262 = vmatprep.subr.bf16.mxu1 %v1406_v31  ;;  %v731_v21 = vrot.slane %v1642_v54, %v411_v39  ;;  %v1426_v31 = vld [vmem:[%s1774_s7] sm:$0xff]   ;;  %v759_v39 = vrot.slane %v1642_v54, %v758_v38 }
  0x20   : > { %509 = vmatprep.subr.bf16.mxu0 %v1391_v22 }
  0x22   : > { %1263 = vmatpush3.bf16.msra.mxu1 %v1407_v32  ;;  %v1427_v32 = vld [vmem:[%s1774_s7 + $0x8] sm:$0xff]  }
  0x23   : > { %510 = vmatpush1.bf16.msra.mxu0 %v1393_v26  ;;  %1264 = vmatprep.subr.bf16.mxu1 %v1408_v33  ;;  %v1428_v33 = vld [vmem:[%s1774_s7 + $0x10] sm:$0xff]  }
  0x24   : > { %1299 = vmatprep.subr.bf16.mxu0 %v1453_v53 }
  0x26   : > { %528 = vmatmul.mubr.bf16.vlgmr.msra.gmra.mrb[0].mxu0 %v402_v30  ;;  %1265 = vmatpush3.bf16.msra.mxu1 %v1409_v34  ;;  %v1425_v30 = vld [vmem:[%s1773_s6 + $0x38] sm:$0xff]  }
  0x27   : > { %1319 = vmatprep.subr.bf16.mxu1 %v1453_v53  ;;  %1300 = vmatpush3.bf16.msra.mxu0 %v1410_v52  ;;  %v1429_v34 = vld [vmem:[%s1774_s7 + $0x18] sm:$0xff]  }
  0x28   : > { %1301 = vmatprep.subr.bf16.mxu0 %v1453_v53  ;;  %1315 = vmatprep.mubr.msk.bf16.mxu0 %vm1454_vm0, %v1453_v53 }
  0x2b   : > { %1302 = vmatpush3.bf16.msra.mxu0 %v1411_v0 }
  0x2c   : > { %1303 = vmatprep.subr.bf16.mxu0 %v1453_v53 }
  0x2f   : > { %1304 = vmatpush3.bf16.msra.mxu0 %v1412_v1 }
  0x30   : > { %1305 = vmatprep.subr.bf16.mxu0 %v1453_v53 }
  0x33   : > { %1306 = vmatpush3.bf16.msra.mxu0 %v1413_v2 }
  0x34   : > { %1307 = vmatprep.subr.bf16.mxu0 %v1453_v53 }
  0x37   : > { %1308 = vmatpush3.bf16.msra.mxu0 %v1414_v3  ;;  %v978_v3 = vsub.s32 5, %v1624_v36 }
  0x38   : > { %1309 = vmatprep.subr.bf16.mxu0 %v1453_v53 }
  0x3b   : > { %1310 = vmatpush3.bf16.msra.mxu0 %v1415_v4 }
  0x3c   : > { %1311 = vmatprep.subr.bf16.mxu0 %v1453_v53 }
  0x3f   : > { %1312 = vmatpush3.bf16.msra.mxu0 %v1416_v5  ;;  %v979_v5 = vrot.slane %v1642_v54, %v978_v3 }
  0x40   : > { %1313 = vmatprep.subr.bf16.mxu0 %v1453_v53 }
  0x43   : > { %1314 = vmatpush3.bf16.msra.mxu0 %v1417_v6 }
  0x44   : > { %1339 = vmatprep.subr.bf16.mxu0 %v1453_v53 }
  0xf9   : > { %v529_v42 = vpop.f32.mrb[0].mxu0 }
  0xfa   : > { %v530_v43 = vadd.f32 %v529_v42, %v408_v40  ;;  %v531_v44 = vpop.f32.mrb[1].mxu0 }
  0xfb   : > { %v532_v45 = vadd.f32 %v531_v44, %v412_v41  ;;  %v533_v46 = vpop.f32.mrb[2].mxu0 }
  0xfc   : > { %v536_v47 = vmax.f32 %v530_v43, 0.0  ;;  %v534_v48 = vpop.f32.mrb[3].mxu0 }
  0xfd   : > { %v537_v49 = vmax.f32 %v532_v45, 0.0  ;;  %v1433_v48 = vld [vmem:[%s1774_s7 + $0x38] sm:$0xff]  }
  0xfe   : > { %v570_v51 = vpack.c.bf16 %v536_v47, %v536_v47  ;;  %v1432_v47 = vld [vmem:[%s1774_s7 + $0x30] sm:$0xff]  }
  0xff   : > { %v571_v50 = vpack.c.bf16 %v537_v49, %v537_v49  ;;  %v868_v49 = vsub.s32 4, %v1624_v36 }
 0x101   : > { %700 = vmatprep.mubr.bf16.mxu1 %v571_v50  ;;  %v869_v50 = vrot.slane %v1642_v54, %v868_v49 }
 0x102   : > { %701 = vmatmul.mubr.bf16.vlgmr.msra.gmra.mrb[0].mxu1 %v570_v51 }
 0x103   : > { %1335 = vmatprep.mubr.msk.bf16.mxu1 %vm1454_vm0, %v1453_v53  ;;  %1320 = vmatpush3.bf16.msra.mxu1 %v1418_v7 }
 0x104   : > { %1321 = vmatprep.subr.bf16.mxu1 %v1453_v53 }
 0x107   : > { %1322 = vmatpush3.bf16.msra.mxu1 %v1419_v8 }
 0x108   : > { %1323 = vmatprep.subr.bf16.mxu1 %v1453_v53 }
 0x10b   : > { %1324 = vmatpush3.bf16.msra.mxu1 %v1420_v9 }
 0x10c   : > { %1325 = vmatprep.subr.bf16.mxu1 %v1453_v53 }
 0x10f   : > { %1326 = vmatpush3.bf16.msra.mxu1 %v1421_v10 }
 0x110   : > { %1327 = vmatprep.subr.bf16.mxu1 %v1453_v53 }
 0x113   : > { %1328 = vmatpush3.bf16.msra.mxu1 %v1422_v11 }
 0x114   : > { %1329 = vmatprep.subr.bf16.mxu1 %v1453_v53 }
 0x117   : > { %1330 = vmatpush3.bf16.msra.mxu1 %v1423_v12 }
 0x118   : > { %1331 = vmatprep.subr.bf16.mxu1 %v1453_v53 }
 0x11b   : > { %1332 = vmatpush3.bf16.msra.mxu1 %v1424_v29 }
 0x11c   : > { %1333 = vmatprep.subr.bf16.mxu1 %v1453_v53 }
 0x11f   : > { %1334 = vmatpush3.bf16.msra.mxu1 %v1425_v30 }
 0x1d5   : > { %v1266_v55 = vpop.f32.mrb[0].mxu1 }
 0x1d6   : > { %v1267_v56 = vpop.f32.mrb[1].mxu1 }
 0x1d7   : > { %v1268_v57 = vadd.f32 %v1267_v56, %v1266_v55  ;;  %v1269_v58 = vpop.f32.mrb[2].mxu1 }
 0x1d8   : > { %v1270_v60 = vpop.f32.mrb[3].mxu1 }
 0x1d9   : > { %v708_v61 = vadd.f32 %v1268_v57, %v384_v27 }
 0x1db   : > { %v713_v62 = vadd.f32 %v712_v59, %v708_v61 }
 0x1dd   : > { %714 = vadd.xlane.f32.xlu0 %v713_v62  ;;  %v718_v63 = vmul.f32 %v713_v62, %v713_v62 }
 0x1e1   : > { %719 = vadd.xlane.f32.xlu0 %v718_v63 }
 0x26a   : > { %v715_v13 = vpop.xlane.xlu0 %714 }
 0x26b   : > { %v717_v14 = vmul.f32 0.0078125, %v715_v13 }
 0x26d   : > { %v722_v16 = vmul.f32 %v717_v14, %v717_v14  ;;  %v724_v22 = vsub.f32 %v713_v62, %v717_v14 }
 0x26e   : > { %v720_v15 = vpop.xlane.xlu0 %719 }
 0x26f   : > { %v721_v17 = vmul.f32 0.0078125, %v720_v15 }
 0x271   : > { %v723_v18 = vsub.f32 %v721_v17, %v722_v16 }
 0x273   : > { %v725_v19 = vadd.f32 1e-05, %v723_v18 }
 0x275   : > { %1434 = vrsqrt.f32 %v725_v19 }
 0x27f   : > { %v1435_v23 = vpop.eup %1434 }
 0x280   : > { %v727_v24 = vmul.f32 %v1435_v23, %v724_v22 }
 0x282   : > { %v732_v26 = vmul.f32 %v731_v21, %v727_v24 }
 0x284   : > { %v737_v27 = vadd.f32 %v736_v25, %v732_v26 }
 0x286   : > { %738 = vst [vmem:[%s378_s26] sm:$0xff] %v737_v27  ;;  %v755_v28 = vpack.c.bf16 %v737_v27, %v737_v27 }
 0x288   : > { %1316 = vmatmul.mubr.bf16.vlgmr.msra.gmra.mrb[4].mxu0 %v755_v28 }
 0x289   : > { %1355 = vmatprep.mubr.msk.bf16.mxu0 %vm1454_vm0, %v1453_v53  ;;  %1340 = vmatpush3.bf16.msra.mxu0 %v1426_v31 }
 0x28a   : > { %1341 = vmatprep.subr.bf16.mxu0 %v1453_v53 }
 0x28d   : > { %1342 = vmatpush3.bf16.msra.mxu0 %v1427_v32 }
 0x28e   : > { %1343 = vmatprep.subr.bf16.mxu0 %v1453_v53 }
 0x291   : > { %1344 = vmatpush3.bf16.msra.mxu0 %v1428_v33 }
 0x292   : > { %1345 = vmatprep.subr.bf16.mxu0 %v1453_v53 }
 0x295   : > { %1346 = vmatpush3.bf16.msra.mxu0 %v1429_v34 }
 0x296   : > { %1347 = vmatprep.subr.bf16.mxu0 %v1453_v53 }
 0x299   : > { %1348 = vmatpush3.bf16.msra.mxu0 %v1430_v35 }
 0x29a   : > { %1349 = vmatprep.subr.bf16.mxu0 %v1453_v53 }
 0x29d   : > { %1350 = vmatpush3.bf16.msra.mxu0 %v1431_v37 }
 0x29e   : > { %1351 = vmatprep.subr.bf16.mxu0 %v1453_v53 }
 0x2a1   : > { %1352 = vmatpush3.bf16.msra.mxu0 %v1432_v47 }
 0x2a2   : > { %1353 = vmatprep.subr.bf16.mxu0 %v1453_v53  ;;  %v1068_v53 = vld [vmem:[%s374_s11] sm:$0xff] }
 0x2a3   : > { %v1069_v60 = vmax.f32 %v1068_v53, 0.0 }
 0x2a5   : > { %1354 = vmatpush3.bf16.msra.mxu0 %v1433_v48  ;;  %v1070_v61 = vmin.f32 %v1069_v60, 1.0 }
 0x2a7   : > { %v1072_v62 = vsub.f32 1.0, %v1070_v61  ;;  %v1071_v0 = vmax.f32 %v1070_v61, 1e-05 }
 0x2a9   : > { %v1073_v63 = vmax.f32 %v1072_v62, 1e-05 }
 0x2ab   : > { %1436 = vrcp.f32 %v1073_v63 }
 0x2b5   : > { %v1437_v1 = vpop.eup %1436 }
 0x2b6   : > { %v1075_v2 = vmul.f32 %v1437_v1, %v1071_v0 }
 0x2b8   : > { %1438 = vlog2.f32 %v1075_v2 }
 0x2c2   : > { %v1439_v4 = vpop.eup %1438 }
 0x2c3   : > { %v1077_v6 = vmul.f32 0.6931472, %v1439_v4 }
 0x35b   : > { %v842_v40 = vpop.f32.mrb[4].mxu0 }
 0x35c   : > { %v843_v41 = vadd.f32 %v842_v40, %v759_v39  ;;  %v1317_v42 = vpop.f32.mrb[5].mxu0 }
 0x35d   : > { %v845_v43 = vpop.f32.mrb[6].mxu0 }
 0x35e   : > { %v848_v44 = vmax.f32 %v843_v41, 0.0  ;;  %v1318_v45 = vpop.f32.mrb[7].mxu0 }
 0x360   : > { %v865_v46 = vpack.c.bf16 %v848_v44, %v848_v44 }
 0x362   : > { %1336 = vmatmul.mubr.bf16.vlgmr.msra.gmra.mrb[4].mxu1 %v865_v46 }
 0x435   : > { %v952_v51 = vpop.f32.mrb[4].mxu1 }
 0x436   : > { %v953_v52 = vadd.f32 %v952_v51, %v869_v50  ;;  %v1337_v55 = vpop.f32.mrb[5].mxu1 }
 0x437   : > { %v955_v56 = vpop.f32.mrb[6].mxu1 }
 0x438   : > { %v958_v57 = vmax.f32 %v953_v52, 0.0  ;;  %v1338_v58 = vpop.f32.mrb[7].mxu1 }
 0x43a   : > { %v975_v59 = vpack.c.bf16 %v958_v57, %v958_v57 }
 0x43c   : > { %1356 = vmatmul.mubr.bf16.vlgmr.msra.gmra.mrb[8].mxu0 %v975_v59 }
 0x50f   : > { %v1062_v7 = vpop.f32.mrb[8].mxu0 }
 0x510   : > { %v1063_v8 = vadd.f32 %v1062_v7, %v979_v5  ;;  %v1357_v9 = vpop.f32.mrb[9].mxu0 }
 0x511   : > { %v1065_v10 = vpop.f32.mrb[10].mxu0 }
 0x512   : > { %v1078_v11 = vadd.f32 %v1077_v6, %v1063_v8  ;;  %v1358_v12 = vpop.f32.mrb[11].mxu0 }
 0x514   : > { %v1247_v13 = vmul.f32 -1.442695, %v1078_v11 }
 0x516   : > { %1440 = vpow2.f32 %v1247_v13 }
 0x520   : > { %v1441_v14 = vpop.eup %1440 }
 0x521   : > { %v1082_v15 = vadd.f32 1.0, %v1441_v14 }
 0x523   : > { %1442 = vrcp.f32 %v1082_v15 }
 0x52d   : > { %v1443_v36 = vpop.eup %1442 }
 0x52e   : > { %1085 = vst [vmem:[%s382_s17] sm:$0xff] %v1443_v36 }
 0x52f PF: > { %s21_s13 = sadd.s32 1, %s1450_s13  }
 0x530   : > { %p18_p4 = scmp.ge.s32.totalorder %s21_s13, 4  }
 0x532   :  { %20 = sbr.rel (!%p18_p4) target bundleno = 1 (0x1), region = 101 }

// kernel: transformer_decoder_forward.7
= control target key start
LH: loop header
LB: loop body
LE: loop exit
PB: predicated region body
PF: predicated region fallthrough
CT: control target
= control target key end

     0   :  { %s1959_s0 = inlined_call_operand.vmem [shape: f32[16,128], index: 0, kind: input, shape index: {}]   ;;  %s1960_s1 = inlined_call_operand.vmem [shape: f32[16,128], index: 1, kind: input, shape index: {}]   ;;  %s1961_s2 = inlined_call_operand.vmem [shape: bf16[128,256], index: 2, kind: input, shape index: {}]   ;;  %s1962_s3 = inlined_call_operand.vmem [shape: f32[1,256], index: 3, kind: input, shape index: {}]   ;;  %s1963_s4 = inlined_call_operand.vmem [shape: bf16[256,128], index: 4, kind: input, shape index: {}]   ;;  %s1964_s5 = inlined_call_operand.vmem [shape: bf16[128,128], index: 5, kind: input, shape index: {}]   ;;  %s1965_s6 = inlined_call_operand.vmem [shape: bf16[128,128], index: 6, kind: input, shape index: {}]   ;;  %s1966_s7 = inlined_call_operand.vmem [shape: bf16[128,128], index: 7, kind: input, shape index: {}]   ;;  %s1967_s8 = inlined_call_operand.vmem [shape: f32[6,128], index: 8, kind: input, shape index: {}]   ;;  %s1968_s9 = inlined_call_operand.hbm [shape: f32[16,128], index: 9, kind: output, shape index: {0}]   ;;  %s1969_s10 = inlined_call_operand.vmem [shape: f32[16,128], index: 10, kind: output, shape index: {1}]  }
   0x1   :  { %1970 = sst [smem:[#allocation6_spill]] %s1959_s0 }
   0x2   :  { %1971 = sst [smem:[#allocation7_spill]] %s1961_s2 }
   0x3   :  { %16 = vsyncpa [#allocation3], 0 }
   0x4   :  { %18 = vsyncpa [#allocation3 + $0x1], 0  ;;  %s1619_s13 = smov 0   ;;  %s1621_s14 = smov 0  }
   0x5   :  { %s1623_s15 = smov 0   ;;  %s1625_s16 = smov 0  }
   0x6 LB: > { %s1640_s17 = sadd.s32 4294967295, %s1558_s16   ;;  %s1202_s18 = sadd.s32 4294967294, %s1558_s16   ;;  %s1558_s16 = sphi %s1625_s16, %s1981_s16   ;;  %s1554_s15 = sphi %s1623_s15, %s1980_s15   ;;  %s1550_s14 = sphi %s1621_s14, %s1979_s14   ;;  %s1546_s13 = sphi %s1619_s13, %s1978_s13  }
   0x7   : > { %s1644_s19 = sadd.s32 1, %s1558_s16   ;;  %s230_s20 = sadd.s32 1, %s1554_s15 }
   0x8   : > { %s227_s21 = ssub.s32 %s1558_s16, %s1644_s19  ;;  %p240_p0 = scmp.ne.s32.totalorder %s1554_s15, %s1550_s14 }
   0x9   : > { %p228_p1 = scmp.eq.s32.totalorder %s227_s21, 0  ;;  %p241_p2 = scmp.eq.s32.totalorder %s1640_s17, 1 }
   0xa   : > { %p246_p3 = scmp.ne.s32.totalorder %s1550_s14, %s1546_s13  ;;  %p247_p4 = scmp.eq.s32.totalorder %s1202_s18, 1 }
   0xb   : > { %s1655_s22 = scalar_select %p228_p1, %s1554_s15, %s230_s20  }
   0xc   : > { %p1657_p5 = por %p241_p2, %p240_p0  ;;  %p1661_p6 = por %p247_p4, %p246_p3 }
   0xd   : > { %1972 = sst [smem:[#allocation5_spill]] %s1655_s22  ;;  %p1205_p7 = scmp.ge.s32.totalorder %s1558_s16, 1 }
   0xe   : > { %p326_p8 = scmp.lt.s32.totalorder %s1558_s16, 3 }
  0x10   : > { %p327_p9 = pnand %p1205_p7, %p326_p8 }
  0x11   : > { %s1975_s2 = sld [smem:[#allocation7_spill]] (!%p327_p9)  ;;  %v1560_v2 = vmov (!%p327_p9), 0   ;;  %p371_p10 = scmp.lt.s32.totalorder (!%p327_p9), %s1640_s17, 1  ;;  %v1446_v10 = vld [vmem:[%s1963_s4 + $0x40] sm:$0xff] (!%p327_p9)   ;;  %v1448_v14 = vld [vmem:[%s1963_s4 + $0x48] sm:$0xff] (!%p327_p9)   ;;  %v1450_v16 = vld [vmem:[%s1963_s4 + $0x50] sm:$0xff] (!%p327_p9)   ;;  %v405_v35 = vlaneseq (!%p327_p9) }
  0x12   : > { %330 = sbr.rel (%p327_p9) target bundleno = 1345 (0x541), region = 56  ;;  %527 = vmatprep.mubr.bf16.mxu0 (!%p327_p9), %v1560_v2  ;;  %v1447_v12 = vld [vmem:[%s1963_s4] sm:$0xff] (!%p327_p9)   ;;  %1271 = vmatprep.subr.bf16.mxu1 (!%p327_p9), %v1446_v10  ;;  %v1449_v15 = vld [vmem:[%s1963_s4 + $0x8] sm:$0xff] (!%p327_p9)   ;;  %v1451_v19 = vld [vmem:[%s1963_s4 + $0x10] sm:$0xff] (!%p327_p9)   ;;  %s1976_s0 = sld [smem:[#allocation6_spill]] (!%p327_p9)  ;;  %v1561_v53 = vmov (!%p327_p9), 0.0  }
  0x13   : > { %1272 = vmatpush3.bf16.msra.mxu1 (!%p327_p9), %v1447_v12  ;;  %v1452_v20 = vld [vmem:[%s1963_s4 + $0x58] sm:$0xff] (!%p327_p9)   ;;  %v1454_v24 = vld [vmem:[%s1963_s4 + $0x60] sm:$0xff] (!%p327_p9)   ;;  %v1456_v28 = vld [vmem:[%s1963_s4 + $0x68] sm:$0xff] (!%p327_p9)   ;;  %v1771_v36 = vshrl.u32 (!%p327_p9), %v405_v35, 7  ;;  %vm1562_vm0 = vmmov (!%p327_p9), 0   ;;  %s362_s26 = sand.u32 (!%p327_p9), 1, %s1550_s14  }
  0x14   : > { %1273 = vmatprep.subr.bf16.mxu1 (!%p327_p9), %v1448_v14  ;;  %v1453_v23 = vld [vmem:[%s1963_s4 + $0x18] sm:$0xff] (!%p327_p9)   ;;  %v1455_v27 = vld [vmem:[%s1963_s4 + $0x20] sm:$0xff] (!%p327_p9)   ;;  %v1457_v29 = vld [vmem:[%s1963_s4 + $0x28] sm:$0xff] (!%p327_p9)   ;;  %s1856_s22 = sshll.u32 (!%p327_p9), %s362_s26, 3  ;;  %s1268_s20 = sshll.u32 (!%p327_p9), %s1640_s17, 7 }
  0x15   : > { %v1458_v31 = vld [vmem:[%s1963_s4 + $0x70] sm:$0xff] (!%p327_p9)   ;;  %v1460_v33 = vld [vmem:[%s1963_s4 + $0x78] sm:$0xff] (!%p327_p9)   ;;  %v407_v37 = vsub.s32 (!%p327_p9), 0, %v1771_v36  ;;  %v403_v38 = vld [vmem:[%s1962_s3] sm:$0x3] (!%p327_p9)  ;;  %v411_v39 = vsub.s32 (!%p327_p9), 1, %v1771_v36  ;;  %s1911_s11 = scalar_lea.hbm (!%p327_p9), %s1968_s9, %s1268_s20 }
  0x16   : > { %v1459_v32 = vld [vmem:[%s1963_s4 + $0x30] sm:$0xff] (!%p327_p9)   ;;  %v1461_v34 = vld [vmem:[%s1963_s4 + $0x38] sm:$0xff] (!%p327_p9)   ;;  %v1462_v52 = vld [vmem:[%s1964_s5] sm:$0xff] (!%p327_p9)   ;;  %s364_s28 = scalar_lea.vmem (!%p327_p9), [#allocation2], %s1856_s22  ;;  %s1563_s18 = smov (!%p327_p9), [#allocation2]  }
  0x17   : > { %v1422_v0 = vld [vmem:[%s1975_s2 + $0x4] ss:$8 sps:$4 sm:$0xff] (!%p327_p9)   ;;  %v1424_v1 = vld [vmem:[%s1975_s2] ss:$8 sps:$4 sm:$0xff] (!%p327_p9)   ;;  %v1425_v3 = vld [vmem:[%s1975_s2 + $0x14] ss:$8 sps:$4 sm:$0xff] (!%p327_p9)   ;;  %1274 = vmatpush3.bf16.msra.mxu1 (!%p327_p9), %v1449_v15  ;;  %v408_v40 = vrot.slane (!%p327_p9), %v403_v38, %v407_v37  ;;  %v412_v41 = vrot.slane (!%p327_p9), %v403_v38, %v411_v39 }
  0x18   : > { %495 = vmatprep.subr.bf16.mxu0 (!%p327_p9), %v1422_v0  ;;  %v1427_v4 = vld [vmem:[%s1975_s2 + $0x10] ss:$8 sps:$4 sm:$0xff] (!%p327_p9)   ;;  %v1428_v5 = vld [vmem:[%s1975_s2 + $0x24] ss:$8 sps:$4 sm:$0xff] (!%p327_p9)   ;;  %v1430_v6 = vld [vmem:[%s1975_s2 + $0x20] ss:$8 sps:$4 sm:$0xff] (!%p327_p9)   ;;  %1275 = vmatprep.subr.bf16.mxu1 (!%p327_p9), %v1450_v16 }
  0x19   : > { %496 = vmatpush1.bf16.msra.mxu0 %v1424_v1  ;;  %v1431_v7 = vld [vmem:[%s1975_s2 + $0x34] ss:$8 sps:$4 sm:$0xff]   ;;  %v1433_v8 = vld [vmem:[%s1975_s2 + $0x30] ss:$8 sps:$4 sm:$0xff]   ;;  %v1434_v9 = vld [vmem:[%s1975_s2 + $0x44] ss:$8 sps:$4 sm:$0xff]  }
  0x1a   : > { %497 = vmatprep.subr.bf16.mxu0 %v1425_v3  ;;  %v1436_v11 = vld [vmem:[%s1975_s2 + $0x40] ss:$8 sps:$4 sm:$0xff]   ;;  %v1437_v13 = vld [vmem:[%s1975_s2 + $0x54] ss:$8 sps:$4 sm:$0xff]   ;;  %s372_s29 = scalar_select %p371_p10, %s1640_s17, 1  ;;  %v758_v38 = vsub.s32 3, %v1771_v36 }
  0x1b   : > { %v1439_v17 = vld [vmem:[%s1975_s2 + $0x50] ss:$8 sps:$4 sm:$0xff]   ;;  %v1440_v18 = vld [vmem:[%s1975_s2 + $0x64] ss:$8 sps:$4 sm:$0xff]   ;;  %v1442_v21 = vld [vmem:[%s1975_s2 + $0x60] ss:$8 sps:$4 sm:$0xff]   ;;  %1276 = vmatpush3.bf16.msra.mxu1 %v1451_v19 }
  0x1c   : > { %s1723_s30 = sshll.u32 %s372_s29, 3  ;;  %v1443_v22 = vld [vmem:[%s1975_s2 + $0x74] ss:$8 sps:$4 sm:$0xff]   ;;  %1277 = vmatprep.subr.bf16.mxu1 %v1452_v20  ;;  %v1445_v25 = vld [vmem:[%s1975_s2 + $0x70] ss:$8 sps:$4 sm:$0xff]   ;;  %v1463_v0 = vld [vmem:[%s1964_s5 + $0x8] sm:$0xff]  }
  0x1d   : > { %498 = vmatpush1.bf16.msra.mxu0 %v1427_v4  ;;  %s374_s27 = scalar_lea.vmem %s1976_s0, %s1723_s30  ;;  %v1789_v54 = vld [vmem:[%s1967_s8] sm:$0x3f]  ;;  %v1464_v1 = vld [vmem:[%s1964_s5 + $0x10] sm:$0xff]   ;;  %v1465_v2 = vld [vmem:[%s1964_s5 + $0x18] sm:$0xff]   ;;  %v735_v20 = vsub.s32 2, %v1771_v36  ;;  %s1104_s21 = sshll.u32 %s364_s28, 4  ;;  %s1105_s21 = int_to_ptr.vmem [resolvable:$true] %s1104_s21 }
  0x1e   : > { %499 = vmatprep.subr.bf16.mxu0 %v1428_v5  ;;  %v384_v26 = vld [vmem:[%s374_s27] sm:$0xff]  ;;  %v712_v59 = vrot.slane %v1789_v54, %v407_v37  ;;  %v1467_v4 = vld [vmem:[%s1964_s5 + $0x28] sm:$0xff]   ;;  %v1468_v5 = vld [vmem:[%s1964_s5 + $0x30] sm:$0xff]   ;;  %s1087_s27 = scalar_lea.sflag [#allocation3], %s362_s26  ;;  %s1496_s12 = scalar_lea.vmem %s1105_s21, 128 }
  0x1f   : > { %1278 = vmatpush3.bf16.msra.mxu1 %v1453_v23  ;;  %v402_v30 = vpack.c.bf16 %v384_v26, %v384_v26  ;;  %v1466_v3 = vld [vmem:[%s1964_s5 + $0x20] sm:$0xff]   ;;  %v1473_v10 = vld [vmem:[%s1965_s6 + $0x18] sm:$0xff]   ;;  %v1475_v12 = vld [vmem:[%s1965_s6 + $0x28] sm:$0xff]   ;;  %p1497_p11 = scmp.ne.s32.totalorder %s1105_s21, %s1496_s12  ;;  %s1500_s0 = sshll.u32 %s1563_s18, 4  ;;  %s1501_s0 = int_to_ptr.vmem [resolvable:$false] %s1500_s0 }
  0x20   : > { %1279 = vmatprep.subr.bf16.mxu1 %v1454_v24  ;;  %v1482_v35 = vld [vmem:[%s1966_s7 + $0x20] sm:$0xff]   ;;  %v1483_v37 = vld [vmem:[%s1966_s7 + $0x28] sm:$0xff]   ;;  %s1502_s2 = scalar_lea.vmem %s1501_s0, 256  ;;  %p1503_p0 = scmp.lt.s32.totalorder %s1105_s21, %s1501_s0 }
  0x21   : > { %500 = vmatpush1.bf16.msra.mxu0 %v1430_v6  ;;  %v1469_v6 = vld [vmem:[%s1964_s5 + $0x38] sm:$0xff]   ;;  %p1498_p12 = pnand %p1497_p11, %p1657_p5  ;;  %p1504_p1 = scmp.lt.s32.totalorder %s1502_s2, %s1496_s12 }
  0x22   : > { %501 = vmatprep.subr.bf16.mxu0 %v1431_v7  ;;  %v1470_v7 = vld [vmem:[%s1965_s6] sm:$0xff]  }
  0x23   : > { %1280 = vmatpush3.bf16.msra.mxu1 %v1455_v27  ;;  %p1499_p13 = pneg %p1498_p12  ;;  %p1505_p2 = por %p1504_p1, %p1503_p0 }
  0x24   : > { %1281 = vmatprep.subr.bf16.mxu1 %v1456_v28 }
  0x25   : > { %502 = vmatpush1.bf16.msra.mxu0 %v1433_v8  ;;  %v1471_v8 = vld [vmem:[%s1965_s6 + $0x8] sm:$0xff]   ;;  %p1506_p3 = pnand %p1505_p2, %p1499_p13 }
  0x26   : > { %503 = vmatprep.subr.bf16.mxu0 %v1434_v9  ;;  %v1472_v9 = vld [vmem:[%s1965_s6 + $0x10] sm:$0xff]  }
  0x27   : > { %1282 = vmatpush3.bf16.msra.mxu1 %v1457_v29  ;;  %v1476_v29 = vld [vmem:[%s1965_s6 + $0x30] sm:$0xff]  }
  0x28   : > { %1283 = vmatprep.subr.bf16.mxu1 %v1458_v31  ;;  %v1478_v31 = vld [vmem:[%s1966_s7] sm:$0xff]  }
  0x29   : > { %504 = vmatpush1.bf16.msra.mxu0 %v1436_v11  ;;  %v1474_v11 = vld [vmem:[%s1965_s6 + $0x20] sm:$0xff]  }
  0x2a   : > { %505 = vmatprep.subr.bf16.mxu0 %v1437_v13 }
  0x2b   : > { %1284 = vmatpush3.bf16.msra.mxu1 %v1459_v32  ;;  %v1479_v32 = vld [vmem:[%s1966_s7 + $0x8] sm:$0xff]  }
  0x2c   : > { %1285 = vmatprep.subr.bf16.mxu1 %v1460_v33  ;;  %v1480_v33 = vld [vmem:[%s1966_s7 + $0x10] sm:$0xff]  }
  0x2d   : > { %506 = vmatpush1.bf16.msra.mxu0 %v1439_v17 }
  0x2e   : > { %507 = vmatprep.subr.bf16.mxu0 %v1440_v18 }
  0x2f   : > { %1286 = vmatpush3.bf16.msra.mxu1 %v1461_v34  ;;  %v1481_v34 = vld [vmem:[%s1966_s7 + $0x18] sm:$0xff]  }
  0x30   : > { %1340 = vmatprep.subr.bf16.mxu1 %v1561_v53 }
  0x31   : > { %508 = vmatpush1.bf16.msra.mxu0 %v1442_v21  ;;  %v731_v21 = vrot.slane %v1789_v54, %v411_v39  ;;  %v759_v39 = vrot.slane %v1789_v54, %v758_v38 }
  0x32   : > { %509 = vmatprep.subr.bf16.mxu0 %v1443_v22 }
  0x35   : > { %510 = vmatpush1.bf16.msra.mxu0 %v1445_v25  ;;  %v736_v25 = vrot.slane %v1789_v54, %v735_v20 }
  0x36   : > { %1320 = vmatprep.subr.bf16.mxu0 %v1561_v53 }
  0x38   : > { %528 = vmatmul.mubr.bf16.vlgmr.msra.gmra.mrb[0].mxu0 %v402_v30  ;;  %v1477_v30 = vld [vmem:[%s1965_s6 + $0x38] sm:$0xff]  }
  0x39   : > { %1321 = vmatpush3.bf16.msra.mxu0 %v1462_v52  ;;  %1336 = vmatprep.mubr.msk.bf16.mxu0 %vm1562_vm0, %v1561_v53 }
  0x3a   : > { %1322 = vmatprep.subr.bf16.mxu0 %v1561_v53 }
  0x3d   : > { %1323 = vmatpush3.bf16.msra.mxu0 %v1463_v0 }
  0x3e   : > { %1324 = vmatprep.subr.bf16.mxu0 %v1561_v53 }
  0x41   : > { %1325 = vmatpush3.bf16.msra.mxu0 %v1464_v1 }
  0x42   : > { %1326 = vmatprep.subr.bf16.mxu0 %v1561_v53 }
  0x45   : > { %1327 = vmatpush3.bf16.msra.mxu0 %v1465_v2 }
  0x46   : > { %1328 = vmatprep.subr.bf16.mxu0 %v1561_v53 }
  0x49   : > { %1329 = vmatpush3.bf16.msra.mxu0 %v1466_v3 }
  0x4a   : > { %1330 = vmatprep.subr.bf16.mxu0 %v1561_v53 }
  0x4d   : > { %1331 = vmatpush3.bf16.msra.mxu0 %v1467_v4 }
  0x4e   : > { %1332 = vmatprep.subr.bf16.mxu0 %v1561_v53 }
  0x51   : > { %1333 = vmatpush3.bf16.msra.mxu0 %v1468_v5 }
  0x52   : > { %1334 = vmatprep.subr.bf16.mxu0 %v1561_v53 }
  0x55   : > { %1335 = vmatpush3.bf16.msra.mxu0 %v1469_v6 }
  0x56   : > { %1360 = vmatprep.subr.bf16.mxu0 %v1561_v53 }
 0x10b   : > { %v529_v42 = vpop.f32.mrb[0].mxu0 }
 0x10c   : > { %v530_v43 = vadd.f32 %v529_v42, %v408_v40  ;;  %v531_v44 = vpop.f32.mrb[1].mxu0 }
 0x10d   : > { %v532_v45 = vadd.f32 %v531_v44, %v412_v41  ;;  %v533_v46 = vpop.f32.mrb[2].mxu0 }
 0x10e   : > { %v536_v47 = vmax.f32 %v530_v43, 0.0  ;;  %v534_v48 = vpop.f32.mrb[3].mxu0 }
 0x10f   : > { %v537_v49 = vmax.f32 %v532_v45, 0.0  ;;  %v1485_v48 = vld [vmem:[%s1966_s7 + $0x38] sm:$0xff]  }
 0x110   : > { %v570_v51 = vpack.c.bf16 %v536_v47, %v536_v47  ;;  %v1484_v47 = vld [vmem:[%s1966_s7 + $0x30] sm:$0xff]  }
 0x111   : > { %v571_v50 = vpack.c.bf16 %v537_v49, %v537_v49  ;;  %v868_v49 = vsub.s32 4, %v1771_v36 }
 0x113   : > { %700 = vmatprep.mubr.bf16.mxu1 %v571_v50  ;;  %v869_v50 = vrot.slane %v1789_v54, %v868_v49 }
 0x114   : > { %701 = vmatmul.mubr.bf16.vlgmr.msra.gmra.mrb[0].mxu1 %v570_v51 }
 0x115   : > { %1356 = vmatprep.mubr.msk.bf16.mxu1 %vm1562_vm0, %v1561_v53  ;;  %1341 = vmatpush3.bf16.msra.mxu1 %v1470_v7 }
 0x116   : > { %1342 = vmatprep.subr.bf16.mxu1 %v1561_v53 }
 0x119   : > { %1343 = vmatpush3.bf16.msra.mxu1 %v1471_v8 }
 0x11a   : > { %1344 = vmatprep.subr.bf16.mxu1 %v1561_v53 }
 0x11d   : > { %1345 = vmatpush3.bf16.msra.mxu1 %v1472_v9 }
 0x11e   : > { %1346 = vmatprep.subr.bf16.mxu1 %v1561_v53 }
 0x121   : > { %1347 = vmatpush3.bf16.msra.mxu1 %v1473_v10 }
 0x122   : > { %1348 = vmatprep.subr.bf16.mxu1 %v1561_v53 }
 0x125   : > { %1349 = vmatpush3.bf16.msra.mxu1 %v1474_v11 }
 0x126   : > { %1350 = vmatprep.subr.bf16.mxu1 %v1561_v53 }
 0x129   : > { %1351 = vmatpush3.bf16.msra.mxu1 %v1475_v12 }
 0x12a   : > { %1352 = vmatprep.subr.bf16.mxu1 %v1561_v53 }
 0x12d   : > { %1353 = vmatpush3.bf16.msra.mxu1 %v1476_v29 }
 0x12e   : > { %1354 = vmatprep.subr.bf16.mxu1 %v1561_v53 }
 0x131   : > { %1355 = vmatpush3.bf16.msra.mxu1 %v1477_v30 }
 0x1e7   : > { %v1287_v55 = vpop.f32.mrb[0].mxu1 }
 0x1e8   : > { %v1288_v56 = vpop.f32.mrb[1].mxu1 }
 0x1e9   : > { %v1289_v57 = vadd.f32 %v1288_v56, %v1287_v55  ;;  %v1290_v58 = vpop.f32.mrb[2].mxu1 }
 0x1ea   : > { %v1291_v60 = vpop.f32.mrb[3].mxu1 }
 0x1eb   : > { %v708_v61 = vadd.f32 %v1289_v57, %v384_v26 }
 0x1ed   : > { %v713_v62 = vadd.f32 %v712_v59, %v708_v61 }
 0x1ef   : > { %714 = vadd.xlane.f32.xlu0 %v713_v62  ;;  %v718_v63 = vmul.f32 %v713_v62, %v713_v62 }
 0x1f3   : > { %719 = vadd.xlane.f32.xlu0 %v718_v63 }
 0x27c   : > { %v715_v13 = vpop.xlane.xlu0 %714 }
 0x27d   : > { %v717_v14 = vmul.f32 0.0078125, %v715_v13 }
 0x27f   : > { %v722_v16 = vmul.f32 %v717_v14, %v717_v14  ;;  %v724_v22 = vsub.f32 %v713_v62, %v717_v14 }
 0x280   : > { %v720_v15 = vpop.xlane.xlu0 %719 }
 0x281   : > { %v721_v17 = vmul.f32 0.0078125, %v720_v15 }
 0x283   : > { %v723_v18 = vsub.f32 %v721_v17, %v722_v16 }
 0x285   : > { %v725_v19 = vadd.f32 1e-05, %v723_v18 }
 0x287   : > { %1486 = vrsqrt.f32 %v725_v19 }
 0x291   : > { %v1487_v23 = vpop.eup %1486 }
 0x292   : > { %v727_v24 = vmul.f32 %v1487_v23, %v724_v22 }
 0x294   : > { %v732_v26 = vmul.f32 %v731_v21, %v727_v24 }
 0x296   : > { %v737_v27 = vadd.f32 %v736_v25, %v732_v26 }
 0x298   : > { %v755_v28 = vpack.c.bf16 %v737_v27, %v737_v27  ;;  %738 = vst [vmem:[%s364_s28] sm:$0xff] %v737_v27 }
 0x29a   : > { %1337 = vmatmul.mubr.bf16.vlgmr.msra.gmra.mrb[4].mxu0 %v755_v28 }
 0x29b   : > { %1376 = vmatprep.mubr.msk.bf16.mxu0 %vm1562_vm0, %v1561_v53  ;;  %1361 = vmatpush3.bf16.msra.mxu0 %v1478_v31 }
 0x29c   : > { %1362 = vmatprep.subr.bf16.mxu0 %v1561_v53 }
 0x29f   : > { %1363 = vmatpush3.bf16.msra.mxu0 %v1479_v32 }
 0x2a0   : > { %1364 = vmatprep.subr.bf16.mxu0 %v1561_v53 }
 0x2a3   : > { %1365 = vmatpush3.bf16.msra.mxu0 %v1480_v33 }
 0x2a4   : > { %1366 = vmatprep.subr.bf16.mxu0 %v1561_v53 }
 0x2a7   : > { %1367 = vmatpush3.bf16.msra.mxu0 %v1481_v34 }
 0x2a8   : > { %1368 = vmatprep.subr.bf16.mxu0 %v1561_v53 }
 0x2ab   : > { %1369 = vmatpush3.bf16.msra.mxu0 %v1482_v35 }
 0x2ac   : > { %1370 = vmatprep.subr.bf16.mxu0 %v1561_v53 }
 0x2af   : > { %1371 = vmatpush3.bf16.msra.mxu0 %v1483_v37 }
 0x2b0   : > { %1372 = vmatprep.subr.bf16.mxu0 %v1561_v53 }
 0x2b3   : > { %1373 = vmatpush3.bf16.msra.mxu0 %v1484_v47 }
 0x2b4   : > { %1374 = vmatprep.subr.bf16.mxu0 %v1561_v53 }
 0x2b7   : > { %1375 = vmatpush3.bf16.msra.mxu0 %v1485_v48 }
 0x36d   : > { %v842_v40 = vpop.f32.mrb[4].mxu0 }
 0x36e   : > { %v843_v41 = vadd.f32 %v842_v40, %v759_v39  ;;  %v1338_v42 = vpop.f32.mrb[5].mxu0 }
 0x36f   : > { %v845_v43 = vpop.f32.mrb[6].mxu0 }
 0x370   : > { %v848_v44 = vmax.f32 %v843_v41, 0.0  ;;  %v1339_v45 = vpop.f32.mrb[7].mxu0 }
 0x372   : > { %v865_v46 = vpack.c.bf16 %v848_v44, %v848_v44 }
 0x374   : > { %1357 = vmatmul.mubr.bf16.vlgmr.msra.gmra.mrb[4].mxu1 %v865_v46 }
 0x447   : > { %v952_v51 = vpop.f32.mrb[4].mxu1 }
 0x448   : > { %v953_v52 = vadd.f32 %v952_v51, %v869_v50  ;;  %v1358_v55 = vpop.f32.mrb[5].mxu1 }
 0x449   : > { %v955_v56 = vpop.f32.mrb[6].mxu1 }
 0x44a   : > { %v958_v57 = vmax.f32 %v953_v52, 0.0  ;;  %v1359_v58 = vpop.f32.mrb[7].mxu1 }
 0x44c   : > { %v975_v59 = vpack.c.bf16 %v958_v57, %v958_v57 }
 0x44e   : > { %1377 = vmatmul.mubr.bf16.vlgmr.msra.gmra.mrb[8].mxu0 %v975_v59 }
 0x44f   : > { %1509 = shalt.err (!%p1506_p3)
}
 0x450   : > { %s1510_s17 = scalar_lea.hbm %s1911_s11, 128  ;;  %s1514_s28 = scalar_lea.hbm %s1968_s9, 256 }
 0x451   : > { %p1511_p4 = scmp.ne.s32.totalorder %s1911_s11, %s1510_s17  ;;  %p1515_p9 = scmp.lt.u32.totalorder %s1911_s11, %s1968_s9 }
 0x452   : > { %p1516_p10 = scmp.lt.u32.totalorder %s1514_s28, %s1510_s17  ;;  %p1518_p12 = scmp.lt.u32.totalorder %s1510_s17, %s1911_s11 }
 0x453   : > { %p1512_p7 = pnand %p1511_p4, %p1657_p5 }
 0x454   : > { %p1517_p11 = por %p1516_p10, %p1515_p9 }
 0x455   : > { %p1513_p8 = pneg %p1512_p7 }
 0x456   : > { %p1519_p13 = por %p1518_p12, %p1517_p11 }
 0x458   : > { %p1520_p0 = pnand %p1519_p13, %p1513_p8 }
 0x45a   : > { %1523 = shalt.err (!%p1520_p0)
}
 0x45b   : > { %1380 = dma.vmem_to_hbm [thread:$0]  (%p1657_p5), %s1105_s21, 128, %s1911_s11, %s1087_s27   ;;  %v978_v3 = vsub.s32 5, %v1771_v36 }
 0x45c   : > { %s378_s29 = scalar_lea.vmem %s1960_s1, %s1723_s30  ;;  %s382_s11 = scalar_lea.vmem %s1969_s10, %s1723_s30 }
 0x45d   : > { %v1068_v53 = vld [vmem:[%s378_s29] sm:$0xff]  ;;  %v979_v5 = vrot.slane %v1789_v54, %v978_v3 }
 0x45e   : > { %v1069_v60 = vmax.f32 %v1068_v53, 0.0 }
 0x460   : > { %v1070_v61 = vmin.f32 %v1069_v60, 1.0 }
 0x462   : > { %v1072_v62 = vsub.f32 1.0, %v1070_v61  ;;  %v1071_v0 = vmax.f32 %v1070_v61, 1e-05 }
 0x464   : > { %v1073_v63 = vmax.f32 %v1072_v62, 1e-05 }
 0x466   : > { %1488 = vrcp.f32 %v1073_v63 }
 0x470   : > { %v1489_v1 = vpop.eup %1488 }
 0x471   : > { %v1075_v2 = vmul.f32 %v1489_v1, %v1071_v0 }
 0x473   : > { %1490 = vlog2.f32 %v1075_v2 }
 0x47d   : > { %v1491_v4 = vpop.eup %1490 }
 0x47e   : > { %v1077_v6 = vmul.f32 0.6931472, %v1491_v4 }
 0x521   : > { %v1062_v7 = vpop.f32.mrb[8].mxu0 }
 0x522   : > { %v1063_v8 = vadd.f32 %v1062_v7, %v979_v5  ;;  %v1378_v9 = vpop.f32.mrb[9].mxu0 }
 0x523   : > { %v1065_v10 = vpop.f32.mrb[10].mxu0 }
 0x524   : > { %v1078_v11 = vadd.f32 %v1077_v6, %v1063_v8  ;;  %v1379_v12 = vpop.f32.mrb[11].mxu0 }
 0x526   : > { %v1266_v13 = vmul.f32 -1.442695, %v1078_v11 }
 0x528   : > { %1492 = vpow2.f32 %v1266_v13 }
 0x532   : > { %v1493_v14 = vpop.eup %1492 }
 0x533   : > { %v1082_v15 = vadd.f32 1.0, %v1493_v14 }
 0x535   : > { %1494 = vrcp.f32 %v1082_v15 }
 0x53f   : > { %v1495_v36 = vpop.eup %1494 }
 0x540   : > { %1085 = vst [vmem:[%s382_s11] sm:$0xff] %v1495_v36 }
 0x541 PF: > { %p1386_p5 = scmp.ge.s32.totalorder %s1558_s16, 2  ;;  %s1119_s27 = sand.u32 1, %s1546_s13  }
 0x542   : > { %s1120_s12 = scalar_lea.sflag [#allocation3], %s1119_s27 }
 0x543   : > { %p1383_p1 = pnand %p1386_p5, %p1661_p6 }
 0x545   : > { %1541 = dma.done.wait (!%p1383_p1), %s1120_s12, 128  }
 0x546   : > { %1543 = vsyncadd (!%p1383_p1), %s1120_s12, 4294967168  ;;  %s1977_s18 = sld [smem:[#allocation5_spill]]  ;;  %p21_p2 = scmp.ge.s32.totalorder %s1644_s19, 4  }
 0x547   : > { %s1978_s13 = smov %s1550_s14  ;;  %s1979_s14 = smov %s1554_s15 }
 0x548   : > { %s1981_s16 = smov %s1644_s19  ;;  %23 = sbr.rel (!%p21_p2) target bundleno = 6 (0x6), region = 106 }
 0x54c   : > { %s1980_s15 = smov %s1977_s18 }
 0x54f   :  { %1132 = vsyncpa [#allocation3], 1 }
 0x550   :  { %1134 = vsyncpa [#allocation3 + $0x1], 1 }

// kernel: transformer_decoder_forward.4
= control target key start
LH: loop header
LB: loop body
LE: loop exit
PB: predicated region body
PF: predicated region fallthrough
CT: control target
= control target key end

     0   :  { %s4207_s0 = inlined_call_operand.vmem [shape: f32[2,8,128], index: 0, kind: input, shape index: {}]   ;;  %s4208_s1 = inlined_call_operand.vmem [shape: f32[2,8,128], index: 1, kind: input, shape index: {}]   ;;  %s4209_s2 = inlined_call_operand.vmem [shape: f32[2,16,128], index: 2, kind: input, shape index: {}]   ;;  %s4210_s3 = inlined_call_operand.hbm [shape: bf16[128,256], index: 3, kind: input, shape index: {}]   ;;  %s4211_s4 = inlined_call_operand.hbm [shape: bf16[256,128], index: 4, kind: input, shape index: {}]   ;;  %s4212_s5 = inlined_call_operand.hbm [shape: bf16[128,256], index: 5, kind: input, shape index: {}]   ;;  %s4213_s6 = inlined_call_operand.vmem [shape: bf16[128,128], index: 6, kind: input, shape index: {}]   ;;  %s4214_s7 = inlined_call_operand.hbm [shape: bf16[128,128], index: 7, kind: input, shape index: {}]   ;;  %s4215_s8 = inlined_call_operand.hbm [shape: bf16[128,128], index: 8, kind: input, shape index: {}]   ;;  %s4216_s9 = inlined_call_operand.hbm [shape: bf16[128,256], index: 9, kind: input, shape index: {}]   ;;  %s4217_s10 = inlined_call_operand.hbm [shape: bf16[128,128], index: 10, kind: input, shape index: {}]   ;;  %s4218_s11 = inlined_call_operand.vmem [shape: f32[15,128], index: 11, kind: input, shape index: {}]   ;;  %s4219_s12 = inlined_call_operand.vmem [shape: f32[2,8,128], index: 12, kind: output, shape index: {}]  }
   0x1   :  { %4227 = sst [smem:[#allocation18_spill]] %s4211_s4 }
   0x2   :  { %17 = vsyncpa [#allocation3], 0 }
   0x3   :  { %18 = vsyncpa [#allocation5], 0 }
   0x4   :  { %19 = vsyncpa [#allocation8], 0 }
   0x5   :  { %20 = vsyncpa [#allocation11], 0  ;;  %s3683_s21 = smov 0  }
   0x6 LB: > { %4228 = sst [smem:[#allocation17_spill]] %s3599_s21  ;;  %s3601_s22 = smov [#allocation4]   ;;  %s3599_s21 = sphi %s3683_s21, %s26_s21  }
   0x7   : > { %s349_s23 = sshll.u32 %s3601_s22, 4  ;;  %s3689_s24 = sadd.s32 4294967295, %s3599_s21   ;;  %s3694_s23 = int_to_ptr.vmem [resolvable:$true] %s349_s23 }
   0x8   : > { %p2733_p0 = scmp.ge.s32.totalorder %s3599_s21, 1  ;;  %p324_p1 = scmp.lt.s32.totalorder %s3599_s21, 3 }
   0x9   : > { %p4221_p2 = scmp.eq.s32.totalorder %s3689_s24, 0  ;;  %s3602_s26 = smov [#allocation7]  }
   0xa   : > { %p3696_p3 = pnand %p2733_p0, %p324_p1  ;;  %s378_s27 = sshll.u32 %s3602_s26, 4  ;;  %s3702_s27 = int_to_ptr.vmem [resolvable:$true] %s378_s27 }
   0xb   : > { %s3603_s29 = smov [#allocation10]   ;;  %s4231_s4 = sld [smem:[#allocation18_spill]] }
   0xc   : > { %s4229_s25 = scalar_select %p3696_p3, 1, 0 }
   0xd   : > { %p3164_p4 = pneg %p3696_p3  ;;  %s3710_s30 = sshll.u32 %s3603_s29, 4  ;;  %s405_s30 = int_to_ptr.vmem [resolvable:$true] %s3710_s30 }
   0xf   : > { %p3706_p5 = pnand %p4221_p2, %p3164_p4 }
  0x11   : > { %s3381_s15 = scalar_lea.hbm %s4231_s4, 2048  ;;  %p3720_p7 = pneg %p3706_p5 }
  0x12   : > { %p3382_p6 = scmp.ne.s32.totalorder %s4231_s4, %s3381_s15  ;;  %p3388_p10 = scmp.lt.u32.totalorder %s3381_s15, %s4231_s4 }
  0x14   : > { %p3384_p8 = pnand %p3720_p7, %p3382_p6 }
  0x16   : > { %p3385_p9 = pneg %p3384_p8 }
  0x18   : > { %p3390_p11 = pnand %p3388_p10, %p3385_p9 }
  0x1a   : > { %3393 = shalt.err (!%p3390_p11)
}
  0x1b   : > { %s3394_s22 = scalar_lea.vmem %s3694_s23, 2048  ;;  %p3402_p1 = scmp.lt.s32.totalorder %s3694_s23, %s3694_s23 }
  0x1c   : > { %p3395_p12 = scmp.ne.s32.totalorder %s3694_s23, %s3394_s22  ;;  %p3403_p4 = scmp.lt.s32.totalorder %s3394_s22, %s3394_s22 }
  0x1e   : > { %p3397_p13 = pnand %p3395_p12, %p3720_p7  ;;  %p3404_p6 = por %p3403_p4, %p3402_p1 }
  0x20   : > { %p3398_p0 = pneg %p3397_p13 }
  0x22   : > { %p3405_p8 = pnand %p3404_p6, %p3398_p0 }
  0x24   : > { %3408 = shalt.err (!%p3405_p8)
}
  0x25   : > { %s4223_s26 = smov 64   ;;  %s4225_s29 = smov 4  }
  0x26   : > { %3170 = dma.hbm_to_vmem [thread:$0]  (!%p3706_p5), %s4231_s4, 2048, %s3694_s23, [#allocation5], %s4223_s26, %s4223_s26, %s4225_s29  }
  0x27   : > { %s3409_s17 = scalar_lea.hbm %s4214_s7, 1024 }
  0x28   : > { %p3410_p9 = scmp.ne.s32.totalorder %s4214_s7, %s3409_s17  ;;  %p3416_p12 = scmp.lt.u32.totalorder %s3409_s17, %s4214_s7 }
  0x2a   : > { %p3412_p10 = pnand %p3410_p9, %p3720_p7 }
  0x2c   : > { %p3413_p11 = pneg %p3412_p10 }
  0x2e   : > { %p3418_p13 = pnand %p3416_p12, %p3413_p11 }
  0x30   : > { %3421 = shalt.err (!%p3418_p13)
}
  0x31   : > { %s3422_s23 = scalar_lea.vmem %s3702_s27, 1024  ;;  %p3430_p6 = scmp.lt.s32.totalorder %s3702_s27, %s3702_s27 }
  0x32   : > { %p3423_p0 = scmp.ne.s32.totalorder %s3702_s27, %s3422_s23  ;;  %p3431_p8 = scmp.lt.s32.totalorder %s3422_s23, %s3422_s23 }
  0x34   : > { %p3425_p1 = pnand %p3423_p0, %p3720_p7  ;;  %p3432_p9 = por %p3431_p8, %p3430_p6 }
  0x36   : > { %p3426_p4 = pneg %p3425_p1 }
  0x38   : > { %p3433_p10 = pnand %p3432_p9, %p3426_p4 }
  0x3a   : > { %3436 = shalt.err (!%p3433_p10)
}
  0x3b   : > { %3176 = dma.hbm_to_vmem [thread:$0]  (!%p3706_p5), %s4214_s7, 1024, %s3702_s27, [#allocation8], %s4223_s26, %s4223_s26, %s4225_s29  }
  0x3c   : > { %s3606_s14 = smov [#allocation2]   ;;  %s3437_s19 = scalar_lea.hbm %s4216_s9, 2048 }
  0x3d   : > { %s336_s15 = sshll.u32 %s3606_s14, 4  ;;  %p3438_p11 = scmp.ne.s32.totalorder %s4216_s9, %s3437_s19  ;;  %s337_s15 = int_to_ptr.vmem [resolvable:$true] %s336_s15 }
  0x3e   : > { %p3444_p0 = scmp.lt.u32.totalorder %s3437_s19, %s4216_s9 }
  0x3f   : > { %p3440_p12 = pnand %p3438_p11, %p3720_p7 }
  0x41   : > { %p3441_p13 = pneg %p3440_p12 }
  0x43   : > { %p3446_p1 = pnand %p3444_p0, %p3441_p13 }
  0x45   : > { %3449 = shalt.err (!%p3446_p1)
}
  0x46   : > { %s3450_s27 = scalar_lea.vmem %s405_s30, 2048  ;;  %p3458_p9 = scmp.lt.s32.totalorder %s405_s30, %s405_s30 }
  0x47   : > { %p3451_p4 = scmp.ne.s32.totalorder %s405_s30, %s3450_s27  ;;  %p3459_p10 = scmp.lt.s32.totalorder %s3450_s27, %s3450_s27 }
  0x49   : > { %p3453_p6 = pnand %p3451_p4, %p3720_p7  ;;  %p3460_p2 = por %p3459_p10, %p3458_p9 }
  0x4b   : > { %p3454_p8 = pneg %p3453_p6 }
  0x4d   : > { %p3461_p3 = pnand %p3460_p2, %p3454_p8 }
  0x4f   : > { %3464 = shalt.err (!%p3461_p3)
}
  0x50   : > { %s3607_s21 = smov 128   ;;  %s3608_s13 = smov 8  }
  0x51   : > { %3182 = dma.hbm_to_vmem [thread:$0]  (!%p3706_p5), %s4216_s9, 2048, %s405_s30, [#allocation11], %s3607_s21, %s3607_s21, %s3608_s13  }
  0x52   : > { %s3465_s19 = scalar_lea.hbm %s4210_s3, 2048 }
  0x53   : > { %p3466_p2 = scmp.ne.s32.totalorder %s4210_s3, %s3465_s19  ;;  %p3472_p12 = scmp.lt.u32.totalorder %s3465_s19, %s4210_s3 }
  0x55   : > { %p3468_p3 = pnand %p3466_p2, %p3720_p7 }
  0x57   : > { %p3469_p11 = pneg %p3468_p3 }
  0x59   : > { %p3474_p13 = pnand %p3472_p12, %p3469_p11 }
  0x5b   : > { %3477 = shalt.err (!%p3474_p13)
}
  0x5c   : > { %s3478_s4 = scalar_lea.vmem %s337_s15, 2048  ;;  %p3486_p6 = scmp.lt.s32.totalorder %s337_s15, %s337_s15 }
  0x5d   : > { %p3479_p0 = scmp.ne.s32.totalorder %s337_s15, %s3478_s4  ;;  %p3487_p8 = scmp.lt.s32.totalorder %s3478_s4, %s3478_s4 }
  0x5f   : > { %p3481_p1 = pnand %p3479_p0, %p3720_p7  ;;  %p3488_p9 = por %p3487_p8, %p3486_p6 }
  0x61   : > { %p3482_p4 = pneg %p3481_p1 }
  0x63   : > { %p3489_p10 = pnand %p3488_p9, %p3482_p4 }
  0x65   : > { %3492 = shalt.err (!%p3489_p10)
}
  0x66   : > { %3167 = dma.hbm_to_vmem [thread:$0]  (!%p3706_p5), %s4210_s3, 2048, %s337_s15, [#allocation3], %s3607_s21, %s3607_s21, %s3608_s13  }
  0x67   : > { %s3609_s16 = smov [#allocation6]   ;;  %s3610_s19 = smov [#allocation9]  }
  0x68   : > { %s362_s17 = sshll.u32 %s3609_s16, 4  ;;  %s391_s20 = sshll.u32 %s3610_s19, 4  ;;  %s363_s17 = int_to_ptr.vmem [resolvable:$true] %s362_s17  ;;  %s392_s20 = int_to_ptr.vmem [resolvable:$true] %s391_s20 }
  0x69   : > { %s3493_s27 = scalar_lea.hbm %s4212_s5, 2048 }
  0x6a   : > { %p3494_p2 = scmp.ne.s32.totalorder %s4212_s5, %s3493_s27  ;;  %p3500_p12 = scmp.lt.u32.totalorder %s3493_s27, %s4212_s5 }
  0x6c   : > { %p3496_p3 = pnand %p3494_p2, %p3720_p7 }
  0x6e   : > { %p3497_p11 = pneg %p3496_p3 }
  0x70   : > { %p3502_p13 = pnand %p3500_p12, %p3497_p11 }
  0x72   : > { %3505 = shalt.err (!%p3502_p13)
}
  0x73   : > { %s3506_s15 = scalar_lea.vmem %s363_s17, 2048  ;;  %p3514_p6 = scmp.lt.s32.totalorder %s363_s17, %s363_s17 }
  0x74   : > { %p3507_p0 = scmp.ne.s32.totalorder %s363_s17, %s3506_s15  ;;  %p3515_p8 = scmp.lt.s32.totalorder %s3506_s15, %s3506_s15 }
  0x76   : > { %p3509_p1 = pnand %p3507_p0, %p3720_p7  ;;  %p3516_p9 = por %p3515_p8, %p3514_p6 }
  0x78   : > { %p3510_p4 = pneg %p3509_p1 }
  0x7a   : > { %p3517_p10 = pnand %p3516_p9, %p3510_p4 }
  0x7c   : > { %3520 = shalt.err (!%p3517_p10)
}
  0x7d   : > { %3173 = dma.hbm_to_vmem [thread:$0]  (!%p3706_p5), %s4212_s5, 2048, %s363_s17, [#allocation5], %s3607_s21, %s3607_s21, %s3608_s13  }
  0x7e   : > { %s3521_s19 = scalar_lea.hbm %s4215_s8, 1024 }
  0x7f   : > { %p3522_p2 = scmp.ne.s32.totalorder %s4215_s8, %s3521_s19  ;;  %p3528_p12 = scmp.lt.u32.totalorder %s3521_s19, %s4215_s8 }
  0x81   : > { %p3524_p3 = pnand %p3522_p2, %p3720_p7 }
  0x83   : > { %p3525_p11 = pneg %p3524_p3 }
  0x85   : > { %p3530_p13 = pnand %p3528_p12, %p3525_p11 }
  0x87   : > { %3533 = shalt.err (!%p3530_p13)
}
  0x88   : > { %s3534_s30 = scalar_lea.vmem %s392_s20, 1024  ;;  %p3542_p6 = scmp.lt.s32.totalorder %s392_s20, %s392_s20 }
  0x89   : > { %p3535_p0 = scmp.ne.s32.totalorder %s392_s20, %s3534_s30  ;;  %p3543_p8 = scmp.lt.s32.totalorder %s3534_s30, %s3534_s30 }
  0x8b   : > { %p3537_p1 = pnand %p3535_p0, %p3720_p7  ;;  %p3544_p9 = por %p3543_p8, %p3542_p6 }
  0x8d   : > { %p3538_p4 = pneg %p3537_p1 }
  0x8f   : > { %p3545_p10 = pnand %p3544_p9, %p3538_p4 }
  0x91   : > { %3548 = shalt.err (!%p3545_p10)
}
  0x92   : > { %s4233_s21 = smov 4   ;;  %s4234_s13 = smov 64  }
  0x93   : > { %3179 = dma.hbm_to_vmem [thread:$0]  (!%p3706_p5), %s4215_s8, 1024, %s392_s20, [#allocation8], %s4234_s13, %s4234_s13, %s4233_s21  }
  0x94   : > { %s3611_s26 = smov [#allocation12]   ;;  %s3549_s19 = scalar_lea.hbm %s4217_s10, 1024 }
  0x95   : > { %s417_s29 = sshll.u32 %s3611_s26, 4  ;;  %p3550_p2 = scmp.ne.s32.totalorder %s4217_s10, %s3549_s19  ;;  %s418_s29 = int_to_ptr.vmem [resolvable:$true] %s417_s29 }
  0x96   : > { %p3556_p12 = scmp.lt.u32.totalorder %s3549_s19, %s4217_s10 }
  0x97   : > { %p3552_p3 = pnand %p3550_p2, %p3720_p7 }
  0x99   : > { %p3553_p11 = pneg %p3552_p3 }
  0x9b   : > { %p3558_p13 = pnand %p3556_p12, %p3553_p11 }
  0x9d   : > { %3561 = shalt.err (!%p3558_p13)
}
  0x9e   : > { %s3562_s20 = scalar_lea.vmem %s418_s29, 1024  ;;  %p3570_p6 = scmp.lt.s32.totalorder %s418_s29, %s418_s29 }
  0x9f   : > { %p3563_p0 = scmp.ne.s32.totalorder %s418_s29, %s3562_s20  ;;  %p3571_p8 = scmp.lt.s32.totalorder %s3562_s20, %s3562_s20 }
  0xa1   : > { %p3565_p1 = pnand %p3563_p0, %p3720_p7  ;;  %p3572_p9 = por %p3571_p8, %p3570_p6 }
  0xa3   : > { %p3566_p4 = pneg %p3565_p1 }
  0xa5   : > { %p3573_p10 = pnand %p3572_p9, %p3566_p4 }
  0xa7   : > { %3576 = shalt.err (!%p3573_p10)
}
  0xa8   : > { %3185 = dma.hbm_to_vmem [thread:$0]  (!%p3706_p5), %s4217_s10, 1024, %s418_s29, [#allocation11], %s4234_s13, %s4234_s13, %s4233_s21  }
  0xa9   : > { %p4235_p2 = scmp.ne.s32.totalorder %s4229_s25, 0 }
  0xaa   : > { %p4236_p7 = scmp.eq.s32.totalorder (!%p4235_p2), %s3689_s24, 0 }
  0xab   : > { %458 = sbr.rel (%p4235_p2) target bundleno = 4716 (0x126c), region = 68 }
  0xb2   : > { %3582 = dma.done.wait (%p4236_p7), [#allocation3], 2048   ;;  %p4237_p3 = pmov %p4236_p7 }
  0xb4   : > { %3584 = vsyncadd (%p4237_p3), [#allocation3], 4294965248  ;;  %p4238_p11 = pmov %p4237_p3 }
  0xb5   : > { %p4239_p12 = pmov %p4237_p3 }
  0xb6   : > { %3586 = dma.done.wait (%p4238_p11), [#allocation5], 4096  }
  0xb7   : > { %3588 = vsyncadd (%p4239_p12), [#allocation5], 4294963200  ;;  %p4240_p13 = pmov %p4237_p3 }
  0xb8   : > { %p4241_p5 = pmov %p4237_p3 }
  0xb9   : > { %3590 = dma.done.wait (%p4240_p13), [#allocation8], 2048  }
  0xba   : > { %3592 = vsyncadd (%p4241_p5), [#allocation8], 4294965248  ;;  %p4242_p0 = pmov %p4237_p3 }
  0xbc   : > { %3594 = dma.done.wait (%p4242_p0), [#allocation11], 3072   ;;  %p4243_p1 = pmov %p4242_p0 }
  0xbd   : > { %v3612_v0 = vmov 0   ;;  %v3225_v1 = vld [vmem:[#allocation2 + $0x4] ss:$8 sps:$4 sm:$0xff]   ;;  %v3227_v2 = vld [vmem:[#allocation2] ss:$8 sps:$4 sm:$0xff]   ;;  %p531_p4 = scmp.lt.s32.totalorder %s3689_s24, 1  ;;  %v575_v47 = vlaneseq }
  0xbe   : > { %3596 = vsyncadd (%p4243_p1), [#allocation11], 4294964224  ;;  %695 = vmatprep.mubr.bf16.mxu0 %v3612_v0  ;;  %663 = vmatprep.subr.bf16.mxu0 %v3225_v1  ;;  %v3228_v3 = vld [vmem:[#allocation2 + $0x14] ss:$8 sps:$4 sm:$0xff]   ;;  %v3230_v4 = vld [vmem:[#allocation2 + $0x10] ss:$8 sps:$4 sm:$0xff]  }
  0xbf   : > { %664 = vmatpush1.bf16.msra.mxu0 %v3227_v2  ;;  %v3231_v5 = vld [vmem:[#allocation2 + $0x24] ss:$8 sps:$4 sm:$0xff]   ;;  %v3233_v6 = vld [vmem:[#allocation2 + $0x20] ss:$8 sps:$4 sm:$0xff]   ;;  %v3234_v7 = vld [vmem:[#allocation2 + $0x34] ss:$8 sps:$4 sm:$0xff]  }
  0xc0   : > { %665 = vmatprep.subr.bf16.mxu0 %v3228_v3  ;;  %v3236_v8 = vld [vmem:[#allocation2 + $0x30] ss:$8 sps:$4 sm:$0xff]   ;;  %v3237_v9 = vld [vmem:[#allocation2 + $0x44] ss:$8 sps:$4 sm:$0xff]   ;;  %v3239_v12 = vld [vmem:[#allocation2 + $0x40] ss:$8 sps:$4 sm:$0xff]  }
  0xc1   : > { %v3249_v10 = vld [vmem:[#allocation4 + $0x40] sm:$0xff]   ;;  %v3251_v13 = vld [vmem:[#allocation4 + $0x48] sm:$0xff]   ;;  %s4246_s24 = smov (!%p531_p4, %s3689_s24), 1  ;;  %v3253_v15 = vld [vmem:[#allocation4 + $0x50] sm:$0xff]   ;;  %v3907_v48 = vshrl.u32 %v575_v47, 7  ;;  %vm3614_vm0 = vmmov 0  }
  0xc2   : > { %v3250_v11 = vld [vmem:[#allocation4] sm:$0xff]   ;;  %2870 = vmatprep.subr.bf16.mxu1 %v3249_v10  ;;  %v3252_v14 = vld [vmem:[#allocation4 + $0x8] sm:$0xff]   ;;  %v3240_v16 = vld [vmem:[#allocation2 + $0x54] ss:$8 sps:$4 sm:$0xff]   ;;  %s3900_s25 = sshll.u32 %s4246_s24, 3  ;;  %vm1157_vm1 = vcmask 261120  }
  0xc3   : > { %666 = vmatpush1.bf16.msra.mxu0 %v3230_v4  ;;  %2871 = vmatpush3.bf16.msra.mxu1 %v3250_v11  ;;  %v3242_v17 = vld [vmem:[#allocation2 + $0x50] ss:$8 sps:$4 sm:$0xff]   ;;  %v3243_v20 = vld [vmem:[#allocation2 + $0x64] ss:$8 sps:$4 sm:$0xff]   ;;  %v3245_v21 = vld [vmem:[#allocation2 + $0x60] ss:$8 sps:$4 sm:$0xff]   ;;  %s538_s21 = scalar_lea.vmem %s4208_s1, %s3900_s25  ;;  %s534_s29 = scalar_lea.vmem %s4207_s0, %s3900_s25 }
  0xc4   : > { %667 = vmatprep.subr.bf16.mxu0 %v3231_v5  ;;  %2872 = vmatprep.subr.bf16.mxu1 %v3251_v13  ;;  %v3254_v18 = vld [vmem:[#allocation4 + $0x10] sm:$0xff]   ;;  %v3255_v19 = vld [vmem:[#allocation4 + $0x58] sm:$0xff]   ;;  %v3257_v24 = vld [vmem:[#allocation4 + $0x60] sm:$0xff]   ;;  %v3915_v50 = vsub.s32 0, %v3907_v48  ;;  %s3615_s14 = smov 96   ;;  %s3616_s16 = smov 64  }
  0xc5   : > { %v3256_v22 = vld [vmem:[#allocation4 + $0x18] sm:$0xff]   ;;  %v3258_v25 = vld [vmem:[#allocation4 + $0x20] sm:$0xff]   ;;  %v3259_v28 = vld [vmem:[#allocation4 + $0x68] sm:$0xff]   ;;  %s3617_s19 = smov 32   ;;  %vm1221_vm2 = vcmask 1043456   ;;  %vm1205_vm3 = vcmask 64512   ;;  %s547_s28 = scalar_lea.vmem %s4219_s12, %s3900_s25 }
  0xc6   : > { %v3246_v23 = vld [vmem:[#allocation2 + $0x74] ss:$8 sps:$4 sm:$0xff]   ;;  %v3248_v26 = vld [vmem:[#allocation2 + $0x70] ss:$8 sps:$4 sm:$0xff]   ;;  %v550_v27 = vld [vmem:[%s538_s21] sm:$0xff]  ;;  %vm1614_vm4 = vcmask 523264  }
  0xc7   : > { %668 = vmatpush1.bf16.msra.mxu0 %v3233_v6  ;;  %2873 = vmatpush3.bf16.msra.mxu1 %v3252_v14  ;;  %v3260_v29 = vld [vmem:[#allocation4 + $0x28] sm:$0xff]   ;;  %v574_v30 = vpack.c.bf16 %v550_v27, %v550_v27  ;;  %v3261_v31 = vld [vmem:[#allocation4 + $0x70] sm:$0xff]   ;;  %v3263_v33 = vld [vmem:[#allocation4 + $0x78] sm:$0xff]   ;;  %v3613_v6 = vmov 0.0   ;;  %v742_v14 = vsub.s32 2, %v3907_v48  ;;  %v1021_v27 = vsub.s32 3, %v3907_v48 }
  0xc8   : > { %669 = vmatprep.subr.bf16.mxu0 %v3234_v7  ;;  %2874 = vmatprep.subr.bf16.mxu1 %v3253_v15  ;;  %v3262_v32 = vld [vmem:[#allocation4 + $0x30] sm:$0xff]   ;;  %v3264_v34 = vld [vmem:[#allocation4 + $0x38] sm:$0xff]   ;;  %v3265_v35 = vld [vmem:[#allocation6] ss:$8 sps:$4 sm:$0xff]   ;;  %vm1616_vm5 = vcmask 785408   ;;  %s2869_s22 = sshll.u32 %s4246_s24, 4 }
  0xc9   : > { %v3267_v36 = vld [vmem:[#allocation6 + $0x4] ss:$8 sps:$4 sm:$0xff]   ;;  %v3270_v37 = vld [vmem:[#allocation6 + $0x14] ss:$8 sps:$4 sm:$0xff]   ;;  %v3268_v38 = vld [vmem:[#allocation6 + $0x10] ss:$8 sps:$4 sm:$0xff]   ;;  %s543_s4 = scalar_lea.vmem %s4209_s2, %s2869_s22 }
  0xca   : > { %v3273_v39 = vld [vmem:[#allocation6 + $0x24] ss:$8 sps:$4 sm:$0xff]   ;;  %v3271_v40 = vld [vmem:[#allocation6 + $0x20] ss:$8 sps:$4 sm:$0xff]   ;;  %v3276_v41 = vld [vmem:[#allocation6 + $0x34] ss:$8 sps:$4 sm:$0xff]  }
  0xcb   : > { %670 = vmatpush1.bf16.msra.mxu0 %v3236_v8  ;;  %2875 = vmatpush3.bf16.msra.mxu1 %v3254_v18  ;;  %v3274_v42 = vld [vmem:[#allocation6 + $0x30] ss:$8 sps:$4 sm:$0xff]   ;;  %v3279_v43 = vld [vmem:[#allocation6 + $0x44] ss:$8 sps:$4 sm:$0xff]   ;;  %v3277_v44 = vld [vmem:[#allocation6 + $0x40] ss:$8 sps:$4 sm:$0xff]  }
  0xcc   : > { %671 = vmatprep.subr.bf16.mxu0 %v3237_v9  ;;  %2876 = vmatprep.subr.bf16.mxu1 %v3255_v19  ;;  %v3282_v45 = vld [vmem:[#allocation6 + $0x54] ss:$8 sps:$4 sm:$0xff]   ;;  %v3280_v46 = vld [vmem:[#allocation6 + $0x50] ss:$8 sps:$4 sm:$0xff]   ;;  %v3912_v49 = vld [vmem:[%s4218_s11] sm:$0xff]  ;;  %vm2065_vm6 = vcmask 130048  }
  0xcd   : > { %v556_v51 = vrot.slane %v3912_v49, 1  ;;  %v578_v52 = vrot.slane %v3912_v49, %v3915_v50  ;;  %v3285_v1 = vld [vmem:[#allocation6 + $0x64] ss:$8 sps:$4 sm:$0xff]   ;;  %v3283_v2 = vld [vmem:[#allocation6 + $0x60] ss:$8 sps:$4 sm:$0xff]   ;;  %v3291_v8 = vld [vmem:[%s4213_s6 + $0x10] sm:$0xff]  }
  0xce   : > { %v3288_v3 = vld [vmem:[#allocation6 + $0x74] ss:$8 sps:$4 sm:$0xff]   ;;  %v3286_v4 = vld [vmem:[#allocation6 + $0x70] ss:$8 sps:$4 sm:$0xff]   ;;  %v3289_v5 = vld [vmem:[%s4213_s6] sm:$0xff]  }
  0xcf   : > { %672 = vmatpush1.bf16.msra.mxu0 %v3239_v12  ;;  %2877 = vmatpush3.bf16.msra.mxu1 %v3256_v22  ;;  %v582_v53 = vrot.slane %v556_v51, %v3915_v50  ;;  %v3290_v7 = vld [vmem:[%s4213_s6 + $0x8] sm:$0xff]   ;;  %v3292_v9 = vld [vmem:[%s4213_s6 + $0x18] sm:$0xff]   ;;  %v3293_v10 = vld [vmem:[%s4213_s6 + $0x20] sm:$0xff]  }
  0xd0   : > { %673 = vmatprep.subr.bf16.mxu0 %v3240_v16  ;;  %2878 = vmatprep.subr.bf16.mxu1 %v3257_v24  ;;  %v3294_v11 = vld [vmem:[%s4213_s6 + $0x28] sm:$0xff]   ;;  %v3295_v12 = vld [vmem:[%s4213_s6 + $0x30] sm:$0xff]   ;;  %v3296_v13 = vld [vmem:[%s4213_s6 + $0x38] sm:$0xff]   ;;  %v743_v16 = vrot.slane %v3912_v49, %v742_v14 }
  0xd3   : > { %674 = vmatpush1.bf16.msra.mxu0 %v3242_v17  ;;  %2879 = vmatpush3.bf16.msra.mxu1 %v3258_v25 }
  0xd4   : > { %675 = vmatprep.subr.bf16.mxu0 %v3243_v20  ;;  %2880 = vmatprep.subr.bf16.mxu1 %v3259_v28  ;;  %v3963_v20 = vld [vmem:[%s534_s29] sm:$0xff] }
  0xd5   : > { %v1045_v25 = vpack.c.bf16 %v3963_v20, %v3963_v20 }
  0xd7   : > { %676 = vmatpush1.bf16.msra.mxu0 %v3245_v21  ;;  %2881 = vmatpush3.bf16.msra.mxu1 %v3260_v29 }
  0xd8   : > { %677 = vmatprep.subr.bf16.mxu0 %v3246_v23  ;;  %2882 = vmatprep.subr.bf16.mxu1 %v3261_v31 }
  0xdb   : > { %678 = vmatpush1.bf16.msra.mxu0 %v3248_v26  ;;  %2883 = vmatpush3.bf16.msra.mxu1 %v3262_v32  ;;  %v1026_v26 = vsub.s32 4, %v3907_v48 }
  0xdc   : > { %2884 = vmatprep.subr.bf16.mxu1 %v3263_v33  ;;  %978 = vmatprep.subr.bf16.mxu0 %v3267_v36 }
  0xdd   : > { %v1027_v28 = vrot.slane %v3912_v49, %v1026_v26 }
  0xde   : > { %696 = vmatmul.mubr.bf16.vlgmr.msra.gmra.mrb[0].mxu0 %v574_v30  ;;  %v1022_v30 = vrot.slane %v3912_v49, %v1021_v27 }
  0xdf   : > { %1010 = vmatprep.mubr.bf16.mxu0 %v3612_v0  ;;  %2885 = vmatpush3.bf16.msra.mxu1 %v3264_v34 }
  0xe0   : > { %979 = vmatpush1.bf16.msra.mxu0 %v3265_v35  ;;  %2960 = vmatprep.subr.bf16.mxu1 %v3613_v6 }
  0xe1   : > { %980 = vmatprep.subr.bf16.mxu0 %v3270_v37 }
  0xe4   : > { %981 = vmatpush1.bf16.msra.mxu0 %v3268_v38 }
  0xe5   : > { %982 = vmatprep.subr.bf16.mxu0 %v3273_v39  ;;  %v1048_v39 = vsub.s32 5, %v3907_v48 }
  0xe8   : > { %983 = vmatpush1.bf16.msra.mxu0 %v3271_v40  ;;  %v1049_v40 = vrot.slane %v3912_v49, %v1048_v39 }
  0xe9   : > { %984 = vmatprep.subr.bf16.mxu0 %v3276_v41 }
  0xec   : > { %985 = vmatpush1.bf16.msra.mxu0 %v3274_v42 }
  0xed   : > { %986 = vmatprep.subr.bf16.mxu0 %v3279_v43 }
  0xf0   : > { %987 = vmatpush1.bf16.msra.mxu0 %v3277_v44 }
  0xf1   : > { %988 = vmatprep.subr.bf16.mxu0 %v3282_v45 }
  0xf4   : > { %989 = vmatpush1.bf16.msra.mxu0 %v3280_v46 }
  0xf5   : > { %990 = vmatprep.subr.bf16.mxu0 %v3285_v1 }
  0xf8   : > { %991 = vmatpush1.bf16.msra.mxu0 %v3283_v2 }
  0xf9   : > { %992 = vmatprep.subr.bf16.mxu0 %v3288_v3 }
  0xfc   : > { %993 = vmatpush1.bf16.msra.mxu0 %v3286_v4 }
  0xfd   : > { %3004 = vmatprep.subr.bf16.mxu0 %v3613_v6 }
 0x1b1   : > { %v697_v54 = vpop.f32.mrb[0].mxu0 }
 0x1b2   : > { %v698_v55 = vadd.f32 %v697_v54, %v578_v52  ;;  %v699_v56 = vpop.f32.mrb[1].mxu0 }
 0x1b3   : > { %v700_v57 = vadd.f32 %v699_v56, %v582_v53  ;;  %v701_v58 = vpop.f32.mrb[2].mxu0 }
 0x1b4   : > { %v704_v59 = vmax.f32 %v698_v55, 0.0  ;;  %v702_v60 = vpop.f32.mrb[3].mxu0 }
 0x1b5   : > { %v705_v61 = vmax.f32 %v700_v57, 0.0 }
 0x1b6   : > { %v738_v63 = vpack.c.bf16 %v704_v59, %v704_v59 }
 0x1b7   : > { %v739_v62 = vpack.c.bf16 %v705_v61, %v705_v61 }
 0x1b9   : > { %872 = vmatprep.mubr.bf16.mxu1 %v739_v62 }
 0x1ba   : > { %873 = vmatmul.mubr.bf16.vlgmr.msra.gmra.mrb[0].mxu1 %v738_v63 }
 0x1bb   : > { %2961 = vmatpush3.bf16.msra.mxu1 %v3289_v5  ;;  %2976 = vmatprep.mubr.msk.bf16.mxu1 %vm3614_vm0, %v3613_v6 }
 0x1bc   : > { %2962 = vmatprep.subr.bf16.mxu1 %v3613_v6 }
 0x1bf   : > { %2963 = vmatpush3.bf16.msra.mxu1 %v3290_v7 }
 0x1c0   : > { %2964 = vmatprep.subr.bf16.mxu1 %v3613_v6 }
 0x1c3   : > { %2965 = vmatpush3.bf16.msra.mxu1 %v3291_v8 }
 0x1c4   : > { %2966 = vmatprep.subr.bf16.mxu1 %v3613_v6 }
 0x1c7   : > { %2967 = vmatpush3.bf16.msra.mxu1 %v3292_v9 }
 0x1c8   : > { %2968 = vmatprep.subr.bf16.mxu1 %v3613_v6 }
 0x1cb   : > { %2969 = vmatpush3.bf16.msra.mxu1 %v3293_v10 }
 0x1cc   : > { %2970 = vmatprep.subr.bf16.mxu1 %v3613_v6 }
 0x1cf   : > { %2971 = vmatpush3.bf16.msra.mxu1 %v3294_v11 }
 0x1d0   : > { %2972 = vmatprep.subr.bf16.mxu1 %v3613_v6 }
 0x1d3   : > { %2973 = vmatpush3.bf16.msra.mxu1 %v3295_v12 }
 0x1d4   : > { %2974 = vmatprep.subr.bf16.mxu1 %v3613_v6 }
 0x1d7   : > { %2975 = vmatpush3.bf16.msra.mxu1 %v3296_v13 }
 0x1d8   : > { %2980 = vmatprep.subr.bf16.mxu1 %v3613_v6 }
 0x1da   : > { %2977 = vmatmul.mubr.bf16.vlgmr.msra.gmra.mrb[4].mxu1 %v1045_v25 }
 0x1db   : > { %2982 = vmatprep.mubr.msk.bf16.mxu1 %vm3614_vm0, %v3613_v6 }
 0x28d   : > { %v2886_v15 = vpop.f32.mrb[0].mxu1 }
 0x28e   : > { %v2887_v17 = vpop.f32.mrb[1].mxu1 }
 0x28f   : > { %v2888_v18 = vadd.f32 %v2887_v17, %v2886_v15  ;;  %v2889_v19 = vpop.f32.mrb[2].mxu1 }
 0x290   : > { %v2890_v21 = vpop.f32.mrb[3].mxu1 }
 0x291   : > { %v3965_v22 = vadd.f32 %v2888_v18, %v743_v16 }
 0x293   : > { %v880_v23 = vadd.f32 %v3965_v22, %v3963_v20 }
 0x295   : > { %v897_v24 = vpack.c.bf16 %v880_v23, %v880_v23 }
 0x297   : > { %1011 = vmatmul.mubr.bf16.vlgmr.msra.gmra.mrb[4].mxu0 %v897_v24 }
 0x298   : > { %3006 = vmatprep.mubr.msk.bf16.mxu0 %vm3614_vm0, %v3613_v6 }
 0x2ad   : > { %v1132_v41 = vpop.f32.mrb[4].mxu1 }
 0x2ae   : > { %v1133_v42 = vadd.f32 %v1132_v41, %v1049_v40  ;;  %v2978_v43 = vpop.f32.mrb[5].mxu1 }
 0x2af   : > { %v1135_v44 = vpop.f32.mrb[6].mxu1 }
 0x2b0   : > { %v3999_v45 = vpack.c.bf16 %v1133_v42, %v1133_v42  ;;  %v2979_v46 = vpop.f32.mrb[7].mxu1 }
 0x2b2   : > { %v1223_v47 = vsel %vm1221_vm2, %v3999_v45, 0 }
 0x36a   : > { %v1012_v29 = vpop.f32.mrb[4].mxu0 }
 0x36b   : > { %v1014_v31 = vpop.f32.mrb[5].mxu0  ;;  %v1023_v35 = vadd.f32 %v1022_v30, %v1012_v29 }
 0x36c   : > { %v1028_v32 = vadd.f32 %v1027_v28, %v1014_v31  ;;  %v1016_v33 = vpop.f32.mrb[6].mxu0 }
 0x36d   : > { %v1017_v34 = vpop.f32.mrb[7].mxu0  ;;  %v1154_v38 = vpack.c.bf16 %v1023_v35, %v1023_v35 }
 0x36e   : > { %v1155_v36 = vpack.c.bf16 %v1028_v32, %v1028_v32 }
 0x370   : > { %1269 = vrot.lane.b32.xlu1 %v1155_v36, %s3615_s14  ;;  %v1162_v37 = vsel %vm1157_vm1, %v1155_v36, 0 }
 0x371   : > { %2981 = vmatpush3.bf16.xpose.msra.mxu1 %v1162_v37 }
 0x372   : > { %2986 = vmatprep.subr.bf16.mxu1 %v3613_v6 }
 0x374   : > { %1266 = vrot.lane.b32.xlu1 %v1154_v38, %s3615_s14 }
 0x378   : > { %1379 = vrot.lane.b32.xlu1 %v1154_v38, %s3616_s16  ;;  %2983 = vmatmul.mubr.msk.bf16.vlgmr.msra.gmra.mrb[8].mxu1 %vm1157_vm1, %v1154_v38 }
 0x379   : > { %2988 = vmatprep.mubr.msk.bf16.mxu1 %vm3614_vm0, %v3613_v6  ;;  %2987 = vmatpush3.bf16.msra.mxu1 %v1223_v47 }
 0x37a   : > { %2992 = vmatprep.subr.bf16.mxu1 %v3613_v6 }
 0x37c   : > { %1492 = vrot.lane.b32.xlu1 %v1155_v36, %s3617_s19 }
 0x380   : > { %1490 = vrot.lane.b32.xlu1 %v1154_v38, %s3617_s19 }
 0x3e2   : > { %v1270_v62 = vpop.permute.xlu1 %1269 }
 0x3e3   : > { %v1275_v11 = vsel %vm1157_vm1, %v1270_v62, 0 }
 0x3e6   : > { %v1267_v63 = vpop.permute.xlu1 %1266 }
 0x3ea   : > { %v1380_v2 = vpop.permute.xlu1 %1379 }
 0x3ee   : > { %v1493_v5 = vpop.permute.xlu1 %1492 }
 0x3ef   : > { %v1498_v9 = vsel %vm1157_vm1, %v1493_v5, 0 }
 0x3f2   : > { %v1491_v12 = vpop.permute.xlu1 %1490 }
 0x44b   : > { %v1198_v51 = vpop.f32.mrb[8].mxu1 }
 0x44c   : > { %v1204_v52 = vmul.f32 0.17677669, %v1198_v51  ;;  %v2984_v53 = vpop.f32.mrb[9].mxu1 }
 0x44d   : > { %v1201_v54 = vpop.f32.mrb[10].mxu1 }
 0x44e   : > { %v2985_v55 = vpop.f32.mrb[11].mxu1  ;;  %v1206_v56 = vsel %vm1205_vm3, %v1204_v52, -inf }
 0x44f   : > { %1207 = vmax.xlane.f32.xlu0 %v1206_v56 }
 0x4dc   : > { %v1208_v57 = vpop.xlane.xlu0 %1207 }
 0x4dd   : > { %v1209_v58 = vsub.f32 %v1204_v52, %v1208_v57 }
 0x4df   : > { %v1210_v59 = vmul.f32 1.442695, %v1209_v58 }
 0x4e1   : > { %3345 = vpow2.f32 %v1210_v59 }
 0x4eb   : > { %v3346_v60 = vpop.eup %3345 }
 0x4ec   : > { %v1212_v61 = vsel %vm1205_vm3, %v3346_v60, 0.0 }
 0x4ed   : > { %1213 = vadd.xlane.f32.xlu0 %v1212_v61 }
 0x503   : > { %1381 = vrot.lane.b32.xlu0 %v1155_v36, %s3616_s16 }
 0x57a   : > { %v1214_v1 = vpop.xlane.xlu0 %1213 }
 0x57b   : > { %3347 = vrcp.f32 %v1214_v1 }
 0x57e   : > { %v1382_v3 = vpop.permute.xlu0 %1381 }
 0x57f   : > { %v1387_v4 = vsel %vm1157_vm1, %v1382_v3, 0 }
 0x580   : > { %3005 = vmatpush3.bf16.xpose.msra.mxu0 %v1387_v4 }
 0x581   : > { %3016 = vmatprep.subr.bf16.mxu0 %v3613_v6 }
 0x585   : > { %v3348_v7 = vpop.eup %3347 }
 0x586   : > { %v1216_v8 = vmul.f32 %v3348_v7, %v3346_v60 }
 0x587   : > { %3007 = vmatmul.mubr.msk.bf16.vlgmr.msra.gmra.mrb[8].mxu0 %vm1157_vm1, %v1380_v2 }
 0x588   : > { %3017 = vmatpush3.bf16.xpose.msra.mxu0 %v1498_v9  ;;  %v1217_v10 = vpack.c.bf16 %v1216_v8, %v1216_v8  ;;  %3018 = vmatprep.mubr.msk.bf16.mxu0 %vm3614_vm0, %v3613_v6 }
 0x589   : > { %3028 = vmatprep.subr.bf16.mxu0 %v3613_v6 }
 0x58a   : > { %2989 = vmatmul.mubr.msk.bf16.vlgmr.msra.gmra.mrb[12].mxu1 %vm1205_vm3, %v1217_v10 }
 0x58b   : > { %2993 = vmatpush3.bf16.xpose.msra.mxu1 %v1275_v11  ;;  %2994 = vmatprep.mubr.msk.bf16.mxu1 %vm3614_vm0, %v3613_v6 }
 0x58c   : > { %2998 = vmatprep.subr.bf16.mxu1 %v3613_v6 }
 0x58f   : > { %3019 = vmatmul.mubr.msk.bf16.vlgmr.msra.gmra.mrb[12].mxu0 %vm1157_vm1, %v1491_v12 }
 0x590   : > { %3044 = vmatprep.mubr.msk.bf16.mxu0 %vm3614_vm0, %v3613_v6 }
 0x592   : > { %2995 = vmatmul.mubr.msk.bf16.vlgmr.msra.gmra.mrb[16].mxu1 %vm1157_vm1, %v1267_v63 }
 0x593   : > { %3000 = vmatprep.mubr.msk.bf16.mxu1 %vm3614_vm0, %v3613_v6 }
 0x65a   : > { %v1423_v13 = vpop.f32.mrb[8].mxu0 }
 0x65b   : > { %v1429_v15 = vmul.f32 0.17677669, %v1423_v13  ;;  %v3008_v16 = vpop.f32.mrb[9].mxu0 }
 0x65c   : > { %v1426_v17 = vpop.f32.mrb[10].mxu0  ;;  %v3297_v16 = vld [vmem:[#allocation7] sm:$0xff]  }
 0x65d   : > { %v4025_v18 = vpop.f32.mrb[12].mxu1  ;;  %v3009_v19 = vpop.f32.mrb[11].mxu0  ;;  %v1430_v21 = vsel %vm1205_vm3, %v1429_v15, -inf  ;;  %3029 = vmatpush3.bf16.msra.mxu0 %v3297_v16  ;;  %v3298_v17 = vld [vmem:[#allocation7 + $0x8] sm:$0xff]   ;;  %v3330_v16 = vld [vmem:[#allocation10 + $0x70] ss:$8 sps:$4 sm:$0xff]  }
 0x65e   : > { %v2990_v23 = vpop.f32.mrb[13].mxu1  ;;  %1431 = vmax.xlane.f32.xlu0 %v1430_v21  ;;  %3030 = vmatprep.subr.bf16.mxu0 %v3613_v6  ;;  %v3299_v19 = vld [vmem:[#allocation7 + $0x10] sm:$0xff]   ;;  %v3300_v21 = vld [vmem:[#allocation7 + $0x18] sm:$0xff]  }
 0x65f   : > { %v1262_v24 = vpop.f32.mrb[14].mxu1  ;;  %v3301_v23 = vld [vmem:[#allocation7 + $0x20] sm:$0xff]  }
 0x660   : > { %v2991_v25 = vpop.f32.mrb[15].mxu1  ;;  %v3302_v24 = vld [vmem:[#allocation7 + $0x28] sm:$0xff]  }
 0x661   : > { %3031 = vmatpush3.bf16.msra.mxu0 %v3298_v17  ;;  %v3303_v25 = vld [vmem:[#allocation7 + $0x30] sm:$0xff]   ;;  %v551_v17 = vld [vmem:[%s543_s4] sm:$0xff] }
 0x662   : > { %v1534_v28 = vpop.f32.mrb[12].mxu0  ;;  %3032 = vmatprep.subr.bf16.mxu0 %v3613_v6 }
 0x663   : > { %v3020_v29 = vpop.f32.mrb[13].mxu0  ;;  %v1540_v36 = vmul.f32 0.17677669, %v1534_v28 }
 0x664   : > { %v1537_v30 = vpop.f32.mrb[14].mxu0 }
 0x665   : > { %v1311_v31 = vpop.f32.mrb[16].mxu1  ;;  %v3021_v32 = vpop.f32.mrb[15].mxu0  ;;  %v1541_v40 = vsel %vm1205_vm3, %v1540_v36, -inf  ;;  %3033 = vmatpush3.bf16.msra.mxu0 %v3299_v19  ;;  %v552_v19 = vld [vmem:[%s543_s4 + $0x8] sm:$0xff] }
 0x666   : > { %v1317_v33 = vmul.f32 0.17677669, %v1311_v31  ;;  %v2996_v34 = vpop.f32.mrb[17].mxu1  ;;  %3034 = vmatprep.subr.bf16.mxu0 %v3613_v6  ;;  %v3304_v32 = vld [vmem:[#allocation7 + $0x38] sm:$0xff]  }
 0x667   : > { %v1314_v35 = vpop.f32.mrb[18].mxu1 }
 0x668   : > { %v2997_v37 = vpop.f32.mrb[19].mxu1  ;;  %v1318_v38 = vsel %vm1205_vm3, %v1317_v33, -inf }
 0x669   : > { %1319 = vmax.xlane.f32.xlu1 %v1318_v38  ;;  %3035 = vmatpush3.bf16.msra.mxu0 %v3300_v21  ;;  %v3333_v21 = vld [vmem:[#allocation9 + $0x20] sm:$0xff]  }
 0x66a   : > { %3036 = vmatprep.subr.bf16.mxu0 %v3613_v6 }
 0x66d   : > { %1542 = vmax.xlane.f32.xlu1 %v1541_v40  ;;  %3037 = vmatpush3.bf16.msra.mxu0 %v3301_v23  ;;  %v1863_v23 = vpack.c.bf16 %v552_v19, %v551_v17 }
 0x66e   : > { %3038 = vmatprep.subr.bf16.mxu0 %v3613_v6 }
 0x671   : > { %3039 = vmatpush3.bf16.msra.mxu0 %v3302_v24  ;;  %v3334_v24 = vld [vmem:[#allocation9 + $0x28] sm:$0xff]  }
 0x672   : > { %3040 = vmatprep.subr.bf16.mxu0 %v3613_v6 }
 0x675   : > { %3041 = vmatpush3.bf16.msra.mxu0 %v3303_v25  ;;  %v3335_v25 = vld [vmem:[#allocation9 + $0x30] sm:$0xff]  }
 0x676   : > { %3042 = vmatprep.subr.bf16.mxu0 %v3613_v6 }
 0x679   : > { %3043 = vmatpush3.bf16.msra.mxu0 %v3304_v32 }
 0x6eb   : > { %v1432_v41 = vpop.xlane.xlu0 %1431 }
 0x6ec   : > { %v1433_v42 = vsub.f32 %v1429_v15, %v1432_v41 }
 0x6ee   : > { %v1434_v43 = vmul.f32 1.442695, %v1433_v42 }
 0x6f0   : > { %3349 = vpow2.f32 %v1434_v43 }
 0x6f6   : > { %v1320_v44 = vpop.xlane.xlu1 %1319 }
 0x6f7   : > { %v1321_v46 = vsub.f32 %v1317_v33, %v1320_v44 }
 0x6f9   : > { %v1322_v54 = vmul.f32 1.442695, %v1321_v46 }
 0x6fa   : > { %v3350_v47 = vpop.eup %3349  ;;  %v1543_v51 = vpop.xlane.xlu1 %1542 }
 0x6fb   : > { %v1544_v52 = vsub.f32 %v1540_v36, %v1543_v51  ;;  %v1436_v53 = vsel %vm1205_vm3, %v3350_v47, 0.0 }
 0x6fc   : > { %1437 = vadd.xlane.f32.xlu0 %v1436_v53  ;;  %v3305_v53 = vld [vmem:[#allocation10] ss:$8 sps:$4 sm:$0xff]  }
 0x6fd   : > { %v1545_v55 = vmul.f32 1.442695, %v1544_v52 }
 0x6ff   : > { %3351 = vpow2.f32 %v1545_v55  ;;  %v3310_v55 = vld [vmem:[#allocation10 + $0x14] ss:$8 sps:$4 sm:$0xff]  }
 0x700   : > { %3353 = vpow2.f32 %v1322_v54  ;;  %v3307_v54 = vld [vmem:[#allocation10 + $0x4] ss:$8 sps:$4 sm:$0xff]  }
 0x701   : > { %1944 = vmatprep.subr.bf16.mxu0 %v3307_v54 }
 0x709   : > { %v3352_v56 = vpop.eup %3351 }
 0x70a   : > { %v1547_v57 = vsel %vm1205_vm3, %v3352_v56, 0.0  ;;  %v3354_v58 = vpop.eup %3353 }
 0x70b   : > { %1548 = vadd.xlane.f32.xlu1 %v1547_v57  ;;  %v1324_v59 = vsel %vm1205_vm3, %v3354_v58, 0.0  ;;  %v3308_v57 = vld [vmem:[#allocation10 + $0x10] ss:$8 sps:$4 sm:$0xff]  }
 0x70f   : > { %1325 = vadd.xlane.f32.xlu1 %v1324_v59  ;;  %v3316_v59 = vld [vmem:[#allocation10 + $0x34] ss:$8 sps:$4 sm:$0xff]  }
 0x712   : > { %1331 = vrot.lane.b32.xlu0 %v3999_v45, %s3615_s14 }
 0x720   : > { %1442 = vrot.lane.b32.xlu1 %v3999_v45, %s3616_s16 }
 0x724   : > { %1553 = vrot.lane.b32.xlu1 %v3999_v45, %s3617_s19 }
 0x789   : > { %v1438_v60 = vpop.xlane.xlu0 %1437 }
 0x78d   : > { %v1332_v61 = vpop.permute.xlu0 %1331 }
 0x78e   : > { %v1337_v62 = vsel %vm1221_vm2, %v1332_v61, 0 }
 0x78f   : > { %2999 = vmatpush3.bf16.msra.mxu1 %v1337_v62 }
 0x790   : > { %3010 = vmatprep.subr.bf16.mxu1 %v3613_v6 }
 0x798   : > { %v1549_v63 = vpop.xlane.xlu1 %1548 }
 0x79c   : > { %v1326_v1 = vpop.xlane.xlu1 %1325 }
 0x79d   : > { %3355 = vrcp.f32 %v1326_v1 }
 0x79e   : > { %3357 = vrcp.f32 %v1438_v60  ;;  %v3314_v60 = vld [vmem:[#allocation10 + $0x30] ss:$8 sps:$4 sm:$0xff]  }
 0x79f   : > { %3359 = vrcp.f32 %v1549_v63 }
 0x7a0   : > { %v1443_v4 = vpop.permute.xlu1 %1442 }
 0x7a1   : > { %v1448_v8 = vsel %vm1221_vm2, %v1443_v4, 0 }
 0x7a4   : > { %v1554_v9 = vpop.permute.xlu1 %1553 }
 0x7a5   : > { %v1559_v12 = vsel %vm1221_vm2, %v1554_v9, 0  ;;  %v3324_v9 = vld [vmem:[#allocation10 + $0x54] ss:$8 sps:$4 sm:$0xff]  }
 0x7a7   : > { %v3356_v2 = vpop.eup %3355 }
 0x7a8   : > { %v1328_v3 = vmul.f32 %v3356_v2, %v3354_v58  ;;  %v3358_v7 = vpop.eup %3357  ;;  %v3313_v58 = vld [vmem:[#allocation10 + $0x24] ss:$8 sps:$4 sm:$0xff]  }
 0x7a9   : > { %v1440_v45 = vmul.f32 %v3358_v7, %v3350_v47  ;;  %v3360_v11 = vpop.eup %3359  ;;  %v3320_v7 = vld [vmem:[#allocation10 + $0x44] ss:$8 sps:$4 sm:$0xff]  }
 0x7aa   : > { %v1329_v5 = vpack.c.bf16 %v1328_v3, %v1328_v3  ;;  %v1551_v13 = vmul.f32 %v3360_v11, %v3352_v56  ;;  %v3317_v56 = vld [vmem:[#allocation9] sm:$0xff]  }
 0x7ab   : > { %v1441_v10 = vpack.c.bf16 %v1440_v45, %v1440_v45  ;;  %v3321_v45 = vld [vmem:[#allocation9 + $0x8] sm:$0xff]  }
 0x7ac   : > { %3001 = vmatmul.mubr.msk.bf16.vlgmr.msra.gmra.mrb[20].mxu1 %vm1205_vm3, %v1329_v5  ;;  %v1552_v15 = vpack.c.bf16 %v1551_v13, %v1551_v13  ;;  %v3328_v11 = vld [vmem:[#allocation10 + $0x64] ss:$8 sps:$4 sm:$0xff]   ;;  %v3329_v13 = vld [vmem:[#allocation9 + $0x18] sm:$0xff]  }
 0x7ad   : > { %3011 = vmatpush3.bf16.msra.mxu1 %v1448_v8  ;;  %3012 = vmatprep.mubr.msk.bf16.mxu1 %vm3614_vm0, %v3613_v6  ;;  %v3318_v8 = vld [vmem:[#allocation10 + $0x40] ss:$8 sps:$4 sm:$0xff]  }
 0x7ae   : > { %3022 = vmatprep.subr.bf16.mxu1 %v3613_v6 }
 0x7b4   : > { %3013 = vmatmul.mubr.msk.bf16.vlgmr.msra.gmra.mrb[24].mxu1 %vm1205_vm3, %v1441_v10  ;;  %v3325_v10 = vld [vmem:[#allocation9 + $0x10] sm:$0xff]  }
 0x7b5   : > { %3023 = vmatpush3.bf16.msra.mxu1 %v1559_v12  ;;  %3024 = vmatprep.mubr.msk.bf16.mxu1 %vm3614_vm0, %v3613_v6  ;;  %v3326_v12 = vld [vmem:[#allocation10 + $0x60] ss:$8 sps:$4 sm:$0xff]  }
 0x7b6   : > { %3048 = vmatprep.subr.bf16.mxu1 %v3613_v6 }
 0x7bc   : > { %3025 = vmatmul.mubr.msk.bf16.vlgmr.msra.gmra.mrb[28].mxu1 %vm1205_vm3, %v1552_v15  ;;  %v3332_v15 = vld [vmem:[#allocation10 + $0x74] ss:$8 sps:$4 sm:$0xff]  }
 0x7bd   : > { %3064 = vmatprep.mubr.msk.bf16.mxu1 %vm3614_vm0, %v3613_v6  ;;  %3049 = vmatpush3.bf16.msra.mxu1 %v3317_v56 }
 0x7be   : > { %3050 = vmatprep.subr.bf16.mxu1 %v3613_v6 }
 0x7c1   : > { %3051 = vmatpush3.bf16.msra.mxu1 %v3321_v45 }
 0x7c2   : > { %3052 = vmatprep.subr.bf16.mxu1 %v3613_v6 }
 0x7c5   : > { %3053 = vmatpush3.bf16.msra.mxu1 %v3325_v10 }
 0x7c6   : > { %3054 = vmatprep.subr.bf16.mxu1 %v3613_v6 }
 0x7c9   : > { %3055 = vmatpush3.bf16.msra.mxu1 %v3329_v13 }
 0x7ca   : > { %3056 = vmatprep.subr.bf16.mxu1 %v3613_v6 }
 0x7cd   : > { %3057 = vmatpush3.bf16.msra.mxu1 %v3333_v21 }
 0x7ce   : > { %3058 = vmatprep.subr.bf16.mxu1 %v3613_v6 }
 0x7d1   : > { %3059 = vmatpush3.bf16.msra.mxu1 %v3334_v24 }
 0x7d2   : > { %3060 = vmatprep.subr.bf16.mxu1 %v3613_v6 }
 0x7d5   : > { %3061 = vmatpush3.bf16.msra.mxu1 %v3335_v25 }
 0x7d6   : > { %3062 = vmatprep.subr.bf16.mxu1 %v3613_v6 }
 0x87f   : > { %v1373_v28 = vpop.f32.mrb[20].mxu1 }
 0x880   : > { %1602 = vrot.lane.b32.xlu0 %v1373_v28, %s3617_s19  ;;  %v3002_v29 = vpop.f32.mrb[21].mxu1  ;;  %v3336_v28 = vld [vmem:[#allocation9 + $0x38] sm:$0xff]  }
 0x881   : > { %v1376_v30 = vpop.f32.mrb[22].mxu1  ;;  %3063 = vmatpush3.bf16.msra.mxu1 %v3336_v28 }
 0x882   : > { %v3003_v31 = vpop.f32.mrb[23].mxu1  ;;  %3068 = vmatprep.subr.bf16.mxu1 %v3613_v6 }
 0x887   : > { %v1484_v33 = vpop.f32.mrb[24].mxu1 }
 0x888   : > { %1606 = vrot.lane.b32.xlu1 %v1484_v33, %s3616_s16  ;;  %v3014_v34 = vpop.f32.mrb[25].mxu1 }
 0x889   : > { %v1487_v35 = vpop.f32.mrb[26].mxu1 }
 0x88a   : > { %v3015_v36 = vpop.f32.mrb[27].mxu1 }
 0x88b   : > { %v1729_v36 = vsub.s32 7, %v3907_v48 }
 0x88f   : > { %v1595_v37 = vpop.f32.mrb[28].mxu1 }
 0x890   : > { %1610 = vrot.lane.b32.xlu0 %v1595_v37, %s3615_s14  ;;  %v3026_v38 = vpop.f32.mrb[29].mxu1  ;;  %v4098_v37 = vld [vmem:[%s4218_s11 + $0x8] sm:$0x7f] }
 0x891   : > { %v1598_v40 = vpop.f32.mrb[30].mxu1 }
 0x892   : > { %v3027_v41 = vpop.f32.mrb[31].mxu1  ;;  %v1730_v40 = vrot.slane %v3912_v49, %v1729_v36 }
 0x8f2   : > { %v1603_v42 = vpop.permute.xlu0 %1602 }
 0x8f3   : > { %v1613_v44 = vsel %vm1157_vm1, %v4025_v18, %v1603_v42  ;;  %v3311_v18 = vld [vmem:[#allocation10 + $0x20] ss:$8 sps:$4 sm:$0xff]   ;;  %v1735_v42 = vrot.slane %v4098_v37, %v3915_v50  ;;  %v1996_v50 = vrot.slane %v4098_v37, %v1021_v27 }
 0x8fa   : > { %v1607_v43 = vpop.permute.xlu1 %1606 }
 0x8fb   : > { %v1615_v46 = vsel %vm1614_vm4, %v1613_v44, %v1607_v43 }
 0x902   : > { %v1611_v47 = vpop.permute.xlu0 %1610 }
 0x903   : > { %v1617_v51 = vsel %vm1616_vm5, %v1615_v46, %v1611_v47 }
 0x904   : > { %v1618_v52 = vpack.c.bf16 %v1617_v51, %v1617_v51 }
 0x906   : > { %3045 = vmatmul.mubr.bf16.vlgmr.msra.gmra.mrb[16].mxu0 %v1618_v52 }
 0x907   : > { %1976 = vmatprep.mubr.bf16.mxu0 %v3612_v0  ;;  %1945 = vmatpush1.bf16.msra.mxu0 %v3305_v53  ;;  %v1710_v0 = vsub.s32 6, %v3907_v48 }
 0x908   : > { %1946 = vmatprep.subr.bf16.mxu0 %v3310_v55 }
 0x909   : > { %v1711_v61 = vrot.slane %v3912_v49, %v1710_v0  ;;  %v1990_v49 = vrot.slane %v4098_v37, %v742_v14  ;;  %v1757_v14 = vsub.s32 1, %v3907_v48 }
 0x90b   : > { %1947 = vmatpush1.bf16.msra.mxu0 %v3308_v57  ;;  %v1758_v27 = vrot.slane %v4098_v37, %v1757_v14 }
 0x90c   : > { %1948 = vmatprep.subr.bf16.mxu0 %v3313_v58 }
 0x90f   : > { %1949 = vmatpush1.bf16.msra.mxu0 %v3311_v18 }
 0x910   : > { %1950 = vmatprep.subr.bf16.mxu0 %v3316_v59 }
 0x913   : > { %1951 = vmatpush1.bf16.msra.mxu0 %v3314_v60 }
 0x914   : > { %1952 = vmatprep.subr.bf16.mxu0 %v3320_v7 }
 0x917   : > { %1953 = vmatpush1.bf16.msra.mxu0 %v3318_v8 }
 0x918   : > { %1954 = vmatprep.subr.bf16.mxu0 %v3324_v9 }
 0x9d9   : > { %v1701_v62 = vpop.f32.mrb[16].mxu0 }
 0x9da   : > { %v1707_v63 = vadd.f32 %v1701_v62, %v3963_v20  ;;  %v3046_v1 = vpop.f32.mrb[17].mxu0  ;;  %v3322_v20 = vld [vmem:[#allocation10 + $0x50] ss:$8 sps:$4 sm:$0xff]  }
 0x9db   : > { %v1704_v2 = vpop.f32.mrb[18].mxu0  ;;  %1955 = vmatpush1.bf16.msra.mxu0 %v3322_v20 }
 0x9dc   : > { %v4075_v3 = vadd.f32 %v1711_v61, %v1707_v63  ;;  %v3047_v4 = vpop.f32.mrb[19].mxu0  ;;  %1956 = vmatprep.subr.bf16.mxu0 %v3328_v11 }
 0x9de   : > { %1713 = vadd.xlane.f32.xlu1 %v4075_v3  ;;  %v1717_v5 = vmul.f32 %v4075_v3, %v4075_v3 }
 0x9df   : > { %1957 = vmatpush1.bf16.msra.mxu0 %v3326_v12 }
 0x9e0   : > { %1718 = vadd.xlane.f32.xlu0 %v1717_v5  ;;  %1958 = vmatprep.subr.bf16.mxu0 %v3332_v15 }
 0x9e3   : > { %1959 = vmatpush1.bf16.msra.mxu0 %v3330_v16 }
 0x9e4   : > { %3092 = vmatprep.subr.bf16.mxu0 %v3613_v6 }
 0x9e6   : > { %1977 = vmatmul.mubr.bf16.vlgmr.msra.gmra.mrb[20].mxu0 %v1863_v23 }
 0x9e7   : > { %3094 = vmatprep.mubr.msk.bf16.mxu0 %vm3614_vm0, %v3613_v6 }
 0xa6b   : > { %v1714_v29 = vpop.xlane.xlu1 %1713 }
 0xa6c   : > { %v1716_v30 = vmul.f32 0.0078125, %v1714_v29 }
 0xa6d   : > { %v1719_v31 = vpop.xlane.xlu0 %1718 }
 0xa6e   : > { %v1721_v32 = vmul.f32 %v1716_v30, %v1716_v30  ;;  %v1720_v33 = vmul.f32 0.0078125, %v1719_v31  ;;  %v1723_v38 = vsub.f32 %v4075_v3, %v1716_v30 }
 0xa70   : > { %v1722_v34 = vsub.f32 %v1720_v33, %v1721_v32 }
 0xa72   : > { %v1724_v35 = vadd.f32 1e-05, %v1722_v34 }
 0xa74   : > { %3361 = vrsqrt.f32 %v1724_v35 }
 0xa7e   : > { %v3362_v41 = vpop.eup %3361 }
 0xa7f   : > { %v1726_v43 = vmul.f32 %v3362_v41, %v1723_v38 }
 0xa81   : > { %v1731_v44 = vmul.f32 %v1730_v40, %v1726_v43 }
 0xa83   : > { %v4104_v46 = vadd.f32 %v1735_v42, %v1731_v44 }
 0xa85   : > { %v1737_v47 = vadd.f32 %v4104_v46, %v3965_v22 }
 0xa87   : > { %v1754_v51 = vpack.c.bf16 %v1737_v47, %v1737_v47 }
 0xa89   : > { %3065 = vmatmul.mubr.bf16.vlgmr.msra.gmra.mrb[32].mxu1 %v1754_v51 }
 0xa8a   : > { %3070 = vmatprep.mubr.msk.bf16.mxu1 %vm3614_vm0, %v3613_v6 }
 0xab9   : > { %v1978_v52 = vpop.f32.mrb[20].mxu0 }
 0xaba   : > { %v1991_v53 = vadd.f32 %v1990_v49, %v1978_v52  ;;  %v1980_v54 = vpop.f32.mrb[21].mxu0 }
 0xabb   : > { %v1997_v55 = vadd.f32 %v1996_v50, %v1980_v54  ;;  %v1982_v56 = vpop.f32.mrb[22].mxu0 }
 0xabc   : > { %v1992_v57 = vadd.f32 %v1990_v49, %v1982_v56  ;;  %v1984_v22 = vpop.f32.mrb[23].mxu0 }
 0xabd   : > { %v1998_v58 = vadd.f32 %v1996_v50, %v1984_v22 }
 0xabe   : > { %v2016_v18 = vpack.c.bf16 %v1992_v57, %v1991_v53 }
 0xabf   : > { %v4116_v59 = vpack.c.bf16 %v1998_v58, %v1997_v55 }
 0xac0   : > { %v2022_v60 = vsel %vm1157_vm1, %v2016_v18, 0 }
 0xac1   : > { %3069 = vmatpush3.bf16.xpose.msra.mxu1 %v2022_v60 }
 0xac2   : > { %3074 = vmatprep.subr.bf16.mxu1 %v3613_v6 }
 0xb5c   : > { %v1841_v61 = vpop.f32.mrb[32].mxu1 }
 0xb5d   : > { %v1842_v62 = vadd.f32 %v1841_v61, %v1758_v27  ;;  %v3066_v63 = vpop.f32.mrb[33].mxu1 }
 0xb5e   : > { %v1844_v1 = vpop.f32.mrb[34].mxu1 }
 0xb5f   : > { %v2015_v2 = vpack.c.bf16 %v1842_v62, %v1842_v62  ;;  %v3067_v3 = vpop.f32.mrb[35].mxu1 }
 0xb61   : > { %3071 = vmatmul.mubr.msk.bf16.vlgmr.msra.gmra.mrb[36].mxu1 %vm1157_vm1, %v2015_v2 }
 0xb62   : > { %3075 = vmatpush3.bf16.msra.mxu1 %v4116_v59  ;;  %3076 = vmatprep.mubr.msk.bf16.mxu1 %vm3614_vm0, %v3613_v6 }
 0xb63   : > { %3080 = vmatprep.subr.bf16.mxu1 %v3613_v6 }
 0xc34   : > { %v2058_v4 = vpop.f32.mrb[36].mxu1 }
 0xc35   : > { %v2064_v5 = vmul.f32 0.17677669, %v2058_v4  ;;  %v3072_v7 = vpop.f32.mrb[37].mxu1 }
 0xc36   : > { %v2061_v8 = vpop.f32.mrb[38].mxu1 }
 0xc37   : > { %v3073_v45 = vpop.f32.mrb[39].mxu1  ;;  %v2066_v9 = vsel %vm2065_vm6, %v2064_v5, -inf }
 0xc38   : > { %2067 = vmax.xlane.f32.xlu0 %v2066_v9 }
 0xc4e   : > { %2125 = vrot.lane.b32.xlu0 %v2016_v18, %s3615_s14 }
 0xc52   : > { %2233 = vrot.lane.b32.xlu0 %v2015_v2, %s3616_s16 }
 0xc56   : > { %2342 = vrot.lane.b32.xlu0 %v2015_v2, %s3617_s19 }
 0xcc5   : > { %v2068_v20 = vpop.xlane.xlu0 %2067 }
 0xcc6   : > { %v2069_v10 = vsub.f32 %v2064_v5, %v2068_v20 }
 0xcc8   : > { %v2070_v11 = vmul.f32 1.442695, %v2069_v10 }
 0xcc9   : > { %v2126_v21 = vpop.permute.xlu0 %2125 }
 0xcca   : > { %3363 = vpow2.f32 %v2070_v11  ;;  %v2131_v29 = vsel %vm1157_vm1, %v2126_v21, 0 }
 0xccd   : > { %v2234_v30 = vpop.permute.xlu0 %2233 }
 0xcd1   : > { %v2343_v32 = vpop.permute.xlu0 %2342 }
 0xcd4   : > { %v3364_v12 = vpop.eup %3363 }
 0xcd5   : > { %v2072_v13 = vsel %vm2065_vm6, %v3364_v12, 0.0 }
 0xcd6   : > { %2073 = vadd.xlane.f32.xlu1 %v2072_v13 }
 0xce7   : > { %2122 = vrot.lane.b32.xlu1 %v2015_v2, %s3615_s14 }
 0xceb   : > { %2235 = vrot.lane.b32.xlu1 %v2016_v18, %s3616_s16 }
 0xcef   : > { %2344 = vrot.lane.b32.xlu1 %v2016_v18, %s3617_s19 }
 0xd63   : > { %v2074_v15 = vpop.xlane.xlu1 %2073 }
 0xd64   : > { %3365 = vrcp.f32 %v2074_v15 }
 0xd67   : > { %v2123_v16 = vpop.permute.xlu1 %2122 }
 0xd6b   : > { %v2236_v17 = vpop.permute.xlu1 %2235 }
 0xd6c   : > { %v2241_v19 = vsel %vm1157_vm1, %v2236_v17, 0 }
 0xd6d   : > { %3093 = vmatpush3.bf16.xpose.msra.mxu0 %v2241_v19 }
 0xd6e   : > { %v3366_v23 = vpop.eup %3365  ;;  %3104 = vmatprep.subr.bf16.mxu0 %v3613_v6 }
 0xd6f   : > { %v2076_v24 = vmul.f32 %v3366_v23, %v3364_v12  ;;  %v2345_v25 = vpop.permute.xlu1 %2344 }
 0xd70   : > { %v2350_v31 = vsel %vm1157_vm1, %v2345_v25, 0 }
 0xd71   : > { %v2077_v28 = vpack.c.bf16 %v2076_v24, %v2076_v24 }
 0xd73   : > { %3077 = vmatmul.mubr.msk.bf16.vlgmr.msra.gmra.mrb[40].mxu1 %vm2065_vm6, %v2077_v28  ;;  %v3337_v28 = vld [vmem:[#allocation12] sm:$0xff]  }
 0xd74   : > { %3081 = vmatpush3.bf16.xpose.msra.mxu1 %v2131_v29  ;;  %3095 = vmatmul.mubr.msk.bf16.vlgmr.msra.gmra.mrb[24].mxu0 %vm1157_vm1, %v2234_v30  ;;  %v3338_v29 = vld [vmem:[#allocation12 + $0x8] sm:$0xff]   ;;  %v3339_v30 = vld [vmem:[#allocation12 + $0x10] sm:$0xff]  }
 0xd75   : > { %3105 = vmatpush3.bf16.xpose.msra.mxu0 %v2350_v31  ;;  %3082 = vmatprep.mubr.msk.bf16.mxu1 %vm3614_vm0, %v3613_v6  ;;  %v3340_v31 = vld [vmem:[#allocation12 + $0x18] sm:$0xff]  }
 0xd76   : > { %3106 = vmatprep.mubr.msk.bf16.mxu0 %vm3614_vm0, %v3613_v6  ;;  %3086 = vmatprep.subr.bf16.mxu1 %v3613_v6 }
 0xd77   : > { %3116 = vmatprep.subr.bf16.mxu0 %v3613_v6 }
 0xd7b   : > { %3083 = vmatmul.mubr.msk.bf16.vlgmr.msra.gmra.mrb[44].mxu1 %vm1157_vm1, %v2123_v16 }
 0xd7c   : > { %3107 = vmatmul.mubr.msk.bf16.vlgmr.msra.gmra.mrb[28].mxu0 %vm1157_vm1, %v2343_v32  ;;  %3088 = vmatprep.mubr.msk.bf16.mxu1 %vm3614_vm0, %v3613_v6  ;;  %v3341_v32 = vld [vmem:[#allocation12 + $0x20] sm:$0xff]  }
 0xd7d   : > { %3132 = vmatprep.mubr.msk.bf16.mxu0 %vm3614_vm0, %v3613_v6  ;;  %3117 = vmatpush3.bf16.msra.mxu0 %v3337_v28 }
 0xd7e   : > { %3118 = vmatprep.subr.bf16.mxu0 %v3613_v6 }
 0xd81   : > { %3119 = vmatpush3.bf16.msra.mxu0 %v3338_v29 }
 0xd82   : > { %3120 = vmatprep.subr.bf16.mxu0 %v3613_v6 }
 0xd85   : > { %3121 = vmatpush3.bf16.msra.mxu0 %v3339_v30 }
 0xd86   : > { %3122 = vmatprep.subr.bf16.mxu0 %v3613_v6 }
 0xd89   : > { %3123 = vmatpush3.bf16.msra.mxu0 %v3340_v31 }
 0xd8a   : > { %3124 = vmatprep.subr.bf16.mxu0 %v3613_v6 }
 0xd8d   : > { %3125 = vmatpush3.bf16.msra.mxu0 %v3341_v32 }
 0xd8e   : > { %3126 = vmatprep.subr.bf16.mxu0 %v3613_v6 }
 0xe46   : > { %v4153_v33 = vpop.f32.mrb[40].mxu1 }
 0xe47   : > { %v3078_v34 = vpop.f32.mrb[41].mxu1  ;;  %v2277_v35 = vpop.f32.mrb[24].mxu0 }
 0xe48   : > { %v2283_v36 = vmul.f32 0.17677669, %v2277_v35  ;;  %v2118_v38 = vpop.f32.mrb[42].mxu1  ;;  %v3096_v40 = vpop.f32.mrb[25].mxu0  ;;  %v3342_v34 = vld [vmem:[#allocation12 + $0x28] sm:$0xff]   ;;  %v3343_v35 = vld [vmem:[#allocation12 + $0x30] sm:$0xff]  }
 0xe49   : > { %v3079_v41 = vpop.f32.mrb[43].mxu1  ;;  %v2280_v42 = vpop.f32.mrb[26].mxu0  ;;  %3127 = vmatpush3.bf16.msra.mxu0 %v3342_v34 }
 0xe4a   : > { %v3097_v43 = vpop.f32.mrb[27].mxu0  ;;  %v2284_v44 = vsel %vm2065_vm6, %v2283_v36, -inf  ;;  %3128 = vmatprep.subr.bf16.mxu0 %v3613_v6  ;;  %v3344_v42 = vld [vmem:[#allocation12 + $0x38] sm:$0xff]  }
 0xe4b   : > { %2285 = vmax.xlane.f32.xlu0 %v2284_v44 }
 0xe4d   : > { %3129 = vmatpush3.bf16.msra.mxu0 %v3343_v35 }
 0xe4e   : > { %v2167_v47 = vpop.f32.mrb[44].mxu1  ;;  %3130 = vmatprep.subr.bf16.mxu0 %v3613_v6 }
 0xe4f   : > { %v2173_v51 = vmul.f32 0.17677669, %v2167_v47  ;;  %v3084_v49 = vpop.f32.mrb[45].mxu1  ;;  %v2386_v50 = vpop.f32.mrb[28].mxu0 }
 0xe50   : > { %v2392_v52 = vmul.f32 0.17677669, %v2386_v50  ;;  %v2170_v53 = vpop.f32.mrb[46].mxu1  ;;  %v3108_v54 = vpop.f32.mrb[29].mxu0 }
 0xe51   : > { %v3085_v55 = vpop.f32.mrb[47].mxu1  ;;  %v2389_v56 = vpop.f32.mrb[30].mxu0  ;;  %v2174_v57 = vsel %vm2065_vm6, %v2173_v51, -inf  ;;  %3131 = vmatpush3.bf16.msra.mxu0 %v3344_v42 }
 0xe52   : > { %v3109_v22 = vpop.f32.mrb[31].mxu0  ;;  %2175 = vmax.xlane.f32.xlu1 %v2174_v57  ;;  %v2393_v58 = vsel %vm2065_vm6, %v2392_v52, -inf }
 0xe53   : > { %2394 = vmax.xlane.f32.xlu0 %v2393_v58 }
 0xed8   : > { %v2286_v18 = vpop.xlane.xlu0 %2285 }
 0xed9   : > { %v2287_v60 = vsub.f32 %v2283_v36, %v2286_v18  ;;  %v2559_v18 = vrot.slane %v4098_v37, %v1026_v26  ;;  %v2577_v26 = vrot.slane %v4098_v37, %v1048_v39 }
 0xedb   : > { %v2288_v14 = vmul.f32 1.442695, %v2287_v60 }
 0xedd   : > { %3367 = vpow2.f32 %v2288_v14 }
 0xedf   : > { %v2176_v27 = vpop.xlane.xlu1 %2175 }
 0xee0   : > { %v2177_v61 = vsub.f32 %v2173_v51, %v2176_v27  ;;  %v2395_v62 = vpop.xlane.xlu0 %2394 }
 0xee1   : > { %v2396_v63 = vsub.f32 %v2392_v52, %v2395_v62 }
 0xee2   : > { %v2178_v1 = vmul.f32 1.442695, %v2177_v61 }
 0xee3   : > { %v2397_v2 = vmul.f32 1.442695, %v2396_v63 }
 0xee5   : > { %3369 = vpow2.f32 %v2397_v2 }
 0xee6   : > { %3371 = vpow2.f32 %v2178_v1 }
 0xee7   : > { %v3368_v3 = vpop.eup %3367 }
 0xee8   : > { %v2290_v4 = vsel %vm2065_vm6, %v3368_v3, 0.0 }
 0xee9   : > { %2291 = vadd.xlane.f32.xlu0 %v2290_v4 }
 0xeef   : > { %v3370_v5 = vpop.eup %3369 }
 0xef0   : > { %v2399_v7 = vsel %vm2065_vm6, %v3370_v5, 0.0  ;;  %v3372_v8 = vpop.eup %3371 }
 0xef1   : > { %2400 = vadd.xlane.f32.xlu1 %v2399_v7  ;;  %v2180_v45 = vsel %vm2065_vm6, %v3372_v8, 0.0 }
 0xef5   : > { %2181 = vadd.xlane.f32.xlu1 %v2180_v45 }
 0xeff   : > { %2187 = vrot.lane.b32.xlu0 %v4116_v59, %s3615_s14 }
 0xf06   : > { %2296 = vrot.lane.b32.xlu1 %v4116_v59, %s3616_s16 }
 0xf0a   : > { %2405 = vrot.lane.b32.xlu1 %v4116_v59, %s3617_s19 }
 0xf76   : > { %v2292_v9 = vpop.xlane.xlu0 %2291 }
 0xf7a   : > { %v2188_v20 = vpop.permute.xlu0 %2187 }
 0xf7b   : > { %3087 = vmatpush3.bf16.msra.mxu1 %v2188_v20 }
 0xf7c   : > { %3098 = vmatprep.subr.bf16.mxu1 %v3613_v6 }
 0xf7e   : > { %v2401_v10 = vpop.xlane.xlu1 %2400 }
 0xf82   : > { %v2182_v11 = vpop.xlane.xlu1 %2181 }
 0xf83   : > { %3373 = vrcp.f32 %v2182_v11 }
 0xf84   : > { %3375 = vrcp.f32 %v2292_v9  ;;  %v2582_v9 = vrot.slane %v4098_v37, %v1710_v0 }
 0xf85   : > { %3377 = vrcp.f32 %v2401_v10 }
 0xf86   : > { %v2297_v17 = vpop.permute.xlu1 %2296 }
 0xf8a   : > { %v2406_v23 = vpop.permute.xlu1 %2405 }
 0xf8d   : > { %v3374_v12 = vpop.eup %3373 }
 0xf8e   : > { %v2184_v13 = vmul.f32 %v3374_v12, %v3372_v8  ;;  %v3376_v16 = vpop.eup %3375 }
 0xf8f   : > { %v2294_v59 = vmul.f32 %v3376_v16, %v3368_v3  ;;  %v3378_v21 = vpop.eup %3377 }
 0xf90   : > { %v2185_v15 = vpack.c.bf16 %v2184_v13, %v2184_v13  ;;  %v2403_v24 = vmul.f32 %v3378_v21, %v3370_v5 }
 0xf91   : > { %v2295_v19 = vpack.c.bf16 %v2294_v59, %v2294_v59 }
 0xf92   : > { %3089 = vmatmul.mubr.msk.bf16.vlgmr.msra.gmra.mrb[48].mxu1 %vm2065_vm6, %v2185_v15  ;;  %v2404_v25 = vpack.c.bf16 %v2403_v24, %v2403_v24 }
 0xf93   : > { %3099 = vmatpush3.bf16.msra.mxu1 %v2297_v17  ;;  %3100 = vmatprep.mubr.msk.bf16.mxu1 %vm3614_vm0, %v3613_v6 }
 0xf94   : > { %3110 = vmatprep.subr.bf16.mxu1 %v3613_v6 }
 0xf9a   : > { %3101 = vmatmul.mubr.msk.bf16.vlgmr.msra.gmra.mrb[52].mxu1 %vm2065_vm6, %v2295_v19 }
 0xf9b   : > { %3111 = vmatpush3.bf16.msra.mxu1 %v2406_v23  ;;  %3112 = vmatprep.mubr.msk.bf16.mxu1 %vm3614_vm0, %v3613_v6 }
 0xfa2   : > { %3113 = vmatmul.mubr.msk.bf16.vlgmr.msra.gmra.mrb[56].mxu1 %vm2065_vm6, %v2404_v25 }
0x1065   : > { %v2227_v36 = vpop.f32.mrb[48].mxu1 }
0x1066   : > { %2452 = vrot.lane.b32.xlu0 %v2227_v36, %s3617_s19  ;;  %v3090_v38 = vpop.f32.mrb[49].mxu1 }
0x1067   : > { %v2230_v40 = vpop.f32.mrb[50].mxu1 }
0x1068   : > { %v3091_v41 = vpop.f32.mrb[51].mxu1 }
0x106d   : > { %v2336_v43 = vpop.f32.mrb[52].mxu1 }
0x106e   : > { %2456 = vrot.lane.b32.xlu1 %v2336_v43, %s3616_s16  ;;  %v3102_v44 = vpop.f32.mrb[53].mxu1 }
0x106f   : > { %v2339_v47 = vpop.f32.mrb[54].mxu1 }
0x1070   : > { %v3103_v51 = vpop.f32.mrb[55].mxu1 }
0x1075   : > { %v2445_v49 = vpop.f32.mrb[56].mxu1 }
0x1076   : > { %2460 = vrot.lane.b32.xlu0 %v2445_v49, %s3615_s14  ;;  %v3114_v50 = vpop.f32.mrb[57].mxu1 }
0x1077   : > { %v2448_v52 = vpop.f32.mrb[58].mxu1 }
0x1078   : > { %v3115_v53 = vpop.f32.mrb[59].mxu1 }
0x10d8   : > { %v2453_v54 = vpop.permute.xlu0 %2452 }
0x10d9   : > { %v2463_v6 = vsel %vm1157_vm1, %v4153_v33, %v2453_v54 }
0x10e0   : > { %v2457_v55 = vpop.permute.xlu1 %2456 }
0x10e1   : > { %v2464_v56 = vsel %vm1614_vm4, %v2463_v6, %v2457_v55 }
0x10e8   : > { %v2461_v57 = vpop.permute.xlu0 %2460 }
0x10e9   : > { %v2465_v22 = vsel %vm1616_vm5, %v2464_v56, %v2461_v57 }
0x10ea   : > { %v2466_v58 = vpack.c.bf16 %v2465_v22, %v2465_v22 }
0x10ec   : > { %3133 = vmatmul.mubr.bf16.vlgmr.msra.gmra.mrb[32].mxu0 %v2466_v58 }
0x11bf   : > { %v2549_v60 = vpop.f32.mrb[32].mxu0 }
0x11c0   : > { %v2555_v14 = vadd.f32 %v2549_v60, %v4104_v46  ;;  %v3134_v27 = vpop.f32.mrb[33].mxu0 }
0x11c1   : > { %v2552_v61 = vpop.f32.mrb[34].mxu0 }
0x11c2   : > { %v2560_v62 = vadd.f32 %v2559_v18, %v2555_v14  ;;  %v3135_v63 = vpop.f32.mrb[35].mxu0 }
0x11c4   : > { %2561 = vadd.xlane.f32.xlu1 %v2560_v62  ;;  %v2564_v33 = vmul.f32 %v2560_v62, %v2560_v62 }
0x11c6   : > { %2565 = vadd.xlane.f32.xlu0 %v2564_v33 }
0x1251   : > { %v2562_v1 = vpop.xlane.xlu1 %2561 }
0x1252   : > { %v2563_v2 = vmul.f32 0.0078125, %v2562_v1 }
0x1253   : > { %v2566_v3 = vpop.xlane.xlu0 %2565 }
0x1254   : > { %v2568_v4 = vmul.f32 %v2563_v2, %v2563_v2  ;;  %v2567_v5 = vmul.f32 0.0078125, %v2566_v3  ;;  %v2570_v46 = vsub.f32 %v2560_v62, %v2563_v2 }
0x1256   : > { %v2569_v7 = vsub.f32 %v2567_v5, %v2568_v4 }
0x1258   : > { %v2571_v8 = vadd.f32 1e-05, %v2569_v7 }
0x125a   : > { %3379 = vrsqrt.f32 %v2571_v8 }
0x1264   : > { %v3380_v45 = vpop.eup %3379 }
0x1265   : > { %v2573_v20 = vmul.f32 %v3380_v45, %v2570_v46 }
0x1267   : > { %v2578_v10 = vmul.f32 %v2577_v26, %v2573_v20 }
0x1269   : > { %v2583_v11 = vadd.f32 %v2582_v9, %v2578_v10 }
0x126b   : > { %2584 = vst [vmem:[%s547_s28] sm:$0xff] %v2583_v11 }
0x126c PF: > { %s4244_s18 = sld [smem:[#allocation17_spill]] }
0x1272   : > { %s26_s21 = sadd.s32 1, %s4244_s18  }
0x1273   : > { %p23_p6 = scmp.ge.s32.totalorder %s26_s21, 4  }
0x1275   :  { %25 = sbr.rel (!%p23_p6) target bundleno = 6 (0x6), region = 133 }
0x127c   :  { %2604 = vsyncpa [#allocation3], 1 }
0x127d   :  { %2606 = vsyncpa [#allocation3 + $0x1], 1 }
0x127e   :  { %2607 = vsyncpa [#allocation5], 1 }
0x127f   :  { %2608 = vsyncpa [#allocation8], 1 }
0x1280   :  { %2609 = vsyncpa [#allocation11], 1 }

// kernel: transformer_decoder_forward.6
= control target key start
LH: loop header
LB: loop body
LE: loop exit
PB: predicated region body
PF: predicated region fallthrough
CT: control target
= control target key end

     0   :  { %s3200_s21 = smov 0   ;;  %s3787_s0 = inlined_call_operand.vmem [shape: f32[2,8,128], index: 0, kind: input, shape index: {}]   ;;  %s3788_s1 = inlined_call_operand.vmem [shape: f32[2,8,128], index: 1, kind: input, shape index: {}]   ;;  %s3789_s2 = inlined_call_operand.vmem [shape: f32[2,16,128], index: 2, kind: input, shape index: {}]   ;;  %s3790_s3 = inlined_call_operand.vmem [shape: bf16[128,256], index: 3, kind: input, shape index: {}]   ;;  %s3791_s4 = inlined_call_operand.vmem [shape: bf16[256,128], index: 4, kind: input, shape index: {}]   ;;  %s3792_s5 = inlined_call_operand.vmem [shape: bf16[128,256], index: 5, kind: input, shape index: {}]   ;;  %s3793_s6 = inlined_call_operand.vmem [shape: bf16[128,128], index: 6, kind: input, shape index: {}]   ;;  %s3794_s7 = inlined_call_operand.vmem [shape: bf16[128,128], index: 7, kind: input, shape index: {}]   ;;  %s3795_s8 = inlined_call_operand.vmem [shape: bf16[128,128], index: 8, kind: input, shape index: {}]   ;;  %s3796_s9 = inlined_call_operand.vmem [shape: bf16[128,256], index: 9, kind: input, shape index: {}]   ;;  %s3797_s10 = inlined_call_operand.vmem [shape: bf16[128,128], index: 10, kind: input, shape index: {}]   ;;  %s3798_s11 = inlined_call_operand.vmem [shape: f32[15,128], index: 11, kind: input, shape index: {}]   ;;  %s3799_s12 = inlined_call_operand.vmem [shape: f32[2,8,128], index: 12, kind: output, shape index: {}]  }
   0x1 LB: > { %s2560_s22 = sadd.s32 4294967295, %s3127_s21   ;;  %p2564_p0 = scmp.ge.s32.totalorder %s3127_s21, 1  ;;  %s3127_s21 = sphi %s3200_s21, %s22_s21  }
   0x2   : > { %p380_p1 = scmp.lt.s32.totalorder %s3127_s21, 3 }
   0x4   : > { %p381_p2 = pnand %p2564_p0, %p380_p1 }
   0x5   : > { %v2965_v0 = vld [vmem:[%s3790_s3 + $0x4] ss:$8 sps:$4 sm:$0xff] (!%p381_p2)   ;;  %v2967_v1 = vld [vmem:[%s3790_s3] ss:$8 sps:$4 sm:$0xff] (!%p381_p2)   ;;  %v3129_v2 = vmov (!%p381_p2), 0   ;;  %p429_p3 = scmp.lt.s32.totalorder (!%p381_p2), %s2560_s22, 1  ;;  %v473_v47 = vlaneseq (!%p381_p2) }
   0x6   : > { %384 = sbr.rel (%p381_p2) target bundleno = 4532 (0x11b4), region = 68  ;;  %593 = vmatprep.mubr.bf16.mxu0 (!%p381_p2), %v3129_v2  ;;  %561 = vmatprep.subr.bf16.mxu0 (!%p381_p2), %v2965_v0  ;;  %v2968_v3 = vld [vmem:[%s3790_s3 + $0x14] ss:$8 sps:$4 sm:$0xff] (!%p381_p2)   ;;  %v2970_v4 = vld [vmem:[%s3790_s3 + $0x10] ss:$8 sps:$4 sm:$0xff] (!%p381_p2)   ;;  %v2989_v10 = vld [vmem:[%s3791_s4 + $0x40] sm:$0xff] (!%p381_p2)  }
   0x7   : > { %562 = vmatpush1.bf16.msra.mxu0 (!%p381_p2), %v2967_v1  ;;  %v2971_v5 = vld [vmem:[%s3790_s3 + $0x24] ss:$8 sps:$4 sm:$0xff] (!%p381_p2)   ;;  %v2973_v6 = vld [vmem:[%s3790_s3 + $0x20] ss:$8 sps:$4 sm:$0xff] (!%p381_p2)   ;;  %v2974_v7 = vld [vmem:[%s3790_s3 + $0x34] ss:$8 sps:$4 sm:$0xff] (!%p381_p2)   ;;  %2685 = vmatprep.subr.bf16.mxu1 (!%p381_p2), %v2989_v10 }
   0x8   : > { %563 = vmatprep.subr.bf16.mxu0 (!%p381_p2), %v2968_v3  ;;  %v2976_v8 = vld [vmem:[%s3790_s3 + $0x30] ss:$8 sps:$4 sm:$0xff] (!%p381_p2)   ;;  %v2977_v9 = vld [vmem:[%s3790_s3 + $0x44] ss:$8 sps:$4 sm:$0xff] (!%p381_p2)   ;;  %v2979_v12 = vld [vmem:[%s3790_s3 + $0x40] ss:$8 sps:$4 sm:$0xff] (!%p381_p2)  }
   0x9   : > { %v2990_v11 = vld [vmem:[%s3791_s4] sm:$0xff] (!%p381_p2)   ;;  %v2991_v13 = vld [vmem:[%s3791_s4 + $0x48] sm:$0xff] (!%p381_p2)   ;;  %v2993_v15 = vld [vmem:[%s3791_s4 + $0x50] sm:$0xff] (!%p381_p2)   ;;  %v3355_v48 = vshrl.u32 (!%p381_p2), %v473_v47, 7  ;;  %vm3131_vm0 = vmmov (!%p381_p2), 0   ;;  %vm1055_vm1 = vcmask (!%p381_p2), 261120  }
   0xa   : > { %2686 = vmatpush3.bf16.msra.mxu1 (!%p381_p2), %v2990_v11  ;;  %v2992_v14 = vld [vmem:[%s3791_s4 + $0x8] sm:$0xff] (!%p381_p2)   ;;  %v2980_v16 = vld [vmem:[%s3790_s3 + $0x54] ss:$8 sps:$4 sm:$0xff] (!%p381_p2)   ;;  %v2982_v17 = vld [vmem:[%s3790_s3 + $0x50] ss:$8 sps:$4 sm:$0xff] (!%p381_p2)   ;;  %s3132_s19 = smov (!%p381_p2), 96  }
   0xb   : > { %564 = vmatpush1.bf16.msra.mxu0 (!%p381_p2), %v2970_v4  ;;  %2687 = vmatprep.subr.bf16.mxu1 (!%p381_p2), %v2991_v13  ;;  %v2994_v18 = vld [vmem:[%s3791_s4 + $0x10] sm:$0xff] (!%p381_p2)   ;;  %v2995_v19 = vld [vmem:[%s3791_s4 + $0x58] sm:$0xff] (!%p381_p2)   ;;  %v2983_v20 = vld [vmem:[%s3790_s3 + $0x64] ss:$8 sps:$4 sm:$0xff] (!%p381_p2)   ;;  %v3363_v50 = vsub.s32 (!%p381_p2), 0, %v3355_v48  ;;  %s3133_s20 = smov (!%p381_p2), 64  }
   0xc   : > { %565 = vmatprep.subr.bf16.mxu0 (!%p381_p2), %v2971_v5  ;;  %v2985_v21 = vld [vmem:[%s3790_s3 + $0x60] ss:$8 sps:$4 sm:$0xff] (!%p381_p2)   ;;  %v2996_v22 = vld [vmem:[%s3791_s4 + $0x18] sm:$0xff] (!%p381_p2)   ;;  %v3001_v31 = vld [vmem:[%s3791_s4 + $0x70] sm:$0xff] (!%p381_p2)   ;;  %s3134_s23 = smov (!%p381_p2), 32   ;;  %vm1119_vm2 = vcmask (!%p381_p2), 1043456  }
   0xd   : > { %s3801_s22 = smov (!%p429_p3, %s2560_s22), 1  ;;  %v2986_v23 = vld [vmem:[%s3790_s3 + $0x74] ss:$8 sps:$4 sm:$0xff]   ;;  %v2997_v24 = vld [vmem:[%s3791_s4 + $0x60] sm:$0xff]   ;;  %v2988_v26 = vld [vmem:[%s3790_s3 + $0x70] ss:$8 sps:$4 sm:$0xff]  }
   0xe   : > { %2688 = vmatpush3.bf16.msra.mxu1 %v2992_v14  ;;  %s3270_s27 = sshll.u32 %s3801_s22, 3  ;;  %v2998_v25 = vld [vmem:[%s3791_s4 + $0x20] sm:$0xff]   ;;  %v2999_v28 = vld [vmem:[%s3791_s4 + $0x68] sm:$0xff]   ;;  %v3002_v32 = vld [vmem:[%s3791_s4 + $0x30] sm:$0xff]   ;;  %v640_v14 = vsub.s32 2, %v3355_v48  ;;  %vm1103_vm3 = vcmask 64512  }
   0xf   : > { %566 = vmatpush1.bf16.msra.mxu0 %v2973_v6  ;;  %2689 = vmatprep.subr.bf16.mxu1 %v2993_v15  ;;  %s436_s18 = scalar_lea.vmem %s3788_s1, %s3270_s27  ;;  %v3000_v29 = vld [vmem:[%s3791_s4 + $0x28] sm:$0xff]   ;;  %v3003_v33 = vld [vmem:[%s3791_s4 + $0x78] sm:$0xff]   ;;  %v3360_v49 = vld [vmem:[%s3798_s11] sm:$0xff]  ;;  %v3130_v6 = vmov 0.0   ;;  %vm1512_vm4 = vcmask 523264   ;;  %vm1514_vm5 = vcmask 785408  }
  0x10   : > { %567 = vmatprep.subr.bf16.mxu0 %v2974_v7  ;;  %v448_v27 = vld [vmem:[%s436_s18] sm:$0xff]  ;;  %v3004_v34 = vld [vmem:[%s3791_s4 + $0x38] sm:$0xff]   ;;  %v454_v51 = vrot.slane %v3360_v49, 1  ;;  %v476_v52 = vrot.slane %v3360_v49, %v3363_v50  ;;  %v3030_v7 = vld [vmem:[%s3793_s6 + $0x8] sm:$0xff]   ;;  %s432_s18 = scalar_lea.vmem %s3787_s0, %s3270_s27  ;;  %s2684_s29 = sshll.u32 %s3801_s22, 4  ;;  %vm1963_vm6 = vcmask 130048  }
  0x11   : > { %v472_v30 = vpack.c.bf16 %v448_v27, %v448_v27  ;;  %v3005_v35 = vld [vmem:[%s3792_s5] ss:$8 sps:$4 sm:$0xff]   ;;  %v3007_v36 = vld [vmem:[%s3792_s5 + $0x4] ss:$8 sps:$4 sm:$0xff]   ;;  %v3010_v37 = vld [vmem:[%s3792_s5 + $0x14] ss:$8 sps:$4 sm:$0xff]   ;;  %s441_s16 = scalar_lea.vmem %s3789_s2, %s2684_s29 }
  0x12   : > { %2690 = vmatpush3.bf16.msra.mxu1 %v2994_v18  ;;  %v3008_v38 = vld [vmem:[%s3792_s5 + $0x10] ss:$8 sps:$4 sm:$0xff]   ;;  %v3013_v39 = vld [vmem:[%s3792_s5 + $0x24] ss:$8 sps:$4 sm:$0xff]   ;;  %v3011_v40 = vld [vmem:[%s3792_s5 + $0x20] ss:$8 sps:$4 sm:$0xff]   ;;  %v480_v53 = vrot.slane %v454_v51, %v3363_v50 }
  0x13   : > { %568 = vmatpush1.bf16.msra.mxu0 %v2976_v8  ;;  %2691 = vmatprep.subr.bf16.mxu1 %v2995_v19  ;;  %v3016_v41 = vld [vmem:[%s3792_s5 + $0x34] ss:$8 sps:$4 sm:$0xff]   ;;  %v3014_v42 = vld [vmem:[%s3792_s5 + $0x30] ss:$8 sps:$4 sm:$0xff]   ;;  %v3019_v43 = vld [vmem:[%s3792_s5 + $0x44] ss:$8 sps:$4 sm:$0xff]  }
  0x14   : > { %569 = vmatprep.subr.bf16.mxu0 %v2977_v9  ;;  %v3017_v44 = vld [vmem:[%s3792_s5 + $0x40] ss:$8 sps:$4 sm:$0xff]   ;;  %v3022_v45 = vld [vmem:[%s3792_s5 + $0x54] ss:$8 sps:$4 sm:$0xff]   ;;  %v3020_v46 = vld [vmem:[%s3792_s5 + $0x50] ss:$8 sps:$4 sm:$0xff]  }
  0x15   : > { %v3025_v0 = vld [vmem:[%s3792_s5 + $0x64] ss:$8 sps:$4 sm:$0xff]   ;;  %v3023_v1 = vld [vmem:[%s3792_s5 + $0x60] ss:$8 sps:$4 sm:$0xff]   ;;  %v3028_v3 = vld [vmem:[%s3792_s5 + $0x74] ss:$8 sps:$4 sm:$0xff]  }
  0x16   : > { %2692 = vmatpush3.bf16.msra.mxu1 %v2996_v22  ;;  %v3026_v4 = vld [vmem:[%s3792_s5 + $0x70] ss:$8 sps:$4 sm:$0xff]   ;;  %v3029_v5 = vld [vmem:[%s3793_s6] sm:$0xff]   ;;  %v3034_v11 = vld [vmem:[%s3793_s6 + $0x28] sm:$0xff]   ;;  %v919_v27 = vsub.s32 3, %v3355_v48 }
  0x17   : > { %570 = vmatpush1.bf16.msra.mxu0 %v2979_v12  ;;  %2693 = vmatprep.subr.bf16.mxu1 %v2997_v24  ;;  %v3031_v8 = vld [vmem:[%s3793_s6 + $0x10] sm:$0xff]   ;;  %v3032_v9 = vld [vmem:[%s3793_s6 + $0x18] sm:$0xff]   ;;  %v3033_v10 = vld [vmem:[%s3793_s6 + $0x20] sm:$0xff]  }
  0x18   : > { %571 = vmatprep.subr.bf16.mxu0 %v2980_v16  ;;  %v3035_v12 = vld [vmem:[%s3793_s6 + $0x30] sm:$0xff]   ;;  %v3036_v13 = vld [vmem:[%s3793_s6 + $0x38] sm:$0xff]   ;;  %v641_v16 = vrot.slane %v3360_v49, %v640_v14 }
  0x1a   : > { %2694 = vmatpush3.bf16.msra.mxu1 %v2998_v25 }
  0x1b   : > { %572 = vmatpush1.bf16.msra.mxu0 %v2982_v17  ;;  %2695 = vmatprep.subr.bf16.mxu1 %v2999_v28 }
  0x1c   : > { %573 = vmatprep.subr.bf16.mxu0 %v2983_v20  ;;  %v3423_v20 = vld [vmem:[%s432_s18] sm:$0xff] }
  0x1d   : > { %v943_v25 = vpack.c.bf16 %v3423_v20, %v3423_v20 }
  0x1e   : > { %2696 = vmatpush3.bf16.msra.mxu1 %v3000_v29 }
  0x1f   : > { %574 = vmatpush1.bf16.msra.mxu0 %v2985_v21  ;;  %2697 = vmatprep.subr.bf16.mxu1 %v3001_v31 }
  0x20   : > { %575 = vmatprep.subr.bf16.mxu0 %v2986_v23 }
  0x22   : > { %2698 = vmatpush3.bf16.msra.mxu1 %v3002_v32 }
  0x23   : > { %576 = vmatpush1.bf16.msra.mxu0 %v2988_v26  ;;  %2699 = vmatprep.subr.bf16.mxu1 %v3003_v33  ;;  %v924_v26 = vsub.s32 4, %v3355_v48 }
  0x24   : > { %876 = vmatprep.subr.bf16.mxu0 %v3007_v36 }
  0x25   : > { %v925_v28 = vrot.slane %v3360_v49, %v924_v26 }
  0x26   : > { %594 = vmatmul.mubr.bf16.vlgmr.msra.gmra.mrb[0].mxu0 %v472_v30  ;;  %2700 = vmatpush3.bf16.msra.mxu1 %v3004_v34  ;;  %v920_v30 = vrot.slane %v3360_v49, %v919_v27 }
  0x27   : > { %908 = vmatprep.mubr.bf16.mxu0 %v3129_v2  ;;  %877 = vmatpush1.bf16.msra.mxu0 %v3005_v35 }
  0x28   : > { %878 = vmatprep.subr.bf16.mxu0 %v3010_v37  ;;  %2775 = vmatprep.subr.bf16.mxu1 %v3130_v6 }
  0x2b   : > { %879 = vmatpush1.bf16.msra.mxu0 %v3008_v38 }
  0x2c   : > { %880 = vmatprep.subr.bf16.mxu0 %v3013_v39  ;;  %v946_v39 = vsub.s32 5, %v3355_v48 }
  0x2f   : > { %881 = vmatpush1.bf16.msra.mxu0 %v3011_v40  ;;  %v947_v40 = vrot.slane %v3360_v49, %v946_v39 }
  0x30   : > { %882 = vmatprep.subr.bf16.mxu0 %v3016_v41 }
  0x33   : > { %883 = vmatpush1.bf16.msra.mxu0 %v3014_v42 }
  0x34   : > { %884 = vmatprep.subr.bf16.mxu0 %v3019_v43 }
  0x37   : > { %885 = vmatpush1.bf16.msra.mxu0 %v3017_v44 }
  0x38   : > { %886 = vmatprep.subr.bf16.mxu0 %v3022_v45 }
  0x3b   : > { %887 = vmatpush1.bf16.msra.mxu0 %v3020_v46 }
  0x3c   : > { %888 = vmatprep.subr.bf16.mxu0 %v3025_v0 }
  0x3f   : > { %889 = vmatpush1.bf16.msra.mxu0 %v3023_v1 }
  0x40   : > { %890 = vmatprep.subr.bf16.mxu0 %v3028_v3 }
  0x43   : > { %891 = vmatpush1.bf16.msra.mxu0 %v3026_v4 }
  0x44   : > { %2819 = vmatprep.subr.bf16.mxu0 %v3130_v6 }
  0xf9   : > { %v595_v54 = vpop.f32.mrb[0].mxu0 }
  0xfa   : > { %v596_v55 = vadd.f32 %v595_v54, %v476_v52  ;;  %v597_v56 = vpop.f32.mrb[1].mxu0 }
  0xfb   : > { %v598_v57 = vadd.f32 %v597_v56, %v480_v53  ;;  %v599_v58 = vpop.f32.mrb[2].mxu0 }
  0xfc   : > { %v602_v59 = vmax.f32 %v596_v55, 0.0  ;;  %v600_v60 = vpop.f32.mrb[3].mxu0 }
  0xfd   : > { %v603_v61 = vmax.f32 %v598_v57, 0.0 }
  0xfe   : > { %v636_v63 = vpack.c.bf16 %v602_v59, %v602_v59 }
  0xff   : > { %v637_v62 = vpack.c.bf16 %v603_v61, %v603_v61 }
 0x101   : > { %770 = vmatprep.mubr.bf16.mxu1 %v637_v62 }
 0x102   : > { %771 = vmatmul.mubr.bf16.vlgmr.msra.gmra.mrb[0].mxu1 %v636_v63 }
 0x103   : > { %2776 = vmatpush3.bf16.msra.mxu1 %v3029_v5  ;;  %2791 = vmatprep.mubr.msk.bf16.mxu1 %vm3131_vm0, %v3130_v6 }
 0x104   : > { %2777 = vmatprep.subr.bf16.mxu1 %v3130_v6 }
 0x107   : > { %2778 = vmatpush3.bf16.msra.mxu1 %v3030_v7 }
 0x108   : > { %2779 = vmatprep.subr.bf16.mxu1 %v3130_v6 }
 0x10b   : > { %2780 = vmatpush3.bf16.msra.mxu1 %v3031_v8 }
 0x10c   : > { %2781 = vmatprep.subr.bf16.mxu1 %v3130_v6 }
 0x10f   : > { %2782 = vmatpush3.bf16.msra.mxu1 %v3032_v9 }
 0x110   : > { %2783 = vmatprep.subr.bf16.mxu1 %v3130_v6 }
 0x113   : > { %2784 = vmatpush3.bf16.msra.mxu1 %v3033_v10 }
 0x114   : > { %2785 = vmatprep.subr.bf16.mxu1 %v3130_v6 }
 0x117   : > { %2786 = vmatpush3.bf16.msra.mxu1 %v3034_v11 }
 0x118   : > { %2787 = vmatprep.subr.bf16.mxu1 %v3130_v6 }
 0x11b   : > { %2788 = vmatpush3.bf16.msra.mxu1 %v3035_v12 }
 0x11c   : > { %2789 = vmatprep.subr.bf16.mxu1 %v3130_v6 }
 0x11f   : > { %2790 = vmatpush3.bf16.msra.mxu1 %v3036_v13 }
 0x120   : > { %2795 = vmatprep.subr.bf16.mxu1 %v3130_v6 }
 0x122   : > { %2792 = vmatmul.mubr.bf16.vlgmr.msra.gmra.mrb[4].mxu1 %v943_v25 }
 0x123   : > { %2797 = vmatprep.mubr.msk.bf16.mxu1 %vm3131_vm0, %v3130_v6 }
 0x1d5   : > { %v2701_v15 = vpop.f32.mrb[0].mxu1 }
 0x1d6   : > { %v2702_v17 = vpop.f32.mrb[1].mxu1 }
 0x1d7   : > { %v2703_v18 = vadd.f32 %v2702_v17, %v2701_v15  ;;  %v2704_v19 = vpop.f32.mrb[2].mxu1 }
 0x1d8   : > { %v2705_v21 = vpop.f32.mrb[3].mxu1 }
 0x1d9   : > { %v3425_v22 = vadd.f32 %v2703_v18, %v641_v16 }
 0x1db   : > { %v778_v23 = vadd.f32 %v3425_v22, %v3423_v20 }
 0x1dd   : > { %v795_v24 = vpack.c.bf16 %v778_v23, %v778_v23 }
 0x1df   : > { %909 = vmatmul.mubr.bf16.vlgmr.msra.gmra.mrb[4].mxu0 %v795_v24 }
 0x1e0   : > { %2821 = vmatprep.mubr.msk.bf16.mxu0 %vm3131_vm0, %v3130_v6 }
 0x1f5   : > { %v1030_v41 = vpop.f32.mrb[4].mxu1 }
 0x1f6   : > { %v1031_v42 = vadd.f32 %v1030_v41, %v947_v40  ;;  %v2793_v43 = vpop.f32.mrb[5].mxu1 }
 0x1f7   : > { %v1033_v44 = vpop.f32.mrb[6].mxu1 }
 0x1f8   : > { %v3459_v45 = vpack.c.bf16 %v1031_v42, %v1031_v42  ;;  %v2794_v46 = vpop.f32.mrb[7].mxu1 }
 0x1fa   : > { %v1121_v47 = vsel %vm1119_vm2, %v3459_v45, 0 }
 0x2b2   : > { %v910_v29 = vpop.f32.mrb[4].mxu0 }
 0x2b3   : > { %v912_v31 = vpop.f32.mrb[5].mxu0  ;;  %v921_v35 = vadd.f32 %v920_v30, %v910_v29 }
 0x2b4   : > { %v926_v32 = vadd.f32 %v925_v28, %v912_v31  ;;  %v914_v33 = vpop.f32.mrb[6].mxu0 }
 0x2b5   : > { %v915_v34 = vpop.f32.mrb[7].mxu0  ;;  %v1052_v38 = vpack.c.bf16 %v921_v35, %v921_v35 }
 0x2b6   : > { %v1053_v36 = vpack.c.bf16 %v926_v32, %v926_v32 }
 0x2b8   : > { %1167 = vrot.lane.b32.xlu1 %v1053_v36, %s3132_s19  ;;  %v1060_v37 = vsel %vm1055_vm1, %v1053_v36, 0 }
 0x2b9   : > { %2796 = vmatpush3.bf16.xpose.msra.mxu1 %v1060_v37 }
 0x2ba   : > { %2801 = vmatprep.subr.bf16.mxu1 %v3130_v6 }
 0x2bc   : > { %1164 = vrot.lane.b32.xlu1 %v1052_v38, %s3132_s19 }
 0x2c0   : > { %1277 = vrot.lane.b32.xlu1 %v1052_v38, %s3133_s20  ;;  %2798 = vmatmul.mubr.msk.bf16.vlgmr.msra.gmra.mrb[8].mxu1 %vm1055_vm1, %v1052_v38 }
 0x2c1   : > { %2803 = vmatprep.mubr.msk.bf16.mxu1 %vm3131_vm0, %v3130_v6  ;;  %2802 = vmatpush3.bf16.msra.mxu1 %v1121_v47 }
 0x2c2   : > { %2807 = vmatprep.subr.bf16.mxu1 %v3130_v6 }
 0x2c4   : > { %1390 = vrot.lane.b32.xlu1 %v1053_v36, %s3134_s23 }
 0x2c8   : > { %1388 = vrot.lane.b32.xlu1 %v1052_v38, %s3134_s23 }
 0x32a   : > { %v1168_v62 = vpop.permute.xlu1 %1167 }
 0x32b   : > { %v1173_v11 = vsel %vm1055_vm1, %v1168_v62, 0 }
 0x32e   : > { %v1165_v63 = vpop.permute.xlu1 %1164 }
 0x332   : > { %v1278_v1 = vpop.permute.xlu1 %1277 }
 0x336   : > { %v1391_v5 = vpop.permute.xlu1 %1390 }
 0x337   : > { %v1396_v9 = vsel %vm1055_vm1, %v1391_v5, 0 }
 0x33a   : > { %v1389_v12 = vpop.permute.xlu1 %1388 }
 0x393   : > { %v1096_v51 = vpop.f32.mrb[8].mxu1 }
 0x394   : > { %v1102_v52 = vmul.f32 0.17677669, %v1096_v51  ;;  %v2799_v53 = vpop.f32.mrb[9].mxu1 }
 0x395   : > { %v1099_v54 = vpop.f32.mrb[10].mxu1 }
 0x396   : > { %v2800_v55 = vpop.f32.mrb[11].mxu1  ;;  %v1104_v56 = vsel %vm1103_vm3, %v1102_v52, -inf }
 0x397   : > { %1105 = vmax.xlane.f32.xlu0 %v1104_v56 }
 0x424   : > { %v1106_v57 = vpop.xlane.xlu0 %1105 }
 0x425   : > { %v1107_v58 = vsub.f32 %v1102_v52, %v1106_v57 }
 0x427   : > { %v1108_v59 = vmul.f32 1.442695, %v1107_v58 }
 0x429   : > { %3085 = vpow2.f32 %v1108_v59 }
 0x433   : > { %v3086_v60 = vpop.eup %3085 }
 0x434   : > { %v1110_v61 = vsel %vm1103_vm3, %v3086_v60, 0.0 }
 0x435   : > { %1111 = vadd.xlane.f32.xlu0 %v1110_v61 }
 0x44b   : > { %1279 = vrot.lane.b32.xlu0 %v1053_v36, %s3133_s20 }
 0x4c2   : > { %v1112_v0 = vpop.xlane.xlu0 %1111 }
 0x4c3   : > { %3087 = vrcp.f32 %v1112_v0 }
 0x4c6   : > { %v1280_v3 = vpop.permute.xlu0 %1279 }
 0x4c7   : > { %v1285_v4 = vsel %vm1055_vm1, %v1280_v3, 0 }
 0x4c8   : > { %2820 = vmatpush3.bf16.xpose.msra.mxu0 %v1285_v4 }
 0x4c9   : > { %2831 = vmatprep.subr.bf16.mxu0 %v3130_v6 }
 0x4cd   : > { %v3088_v7 = vpop.eup %3087 }
 0x4ce   : > { %v1114_v8 = vmul.f32 %v3088_v7, %v3086_v60 }
 0x4cf   : > { %2822 = vmatmul.mubr.msk.bf16.vlgmr.msra.gmra.mrb[8].mxu0 %vm1055_vm1, %v1278_v1 }
 0x4d0   : > { %2832 = vmatpush3.bf16.xpose.msra.mxu0 %v1396_v9  ;;  %v1115_v10 = vpack.c.bf16 %v1114_v8, %v1114_v8  ;;  %2833 = vmatprep.mubr.msk.bf16.mxu0 %vm3131_vm0, %v3130_v6 }
 0x4d1   : > { %2843 = vmatprep.subr.bf16.mxu0 %v3130_v6 }
 0x4d2   : > { %2804 = vmatmul.mubr.msk.bf16.vlgmr.msra.gmra.mrb[12].mxu1 %vm1103_vm3, %v1115_v10 }
 0x4d3   : > { %2808 = vmatpush3.bf16.xpose.msra.mxu1 %v1173_v11  ;;  %2809 = vmatprep.mubr.msk.bf16.mxu1 %vm3131_vm0, %v3130_v6 }
 0x4d4   : > { %2813 = vmatprep.subr.bf16.mxu1 %v3130_v6 }
 0x4d7   : > { %2834 = vmatmul.mubr.msk.bf16.vlgmr.msra.gmra.mrb[12].mxu0 %vm1055_vm1, %v1389_v12 }
 0x4d8   : > { %2859 = vmatprep.mubr.msk.bf16.mxu0 %vm3131_vm0, %v3130_v6 }
 0x4da   : > { %2810 = vmatmul.mubr.msk.bf16.vlgmr.msra.gmra.mrb[16].mxu1 %vm1055_vm1, %v1165_v63 }
 0x4db   : > { %2815 = vmatprep.mubr.msk.bf16.mxu1 %vm3131_vm0, %v3130_v6 }
 0x5a2   : > { %v1321_v13 = vpop.f32.mrb[8].mxu0 }
 0x5a3   : > { %v1327_v15 = vmul.f32 0.17677669, %v1321_v13  ;;  %v2823_v16 = vpop.f32.mrb[9].mxu0 }
 0x5a4   : > { %v1324_v17 = vpop.f32.mrb[10].mxu0  ;;  %v3037_v16 = vld [vmem:[%s3794_s7] sm:$0xff]  }
 0x5a5   : > { %v3485_v18 = vpop.f32.mrb[12].mxu1  ;;  %v2824_v19 = vpop.f32.mrb[11].mxu0  ;;  %v1328_v21 = vsel %vm1103_vm3, %v1327_v15, -inf  ;;  %2844 = vmatpush3.bf16.msra.mxu0 %v3037_v16  ;;  %v3038_v17 = vld [vmem:[%s3794_s7 + $0x8] sm:$0xff]   ;;  %v3070_v16 = vld [vmem:[%s3796_s9 + $0x70] ss:$8 sps:$4 sm:$0xff]  }
 0x5a6   : > { %v2805_v23 = vpop.f32.mrb[13].mxu1  ;;  %1329 = vmax.xlane.f32.xlu0 %v1328_v21  ;;  %2845 = vmatprep.subr.bf16.mxu0 %v3130_v6  ;;  %v3039_v19 = vld [vmem:[%s3794_s7 + $0x10] sm:$0xff]   ;;  %v3040_v21 = vld [vmem:[%s3794_s7 + $0x18] sm:$0xff]  }
 0x5a7   : > { %v1160_v24 = vpop.f32.mrb[14].mxu1  ;;  %v3041_v23 = vld [vmem:[%s3794_s7 + $0x20] sm:$0xff]  }
 0x5a8   : > { %v2806_v25 = vpop.f32.mrb[15].mxu1  ;;  %v3042_v24 = vld [vmem:[%s3794_s7 + $0x28] sm:$0xff]  }
 0x5a9   : > { %2846 = vmatpush3.bf16.msra.mxu0 %v3038_v17  ;;  %v3043_v25 = vld [vmem:[%s3794_s7 + $0x30] sm:$0xff]   ;;  %v449_v17 = vld [vmem:[%s441_s16] sm:$0xff] }
 0x5aa   : > { %v1432_v28 = vpop.f32.mrb[12].mxu0  ;;  %2847 = vmatprep.subr.bf16.mxu0 %v3130_v6 }
 0x5ab   : > { %v2835_v29 = vpop.f32.mrb[13].mxu0  ;;  %v1438_v36 = vmul.f32 0.17677669, %v1432_v28 }
 0x5ac   : > { %v1435_v30 = vpop.f32.mrb[14].mxu0 }
 0x5ad   : > { %v1209_v31 = vpop.f32.mrb[16].mxu1  ;;  %v2836_v32 = vpop.f32.mrb[15].mxu0  ;;  %v1439_v40 = vsel %vm1103_vm3, %v1438_v36, -inf  ;;  %2848 = vmatpush3.bf16.msra.mxu0 %v3039_v19  ;;  %v450_v19 = vld [vmem:[%s441_s16 + $0x8] sm:$0xff] }
 0x5ae   : > { %v1215_v33 = vmul.f32 0.17677669, %v1209_v31  ;;  %v2811_v34 = vpop.f32.mrb[17].mxu1  ;;  %2849 = vmatprep.subr.bf16.mxu0 %v3130_v6  ;;  %v3044_v32 = vld [vmem:[%s3794_s7 + $0x38] sm:$0xff]  }
 0x5af   : > { %v1212_v35 = vpop.f32.mrb[18].mxu1 }
 0x5b0   : > { %v2812_v37 = vpop.f32.mrb[19].mxu1  ;;  %v1216_v38 = vsel %vm1103_vm3, %v1215_v33, -inf }
 0x5b1   : > { %1217 = vmax.xlane.f32.xlu1 %v1216_v38  ;;  %2850 = vmatpush3.bf16.msra.mxu0 %v3040_v21  ;;  %v3073_v21 = vld [vmem:[%s3795_s8 + $0x20] sm:$0xff]  }
 0x5b2   : > { %2851 = vmatprep.subr.bf16.mxu0 %v3130_v6 }
 0x5b5   : > { %1440 = vmax.xlane.f32.xlu1 %v1439_v40  ;;  %2852 = vmatpush3.bf16.msra.mxu0 %v3041_v23  ;;  %v1761_v23 = vpack.c.bf16 %v450_v19, %v449_v17 }
 0x5b6   : > { %2853 = vmatprep.subr.bf16.mxu0 %v3130_v6 }
 0x5b9   : > { %2854 = vmatpush3.bf16.msra.mxu0 %v3042_v24  ;;  %v3074_v24 = vld [vmem:[%s3795_s8 + $0x28] sm:$0xff]  }
 0x5ba   : > { %2855 = vmatprep.subr.bf16.mxu0 %v3130_v6 }
 0x5bd   : > { %2856 = vmatpush3.bf16.msra.mxu0 %v3043_v25  ;;  %v3075_v25 = vld [vmem:[%s3795_s8 + $0x30] sm:$0xff]  }
 0x5be   : > { %2857 = vmatprep.subr.bf16.mxu0 %v3130_v6 }
 0x5c1   : > { %2858 = vmatpush3.bf16.msra.mxu0 %v3044_v32 }
 0x633   : > { %v1330_v41 = vpop.xlane.xlu0 %1329 }
 0x634   : > { %v1331_v42 = vsub.f32 %v1327_v15, %v1330_v41 }
 0x636   : > { %v1332_v43 = vmul.f32 1.442695, %v1331_v42 }
 0x638   : > { %3089 = vpow2.f32 %v1332_v43 }
 0x63e   : > { %v1218_v44 = vpop.xlane.xlu1 %1217 }
 0x63f   : > { %v1219_v46 = vsub.f32 %v1215_v33, %v1218_v44 }
 0x641   : > { %v1220_v54 = vmul.f32 1.442695, %v1219_v46 }
 0x642   : > { %v3090_v47 = vpop.eup %3089  ;;  %v1441_v51 = vpop.xlane.xlu1 %1440 }
 0x643   : > { %v1442_v52 = vsub.f32 %v1438_v36, %v1441_v51  ;;  %v1334_v53 = vsel %vm1103_vm3, %v3090_v47, 0.0 }
 0x644   : > { %1335 = vadd.xlane.f32.xlu0 %v1334_v53  ;;  %v3045_v53 = vld [vmem:[%s3796_s9] ss:$8 sps:$4 sm:$0xff]  }
 0x645   : > { %v1443_v55 = vmul.f32 1.442695, %v1442_v52 }
 0x647   : > { %3091 = vpow2.f32 %v1443_v55  ;;  %v3057_v55 = vld [vmem:[%s3795_s8] sm:$0xff]  }
 0x648   : > { %3093 = vpow2.f32 %v1220_v54  ;;  %v3047_v54 = vld [vmem:[%s3796_s9 + $0x4] ss:$8 sps:$4 sm:$0xff]  }
 0x649   : > { %1842 = vmatprep.subr.bf16.mxu0 %v3047_v54 }
 0x651   : > { %v3092_v56 = vpop.eup %3091 }
 0x652   : > { %v1445_v57 = vsel %vm1103_vm3, %v3092_v56, 0.0  ;;  %v3094_v58 = vpop.eup %3093 }
 0x653   : > { %1446 = vadd.xlane.f32.xlu1 %v1445_v57  ;;  %v1222_v59 = vsel %vm1103_vm3, %v3094_v58, 0.0  ;;  %v3051_v57 = vld [vmem:[%s3796_s9 + $0x20] ss:$8 sps:$4 sm:$0xff]  }
 0x657   : > { %1223 = vadd.xlane.f32.xlu1 %v1222_v59  ;;  %v3054_v59 = vld [vmem:[%s3796_s9 + $0x30] ss:$8 sps:$4 sm:$0xff]  }
 0x65a   : > { %1229 = vrot.lane.b32.xlu0 %v3459_v45, %s3132_s19 }
 0x668   : > { %1340 = vrot.lane.b32.xlu1 %v3459_v45, %s3133_s20 }
 0x66c   : > { %1451 = vrot.lane.b32.xlu1 %v3459_v45, %s3134_s23 }
 0x6d1   : > { %v1336_v60 = vpop.xlane.xlu0 %1335 }
 0x6d5   : > { %v1230_v61 = vpop.permute.xlu0 %1229 }
 0x6d6   : > { %v1235_v62 = vsel %vm1119_vm2, %v1230_v61, 0 }
 0x6d7   : > { %2814 = vmatpush3.bf16.msra.mxu1 %v1235_v62 }
 0x6d8   : > { %2825 = vmatprep.subr.bf16.mxu1 %v3130_v6 }
 0x6e0   : > { %v1447_v63 = vpop.xlane.xlu1 %1446 }
 0x6e4   : > { %v1224_v0 = vpop.xlane.xlu1 %1223 }
 0x6e5   : > { %3095 = vrcp.f32 %v1224_v0 }
 0x6e6   : > { %3097 = vrcp.f32 %v1336_v60  ;;  %v1608_v60 = vsub.s32 6, %v3355_v48 }
 0x6e7   : > { %3099 = vrcp.f32 %v1447_v63 }
 0x6e8   : > { %v1341_v4 = vpop.permute.xlu1 %1340  ;;  %v1609_v61 = vrot.slane %v3360_v49, %v1608_v60 }
 0x6e9   : > { %v1346_v8 = vsel %vm1119_vm2, %v1341_v4, 0 }
 0x6ec   : > { %v1452_v9 = vpop.permute.xlu1 %1451 }
 0x6ed   : > { %v1457_v12 = vsel %vm1119_vm2, %v1452_v9, 0  ;;  %v3062_v9 = vld [vmem:[%s3796_s9 + $0x50] ss:$8 sps:$4 sm:$0xff]  }
 0x6ef   : > { %v3096_v1 = vpop.eup %3095 }
 0x6f0   : > { %v1226_v3 = vmul.f32 %v3096_v1, %v3094_v58  ;;  %v3098_v7 = vpop.eup %3097  ;;  %v3056_v58 = vld [vmem:[%s3796_s9 + $0x34] ss:$8 sps:$4 sm:$0xff]  }
 0x6f1   : > { %v1338_v45 = vmul.f32 %v3098_v7, %v3090_v47  ;;  %v3100_v11 = vpop.eup %3099  ;;  %v3060_v7 = vld [vmem:[%s3796_s9 + $0x44] ss:$8 sps:$4 sm:$0xff]  }
 0x6f2   : > { %v1227_v5 = vpack.c.bf16 %v1226_v3, %v1226_v3  ;;  %v1449_v13 = vmul.f32 %v3100_v11, %v3092_v56  ;;  %v3053_v56 = vld [vmem:[%s3796_s9 + $0x24] ss:$8 sps:$4 sm:$0xff]  }
 0x6f3   : > { %v1339_v10 = vpack.c.bf16 %v1338_v45, %v1338_v45  ;;  %v3064_v45 = vld [vmem:[%s3796_s9 + $0x54] ss:$8 sps:$4 sm:$0xff]   ;;  %v3068_v11 = vld [vmem:[%s3796_s9 + $0x64] ss:$8 sps:$4 sm:$0xff]  }
 0x6f4   : > { %2816 = vmatmul.mubr.msk.bf16.vlgmr.msra.gmra.mrb[20].mxu1 %vm1103_vm3, %v1227_v5  ;;  %v1450_v15 = vpack.c.bf16 %v1449_v13, %v1449_v13  ;;  %v3069_v13 = vld [vmem:[%s3795_s8 + $0x18] sm:$0xff]  }
 0x6f5   : > { %2826 = vmatpush3.bf16.msra.mxu1 %v1346_v8  ;;  %2827 = vmatprep.mubr.msk.bf16.mxu1 %vm3131_vm0, %v3130_v6  ;;  %v3058_v8 = vld [vmem:[%s3796_s9 + $0x40] ss:$8 sps:$4 sm:$0xff]  }
 0x6f6   : > { %2837 = vmatprep.subr.bf16.mxu1 %v3130_v6 }
 0x6fc   : > { %2828 = vmatmul.mubr.msk.bf16.vlgmr.msra.gmra.mrb[24].mxu1 %vm1103_vm3, %v1339_v10  ;;  %v3065_v10 = vld [vmem:[%s3795_s8 + $0x10] sm:$0xff]  }
 0x6fd   : > { %2838 = vmatpush3.bf16.msra.mxu1 %v1457_v12  ;;  %2839 = vmatprep.mubr.msk.bf16.mxu1 %vm3131_vm0, %v3130_v6  ;;  %v3066_v12 = vld [vmem:[%s3796_s9 + $0x60] ss:$8 sps:$4 sm:$0xff]  }
 0x6fe   : > { %2863 = vmatprep.subr.bf16.mxu1 %v3130_v6 }
 0x704   : > { %2840 = vmatmul.mubr.msk.bf16.vlgmr.msra.gmra.mrb[28].mxu1 %vm1103_vm3, %v1450_v15  ;;  %v3072_v15 = vld [vmem:[%s3796_s9 + $0x74] ss:$8 sps:$4 sm:$0xff]  }
 0x705   : > { %2879 = vmatprep.mubr.msk.bf16.mxu1 %vm3131_vm0, %v3130_v6  ;;  %2864 = vmatpush3.bf16.msra.mxu1 %v3057_v55 }
 0x706   : > { %2865 = vmatprep.subr.bf16.mxu1 %v3130_v6 }
 0x7c7   : > { %v1271_v28 = vpop.f32.mrb[20].mxu1 }
 0x7c8   : > { %1500 = vrot.lane.b32.xlu0 %v1271_v28, %s3134_s23  ;;  %v2817_v29 = vpop.f32.mrb[21].mxu1  ;;  %v3076_v28 = vld [vmem:[%s3795_s8 + $0x38] sm:$0xff]  }
 0x7c9   : > { %v1274_v30 = vpop.f32.mrb[22].mxu1 }
 0x7ca   : > { %v2818_v31 = vpop.f32.mrb[23].mxu1 }
 0x7cf   : > { %v1382_v33 = vpop.f32.mrb[24].mxu1 }
 0x7d0   : > { %1504 = vrot.lane.b32.xlu1 %v1382_v33, %s3133_s20  ;;  %v2829_v34 = vpop.f32.mrb[25].mxu1 }
 0x7d1   : > { %v1385_v35 = vpop.f32.mrb[26].mxu1 }
 0x7d2   : > { %v2830_v36 = vpop.f32.mrb[27].mxu1 }
 0x7d3   : > { %v1627_v36 = vsub.s32 7, %v3355_v48 }
 0x7d7   : > { %v1493_v37 = vpop.f32.mrb[28].mxu1 }
 0x7d8   : > { %1508 = vrot.lane.b32.xlu0 %v1493_v37, %s3132_s19  ;;  %v2841_v38 = vpop.f32.mrb[29].mxu1  ;;  %v3654_v37 = vld [vmem:[%s3798_s11 + $0x8] sm:$0x7f] }
 0x7d9   : > { %v1496_v40 = vpop.f32.mrb[30].mxu1 }
 0x7da   : > { %v2842_v41 = vpop.f32.mrb[31].mxu1  ;;  %v1628_v40 = vrot.slane %v3360_v49, %v1627_v36  ;;  %v1888_v49 = vrot.slane %v3654_v37, %v640_v14  ;;  %v1655_v14 = vsub.s32 1, %v3355_v48 }
 0x83a   : > { %v1501_v42 = vpop.permute.xlu0 %1500 }
 0x83b   : > { %v1511_v44 = vsel %vm1055_vm1, %v3485_v18, %v1501_v42  ;;  %v3050_v18 = vld [vmem:[%s3796_s9 + $0x14] ss:$8 sps:$4 sm:$0xff]   ;;  %v1633_v42 = vrot.slane %v3654_v37, %v3363_v50  ;;  %v1894_v50 = vrot.slane %v3654_v37, %v919_v27  ;;  %v1656_v27 = vrot.slane %v3654_v37, %v1655_v14 }
 0x842   : > { %v1505_v43 = vpop.permute.xlu1 %1504 }
 0x843   : > { %v1513_v46 = vsel %vm1512_vm4, %v1511_v44, %v1505_v43 }
 0x84a   : > { %v1509_v47 = vpop.permute.xlu0 %1508 }
 0x84b   : > { %v1515_v51 = vsel %vm1514_vm5, %v1513_v46, %v1509_v47 }
 0x84c   : > { %v1516_v52 = vpack.c.bf16 %v1515_v51, %v1515_v51 }
 0x84e   : > { %2860 = vmatmul.mubr.bf16.vlgmr.msra.gmra.mrb[16].mxu0 %v1516_v52 }
 0x84f   : > { %1874 = vmatprep.mubr.bf16.mxu0 %v3129_v2  ;;  %1843 = vmatpush1.bf16.msra.mxu0 %v3045_v53  ;;  %v3048_v2 = vld [vmem:[%s3796_s9 + $0x10] ss:$8 sps:$4 sm:$0xff]  }
 0x850   : > { %1844 = vmatprep.subr.bf16.mxu0 %v3050_v18 }
 0x853   : > { %1845 = vmatpush1.bf16.msra.mxu0 %v3048_v2 }
 0x854   : > { %1846 = vmatprep.subr.bf16.mxu0 %v3053_v56 }
 0x857   : > { %1847 = vmatpush1.bf16.msra.mxu0 %v3051_v57 }
 0x858   : > { %1848 = vmatprep.subr.bf16.mxu0 %v3056_v58 }
 0x85b   : > { %1849 = vmatpush1.bf16.msra.mxu0 %v3054_v59 }
 0x85c   : > { %1850 = vmatprep.subr.bf16.mxu0 %v3060_v7 }
 0x85f   : > { %1851 = vmatpush1.bf16.msra.mxu0 %v3058_v8 }
 0x860   : > { %1852 = vmatprep.subr.bf16.mxu0 %v3064_v45 }
 0x863   : > { %1853 = vmatpush1.bf16.msra.mxu0 %v3062_v9 }
 0x864   : > { %1854 = vmatprep.subr.bf16.mxu0 %v3068_v11 }
 0x867   : > { %1855 = vmatpush1.bf16.msra.mxu0 %v3066_v12 }
 0x868   : > { %1856 = vmatprep.subr.bf16.mxu0 %v3072_v15 }
 0x86b   : > { %1857 = vmatpush1.bf16.msra.mxu0 %v3070_v16 }
 0x86c   : > { %2907 = vmatprep.subr.bf16.mxu0 %v3130_v6 }
 0x86e   : > { %1875 = vmatmul.mubr.bf16.vlgmr.msra.gmra.mrb[20].mxu0 %v1761_v23 }
 0x86f   : > { %2909 = vmatprep.mubr.msk.bf16.mxu0 %vm3131_vm0, %v3130_v6 }
 0x921   : > { %v1599_v62 = vpop.f32.mrb[16].mxu0 }
 0x922   : > { %v1605_v63 = vadd.f32 %v1599_v62, %v3423_v20  ;;  %v2861_v0 = vpop.f32.mrb[17].mxu0  ;;  %v3061_v20 = vld [vmem:[%s3795_s8 + $0x8] sm:$0xff]  }
 0x923   : > { %v1602_v1 = vpop.f32.mrb[18].mxu0  ;;  %2866 = vmatpush3.bf16.msra.mxu1 %v3061_v20 }
 0x924   : > { %v3586_v3 = vadd.f32 %v1609_v61, %v1605_v63  ;;  %v2862_v4 = vpop.f32.mrb[19].mxu0  ;;  %2867 = vmatprep.subr.bf16.mxu1 %v3130_v6 }
 0x926   : > { %1611 = vadd.xlane.f32.xlu1 %v3586_v3  ;;  %v1615_v5 = vmul.f32 %v3586_v3, %v3586_v3 }
 0x927   : > { %2868 = vmatpush3.bf16.msra.mxu1 %v3065_v10 }
 0x928   : > { %1616 = vadd.xlane.f32.xlu0 %v1615_v5  ;;  %2869 = vmatprep.subr.bf16.mxu1 %v3130_v6 }
 0x92b   : > { %2870 = vmatpush3.bf16.msra.mxu1 %v3069_v13 }
 0x92c   : > { %2871 = vmatprep.subr.bf16.mxu1 %v3130_v6 }
 0x92f   : > { %2872 = vmatpush3.bf16.msra.mxu1 %v3073_v21 }
 0x930   : > { %2873 = vmatprep.subr.bf16.mxu1 %v3130_v6 }
 0x933   : > { %2874 = vmatpush3.bf16.msra.mxu1 %v3074_v24 }
 0x934   : > { %2875 = vmatprep.subr.bf16.mxu1 %v3130_v6 }
 0x937   : > { %2876 = vmatpush3.bf16.msra.mxu1 %v3075_v25 }
 0x938   : > { %2877 = vmatprep.subr.bf16.mxu1 %v3130_v6 }
 0x93b   : > { %2878 = vmatpush3.bf16.msra.mxu1 %v3076_v28 }
 0x93c   : > { %2883 = vmatprep.subr.bf16.mxu1 %v3130_v6 }
 0x941   : > { %v1876_v52 = vpop.f32.mrb[20].mxu0 }
 0x942   : > { %v1889_v53 = vadd.f32 %v1888_v49, %v1876_v52  ;;  %v1878_v54 = vpop.f32.mrb[21].mxu0 }
 0x943   : > { %v1895_v18 = vadd.f32 %v1894_v50, %v1878_v54  ;;  %v1880_v55 = vpop.f32.mrb[22].mxu0 }
 0x944   : > { %v1890_v2 = vadd.f32 %v1888_v49, %v1880_v55 }
 0x946   : > { %v1914_v57 = vpack.c.bf16 %v1890_v2, %v1889_v53 }
 0x948   : > { %v1920_v59 = vsel %vm1055_vm1, %v1914_v57, 0 }
 0x9b3   : > { %v1612_v29 = vpop.xlane.xlu1 %1611 }
 0x9b4   : > { %v1614_v30 = vmul.f32 0.0078125, %v1612_v29 }
 0x9b5   : > { %v1617_v31 = vpop.xlane.xlu0 %1616 }
 0x9b6   : > { %v1619_v32 = vmul.f32 %v1614_v30, %v1614_v30  ;;  %v1618_v33 = vmul.f32 0.0078125, %v1617_v31  ;;  %v1621_v38 = vsub.f32 %v3586_v3, %v1614_v30 }
 0x9b8   : > { %v1620_v34 = vsub.f32 %v1618_v33, %v1619_v32 }
 0x9ba   : > { %v1622_v35 = vadd.f32 1e-05, %v1620_v34 }
 0x9bc   : > { %3101 = vrsqrt.f32 %v1622_v35 }
 0x9c6   : > { %v3102_v41 = vpop.eup %3101 }
 0x9c7   : > { %v1624_v43 = vmul.f32 %v3102_v41, %v1621_v38 }
 0x9c9   : > { %v1629_v44 = vmul.f32 %v1628_v40, %v1624_v43 }
 0x9cb   : > { %v3660_v46 = vadd.f32 %v1633_v42, %v1629_v44 }
 0x9cd   : > { %v1635_v47 = vadd.f32 %v3660_v46, %v3425_v22  ;;  %v1882_v22 = vpop.f32.mrb[23].mxu0 }
 0x9ce   : > { %v1896_v56 = vadd.f32 %v1894_v50, %v1882_v22 }
 0x9cf   : > { %v1652_v51 = vpack.c.bf16 %v1635_v47, %v1635_v47 }
 0x9d0   : > { %v3672_v58 = vpack.c.bf16 %v1896_v56, %v1895_v18 }
 0x9d1   : > { %2880 = vmatmul.mubr.bf16.vlgmr.msra.gmra.mrb[32].mxu1 %v1652_v51 }
 0x9d2   : > { %2885 = vmatprep.mubr.msk.bf16.mxu1 %vm3131_vm0, %v3130_v6  ;;  %2884 = vmatpush3.bf16.xpose.msra.mxu1 %v1920_v59 }
 0x9d3   : > { %2889 = vmatprep.subr.bf16.mxu1 %v3130_v6 }
 0xaa4   : > { %v1739_v61 = vpop.f32.mrb[32].mxu1 }
 0xaa5   : > { %v1740_v62 = vadd.f32 %v1739_v61, %v1656_v27  ;;  %v2881_v63 = vpop.f32.mrb[33].mxu1 }
 0xaa6   : > { %v1742_v0 = vpop.f32.mrb[34].mxu1 }
 0xaa7   : > { %v1913_v1 = vpack.c.bf16 %v1740_v62, %v1740_v62  ;;  %v2882_v3 = vpop.f32.mrb[35].mxu1 }
 0xaa9   : > { %2886 = vmatmul.mubr.msk.bf16.vlgmr.msra.gmra.mrb[36].mxu1 %vm1055_vm1, %v1913_v1 }
 0xaaa   : > { %2890 = vmatpush3.bf16.msra.mxu1 %v3672_v58  ;;  %2891 = vmatprep.mubr.msk.bf16.mxu1 %vm3131_vm0, %v3130_v6 }
 0xaab   : > { %2895 = vmatprep.subr.bf16.mxu1 %v3130_v6 }
 0xb7c   : > { %v1956_v4 = vpop.f32.mrb[36].mxu1 }
 0xb7d   : > { %v1962_v5 = vmul.f32 0.17677669, %v1956_v4  ;;  %v2887_v7 = vpop.f32.mrb[37].mxu1 }
 0xb7e   : > { %v1959_v8 = vpop.f32.mrb[38].mxu1 }
 0xb7f   : > { %v2888_v20 = vpop.f32.mrb[39].mxu1  ;;  %v1964_v45 = vsel %vm1963_vm6, %v1962_v5, -inf }
 0xb80   : > { %1965 = vmax.xlane.f32.xlu0 %v1964_v45 }
 0xb96   : > { %2023 = vrot.lane.b32.xlu0 %v1914_v57, %s3132_s19 }
 0xb9a   : > { %2131 = vrot.lane.b32.xlu0 %v1913_v1, %s3133_s20 }
 0xb9e   : > { %2240 = vrot.lane.b32.xlu0 %v1913_v1, %s3134_s23 }
 0xc0d   : > { %v1966_v9 = vpop.xlane.xlu0 %1965 }
 0xc0e   : > { %v1967_v10 = vsub.f32 %v1962_v5, %v1966_v9 }
 0xc10   : > { %v1968_v11 = vmul.f32 1.442695, %v1967_v10 }
 0xc11   : > { %v2024_v21 = vpop.permute.xlu0 %2023 }
 0xc12   : > { %3103 = vpow2.f32 %v1968_v11  ;;  %v2029_v29 = vsel %vm1055_vm1, %v2024_v21, 0 }
 0xc15   : > { %v2132_v30 = vpop.permute.xlu0 %2131 }
 0xc19   : > { %v2241_v32 = vpop.permute.xlu0 %2240 }
 0xc1c   : > { %v3104_v12 = vpop.eup %3103 }
 0xc1d   : > { %v1970_v13 = vsel %vm1963_vm6, %v3104_v12, 0.0 }
 0xc1e   : > { %1971 = vadd.xlane.f32.xlu1 %v1970_v13 }
 0xc2f   : > { %2020 = vrot.lane.b32.xlu1 %v1913_v1, %s3132_s19 }
 0xc33   : > { %2133 = vrot.lane.b32.xlu1 %v1914_v57, %s3133_s20 }
 0xc37   : > { %2242 = vrot.lane.b32.xlu1 %v1914_v57, %s3134_s23 }
 0xcab   : > { %v1972_v15 = vpop.xlane.xlu1 %1971 }
 0xcac   : > { %3105 = vrcp.f32 %v1972_v15 }
 0xcaf   : > { %v2021_v16 = vpop.permute.xlu1 %2020 }
 0xcb3   : > { %v2134_v17 = vpop.permute.xlu1 %2133 }
 0xcb4   : > { %v2139_v19 = vsel %vm1055_vm1, %v2134_v17, 0 }
 0xcb5   : > { %2908 = vmatpush3.bf16.xpose.msra.mxu0 %v2139_v19 }
 0xcb6   : > { %v3106_v23 = vpop.eup %3105  ;;  %2919 = vmatprep.subr.bf16.mxu0 %v3130_v6 }
 0xcb7   : > { %v1974_v24 = vmul.f32 %v3106_v23, %v3104_v12  ;;  %v2243_v25 = vpop.permute.xlu1 %2242 }
 0xcb8   : > { %v2248_v31 = vsel %vm1055_vm1, %v2243_v25, 0 }
 0xcb9   : > { %v1975_v28 = vpack.c.bf16 %v1974_v24, %v1974_v24 }
 0xcbb   : > { %2892 = vmatmul.mubr.msk.bf16.vlgmr.msra.gmra.mrb[40].mxu1 %vm1963_vm6, %v1975_v28  ;;  %v3077_v28 = vld [vmem:[%s3797_s10] sm:$0xff]  }
 0xcbc   : > { %2896 = vmatpush3.bf16.xpose.msra.mxu1 %v2029_v29  ;;  %2910 = vmatmul.mubr.msk.bf16.vlgmr.msra.gmra.mrb[24].mxu0 %vm1055_vm1, %v2132_v30  ;;  %v3078_v29 = vld [vmem:[%s3797_s10 + $0x8] sm:$0xff]   ;;  %v3079_v30 = vld [vmem:[%s3797_s10 + $0x10] sm:$0xff]  }
 0xcbd   : > { %2920 = vmatpush3.bf16.xpose.msra.mxu0 %v2248_v31  ;;  %2897 = vmatprep.mubr.msk.bf16.mxu1 %vm3131_vm0, %v3130_v6  ;;  %v3080_v31 = vld [vmem:[%s3797_s10 + $0x18] sm:$0xff]  }
 0xcbe   : > { %2921 = vmatprep.mubr.msk.bf16.mxu0 %vm3131_vm0, %v3130_v6  ;;  %2901 = vmatprep.subr.bf16.mxu1 %v3130_v6 }
 0xcbf   : > { %2931 = vmatprep.subr.bf16.mxu0 %v3130_v6 }
 0xcc3   : > { %2898 = vmatmul.mubr.msk.bf16.vlgmr.msra.gmra.mrb[44].mxu1 %vm1055_vm1, %v2021_v16 }
 0xcc4   : > { %2922 = vmatmul.mubr.msk.bf16.vlgmr.msra.gmra.mrb[28].mxu0 %vm1055_vm1, %v2241_v32  ;;  %2903 = vmatprep.mubr.msk.bf16.mxu1 %vm3131_vm0, %v3130_v6  ;;  %v3081_v32 = vld [vmem:[%s3797_s10 + $0x20] sm:$0xff]  }
 0xcc5   : > { %2947 = vmatprep.mubr.msk.bf16.mxu0 %vm3131_vm0, %v3130_v6  ;;  %2932 = vmatpush3.bf16.msra.mxu0 %v3077_v28 }
 0xcc6   : > { %2933 = vmatprep.subr.bf16.mxu0 %v3130_v6 }
 0xcc9   : > { %2934 = vmatpush3.bf16.msra.mxu0 %v3078_v29 }
 0xcca   : > { %2935 = vmatprep.subr.bf16.mxu0 %v3130_v6 }
 0xccd   : > { %2936 = vmatpush3.bf16.msra.mxu0 %v3079_v30 }
 0xcce   : > { %2937 = vmatprep.subr.bf16.mxu0 %v3130_v6 }
 0xcd1   : > { %2938 = vmatpush3.bf16.msra.mxu0 %v3080_v31 }
 0xcd2   : > { %2939 = vmatprep.subr.bf16.mxu0 %v3130_v6 }
 0xcd5   : > { %2940 = vmatpush3.bf16.msra.mxu0 %v3081_v32 }
 0xcd6   : > { %2941 = vmatprep.subr.bf16.mxu0 %v3130_v6 }
 0xd8e   : > { %v3709_v33 = vpop.f32.mrb[40].mxu1 }
 0xd8f   : > { %v2893_v34 = vpop.f32.mrb[41].mxu1  ;;  %v2175_v35 = vpop.f32.mrb[24].mxu0 }
 0xd90   : > { %v2181_v36 = vmul.f32 0.17677669, %v2175_v35  ;;  %v2016_v38 = vpop.f32.mrb[42].mxu1  ;;  %v2911_v40 = vpop.f32.mrb[25].mxu0  ;;  %v3082_v34 = vld [vmem:[%s3797_s10 + $0x28] sm:$0xff]   ;;  %v3083_v35 = vld [vmem:[%s3797_s10 + $0x30] sm:$0xff]  }
 0xd91   : > { %v2894_v41 = vpop.f32.mrb[43].mxu1  ;;  %v2178_v42 = vpop.f32.mrb[26].mxu0  ;;  %2942 = vmatpush3.bf16.msra.mxu0 %v3082_v34 }
 0xd92   : > { %v2912_v43 = vpop.f32.mrb[27].mxu0  ;;  %v2182_v44 = vsel %vm1963_vm6, %v2181_v36, -inf  ;;  %2943 = vmatprep.subr.bf16.mxu0 %v3130_v6  ;;  %v3084_v42 = vld [vmem:[%s3797_s10 + $0x38] sm:$0xff]  }
 0xd93   : > { %2183 = vmax.xlane.f32.xlu0 %v2182_v44 }
 0xd95   : > { %2944 = vmatpush3.bf16.msra.mxu0 %v3083_v35 }
 0xd96   : > { %v2065_v47 = vpop.f32.mrb[44].mxu1  ;;  %2945 = vmatprep.subr.bf16.mxu0 %v3130_v6 }
 0xd97   : > { %v2071_v51 = vmul.f32 0.17677669, %v2065_v47  ;;  %v2899_v49 = vpop.f32.mrb[45].mxu1  ;;  %v2284_v50 = vpop.f32.mrb[28].mxu0 }
 0xd98   : > { %v2290_v52 = vmul.f32 0.17677669, %v2284_v50  ;;  %v2068_v53 = vpop.f32.mrb[46].mxu1  ;;  %v2923_v54 = vpop.f32.mrb[29].mxu0 }
 0xd99   : > { %v2900_v18 = vpop.f32.mrb[47].mxu1  ;;  %v2287_v55 = vpop.f32.mrb[30].mxu0  ;;  %v2072_v2 = vsel %vm1963_vm6, %v2071_v51, -inf  ;;  %2946 = vmatpush3.bf16.msra.mxu0 %v3084_v42 }
 0xd9a   : > { %v2924_v22 = vpop.f32.mrb[31].mxu0  ;;  %2073 = vmax.xlane.f32.xlu1 %v2072_v2  ;;  %v2291_v56 = vsel %vm1963_vm6, %v2290_v52, -inf }
 0xd9b   : > { %2292 = vmax.xlane.f32.xlu0 %v2291_v56 }
 0xe20   : > { %v2184_v57 = vpop.xlane.xlu0 %2183 }
 0xe21   : > { %v2185_v59 = vsub.f32 %v2181_v36, %v2184_v57  ;;  %v2457_v57 = vrot.slane %v3654_v37, %v924_v26  ;;  %v2475_v26 = vrot.slane %v3654_v37, %v946_v39 }
 0xe23   : > { %v2186_v14 = vmul.f32 1.442695, %v2185_v59 }
 0xe25   : > { %3107 = vpow2.f32 %v2186_v14 }
 0xe27   : > { %v2074_v27 = vpop.xlane.xlu1 %2073 }
 0xe28   : > { %v2075_v61 = vsub.f32 %v2071_v51, %v2074_v27  ;;  %v2293_v62 = vpop.xlane.xlu0 %2292 }
 0xe29   : > { %v2294_v63 = vsub.f32 %v2290_v52, %v2293_v62 }
 0xe2a   : > { %v2076_v0 = vmul.f32 1.442695, %v2075_v61 }
 0xe2b   : > { %v2295_v1 = vmul.f32 1.442695, %v2294_v63 }
 0xe2d   : > { %3109 = vpow2.f32 %v2295_v1 }
 0xe2e   : > { %3111 = vpow2.f32 %v2076_v0 }
 0xe2f   : > { %v3108_v3 = vpop.eup %3107 }
 0xe30   : > { %v2188_v4 = vsel %vm1963_vm6, %v3108_v3, 0.0 }
 0xe31   : > { %2189 = vadd.xlane.f32.xlu0 %v2188_v4 }
 0xe37   : > { %v3110_v5 = vpop.eup %3109 }
 0xe38   : > { %v2297_v7 = vsel %vm1963_vm6, %v3110_v5, 0.0  ;;  %v3112_v8 = vpop.eup %3111 }
 0xe39   : > { %2298 = vadd.xlane.f32.xlu1 %v2297_v7  ;;  %v2078_v20 = vsel %vm1963_vm6, %v3112_v8, 0.0 }
 0xe3d   : > { %2079 = vadd.xlane.f32.xlu1 %v2078_v20 }
 0xe47   : > { %2085 = vrot.lane.b32.xlu0 %v3672_v58, %s3132_s19 }
 0xe4e   : > { %2194 = vrot.lane.b32.xlu1 %v3672_v58, %s3133_s20 }
 0xe52   : > { %2303 = vrot.lane.b32.xlu1 %v3672_v58, %s3134_s23 }
 0xebe   : > { %v2190_v45 = vpop.xlane.xlu0 %2189 }
 0xec2   : > { %v2086_v9 = vpop.permute.xlu0 %2085 }
 0xec3   : > { %2902 = vmatpush3.bf16.msra.mxu1 %v2086_v9 }
 0xec4   : > { %2913 = vmatprep.subr.bf16.mxu1 %v3130_v6 }
 0xec6   : > { %v2299_v10 = vpop.xlane.xlu1 %2298 }
 0xeca   : > { %v2080_v11 = vpop.xlane.xlu1 %2079 }
 0xecb   : > { %3113 = vrcp.f32 %v2080_v11 }
 0xecc   : > { %3115 = vrcp.f32 %v2190_v45  ;;  %v2480_v45 = vrot.slane %v3654_v37, %v1608_v60 }
 0xecd   : > { %3117 = vrcp.f32 %v2299_v10 }
 0xece   : > { %v2195_v17 = vpop.permute.xlu1 %2194 }
 0xed2   : > { %v2304_v23 = vpop.permute.xlu1 %2303 }
 0xed5   : > { %v3114_v12 = vpop.eup %3113 }
 0xed6   : > { %v2082_v13 = vmul.f32 %v3114_v12, %v3112_v8  ;;  %v3116_v16 = vpop.eup %3115 }
 0xed7   : > { %v2192_v58 = vmul.f32 %v3116_v16, %v3108_v3  ;;  %v3118_v21 = vpop.eup %3117 }
 0xed8   : > { %v2083_v15 = vpack.c.bf16 %v2082_v13, %v2082_v13  ;;  %v2301_v24 = vmul.f32 %v3118_v21, %v3110_v5 }
 0xed9   : > { %v2193_v19 = vpack.c.bf16 %v2192_v58, %v2192_v58 }
 0xeda   : > { %2904 = vmatmul.mubr.msk.bf16.vlgmr.msra.gmra.mrb[48].mxu1 %vm1963_vm6, %v2083_v15  ;;  %v2302_v25 = vpack.c.bf16 %v2301_v24, %v2301_v24 }
 0xedb   : > { %2914 = vmatpush3.bf16.msra.mxu1 %v2195_v17  ;;  %2915 = vmatprep.mubr.msk.bf16.mxu1 %vm3131_vm0, %v3130_v6 }
 0xedc   : > { %2925 = vmatprep.subr.bf16.mxu1 %v3130_v6 }
 0xee2   : > { %2916 = vmatmul.mubr.msk.bf16.vlgmr.msra.gmra.mrb[52].mxu1 %vm1963_vm6, %v2193_v19 }
 0xee3   : > { %2926 = vmatpush3.bf16.msra.mxu1 %v2304_v23  ;;  %2927 = vmatprep.mubr.msk.bf16.mxu1 %vm3131_vm0, %v3130_v6 }
 0xeea   : > { %2928 = vmatmul.mubr.msk.bf16.vlgmr.msra.gmra.mrb[56].mxu1 %vm1963_vm6, %v2302_v25 }
 0xfad   : > { %v2125_v36 = vpop.f32.mrb[48].mxu1 }
 0xfae   : > { %2350 = vrot.lane.b32.xlu0 %v2125_v36, %s3134_s23  ;;  %v2905_v38 = vpop.f32.mrb[49].mxu1  ;;  %s445_s23 = scalar_lea.vmem %s3799_s12, %s3270_s27 }
 0xfaf   : > { %v2128_v40 = vpop.f32.mrb[50].mxu1 }
 0xfb0   : > { %v2906_v41 = vpop.f32.mrb[51].mxu1 }
 0xfb5   : > { %v2234_v43 = vpop.f32.mrb[52].mxu1 }
 0xfb6   : > { %2354 = vrot.lane.b32.xlu1 %v2234_v43, %s3133_s20  ;;  %v2917_v44 = vpop.f32.mrb[53].mxu1 }
 0xfb7   : > { %v2237_v47 = vpop.f32.mrb[54].mxu1 }
 0xfb8   : > { %v2918_v51 = vpop.f32.mrb[55].mxu1 }
 0xfbd   : > { %v2343_v49 = vpop.f32.mrb[56].mxu1 }
 0xfbe   : > { %2358 = vrot.lane.b32.xlu0 %v2343_v49, %s3132_s19  ;;  %v2929_v50 = vpop.f32.mrb[57].mxu1 }
 0xfbf   : > { %v2346_v52 = vpop.f32.mrb[58].mxu1 }
 0xfc0   : > { %v2930_v53 = vpop.f32.mrb[59].mxu1 }
0x1020   : > { %v2351_v54 = vpop.permute.xlu0 %2350 }
0x1021   : > { %v2361_v18 = vsel %vm1055_vm1, %v3709_v33, %v2351_v54 }
0x1028   : > { %v2355_v6 = vpop.permute.xlu1 %2354 }
0x1029   : > { %v2362_v55 = vsel %vm1512_vm4, %v2361_v18, %v2355_v6 }
0x1030   : > { %v2359_v2 = vpop.permute.xlu0 %2358 }
0x1031   : > { %v2363_v22 = vsel %vm1514_vm5, %v2362_v55, %v2359_v2 }
0x1032   : > { %v2364_v56 = vpack.c.bf16 %v2363_v22, %v2363_v22 }
0x1034   : > { %2948 = vmatmul.mubr.bf16.vlgmr.msra.gmra.mrb[32].mxu0 %v2364_v56 }
0x1107   : > { %v2447_v59 = vpop.f32.mrb[32].mxu0 }
0x1108   : > { %v2453_v14 = vadd.f32 %v2447_v59, %v3660_v46  ;;  %v2949_v27 = vpop.f32.mrb[33].mxu0 }
0x1109   : > { %v2450_v61 = vpop.f32.mrb[34].mxu0 }
0x110a   : > { %v2458_v62 = vadd.f32 %v2457_v57, %v2453_v14  ;;  %v2950_v63 = vpop.f32.mrb[35].mxu0 }
0x110c   : > { %2459 = vadd.xlane.f32.xlu1 %v2458_v62  ;;  %v2462_v33 = vmul.f32 %v2458_v62, %v2458_v62 }
0x110e   : > { %2463 = vadd.xlane.f32.xlu0 %v2462_v33 }
0x1199   : > { %v2460_v0 = vpop.xlane.xlu1 %2459 }
0x119a   : > { %v2461_v1 = vmul.f32 0.0078125, %v2460_v0 }
0x119b   : > { %v2464_v3 = vpop.xlane.xlu0 %2463 }
0x119c   : > { %v2466_v4 = vmul.f32 %v2461_v1, %v2461_v1  ;;  %v2465_v5 = vmul.f32 0.0078125, %v2464_v3  ;;  %v2468_v46 = vsub.f32 %v2458_v62, %v2461_v1 }
0x119e   : > { %v2467_v7 = vsub.f32 %v2465_v5, %v2466_v4 }
0x11a0   : > { %v2469_v8 = vadd.f32 1e-05, %v2467_v7 }
0x11a2   : > { %3119 = vrsqrt.f32 %v2469_v8 }
0x11ac   : > { %v3120_v20 = vpop.eup %3119 }
0x11ad   : > { %v2471_v9 = vmul.f32 %v3120_v20, %v2468_v46 }
0x11af   : > { %v2476_v10 = vmul.f32 %v2475_v26, %v2471_v9 }
0x11b1   : > { %v2481_v11 = vadd.f32 %v2480_v45, %v2476_v10 }
0x11b3   : > { %2482 = vst [vmem:[%s445_s23] sm:$0xff] %v2481_v11 }
0x11b4 PF: > { %s22_s21 = sadd.s32 1, %s3127_s21  }
0x11b5   : > { %p19_p4 = scmp.ge.s32.totalorder %s22_s21, 4  }
0x11b7   :  { %21 = sbr.rel (!%p19_p4) target bundleno = 1 (0x1), region = 104 }

</bundles_post_ra>
